<compile_context>
chip_gen: v7x
topology: tpu7x:2x2x1
jax: 0.10.0
libtpu: 0.0.40
codegen_flags: <defaults>
</compile_context>

<pallas_src>
import jax
import jax.numpy as jnp
from jax.experimental import pallas as pl
from jax.experimental.pallas import tpu as pltpu


def cbam_block(x, w1, w2, w_sa, *, block_bytes_target=2 << 20):
    """CBAM forward.

    x    : (B, C, H, W) float32
    w1   : (Cr, C)   = Conv2d(C, Cr, 1, bias=False).weight squeezed
    w2   : (C, Cr)   = Conv2d(Cr, C, 1, bias=False).weight squeezed
    w_sa : (2, K, K) = Conv2d(2, 1, K, padding=K//2, bias=False).weight squeezed
    """
    B, C, H, W = x.shape
    Cr = w1.shape[0]
    K = w_sa.shape[-1]
    p = K // 2
    HW = H * W
    Hp, Wp = H + 2 * p, W + 2 * p

    # ---- batch tiling: several images per grid step ------------------------
    per_img_bytes = C * HW * x.dtype.itemsize
    bt = int(max(1, min(B, block_bytes_target // per_img_bytes)))
    while B % bt:           # largest divisor of B not exceeding the byte target
        bt -= 1
    Bt = bt

    # ---- lane-dense layout: flatten H*W onto the lane axis -----------------
    x3 = x.reshape(B, C, HW)
    w1_k = jnp.transpose(w1)          # (C, Cr)  resident in VMEM
    w2_k = jnp.transpose(w2)          # (Cr, C)  resident in VMEM
    wsa_flat = w_sa.reshape(-1)       # (2*K*K,) -> SMEM scalars

    def kernel(x_ref, w1_ref, w2_ref, wsa_ref, o_ref, pad_ref):
        # x_ref/o_ref : (Bt, C, HW)  lane-dense block (HW on the lane axis)
        # w1_ref      : (C, Cr)      excitation fc1 (pre-transposed, resident)
        # w2_ref      : (Cr, C)      excitation fc2 (pre-transposed, resident)
        # wsa_ref     : (2*K*K,)     SMEM 7x7 conv taps (row-major flat)
        # pad_ref     : (Bt, 2, Hp, Wp) VMEM scratch: zero-padded mean/max maps
        x_blk = x_ref[...]                                       # (Bt, C, HW)

        # ---------------- channel attention ------------------------------
        # Spatial squeeze as a single MXU matmul against a ones vector.
        ones_hw = jnp.ones((HW, 1), jnp.float32)
        sq = jnp.dot(x_blk.reshape(Bt * C, HW), ones_hw,
                     preferred_element_type=jnp.float32)         # (Bt*C, 1)
        sq = sq.reshape(Bt, C) * (1.0 / HW)                      # (Bt, C)
        hmid = jnp.maximum(
            jnp.dot(sq, w1_ref[...], preferred_element_type=jnp.float32), 0.0)
        ca = jax.nn.sigmoid(
            jnp.dot(hmid, w2_ref[...],
                    preferred_element_type=jnp.float32))         # (Bt, C)

        # Write gated activations straight into the output block; the spatial
        # gate below is an in-place RMW (no full-size temporary kept live).
        gated = x_blk * ca[:, :, None]                           # (Bt, C, HW)
        o_ref[...] = gated

        # ---------------- spatial attention ------------------------------
        # Channel-wise mean/max (reduce over the C axis -> cheap VPU work),
        # reshaped to 2-D (H, W) maps only for the tiny 7x7 conv.
        avg_map = (jnp.sum(gated, axis=1) * (1.0 / C)).reshape(Bt, H, W)
        max_map = jnp.max(gated, axis=1).reshape(Bt, H, W)

        # Zero only the halo strips of the padded scratch (interior is fully
        # overwritten). Done every step: safe under "parallel" semantics.
        zrow = jnp.zeros((Bt, 2, p, Wp), jnp.float32)
        zcol = jnp.zeros((Bt, 2, H, p), jnp.float32)
        pad_ref[:, :, 0:p, :] = zrow
        pad_ref[:, :, p + H:Hp, :] = zrow
        pad_ref[:, :, p:p + H, 0:p] = zcol
        pad_ref[:, :, p:p + H, p + W:Wp] = zcol
        pad_ref[:, 0, p:p + H, p:p + W] = avg_map
        pad_ref[:, 1, p:p + H, p:p + W] = max_map

        # 7x7 cross-correlation (PyTorch Conv2d semantics):
        #   out[h,w] += W[c,kh,kw] * padded[c, h+kh, w+kw]
        # Load each padded row band once (2*K = 14 VMEM loads); the K lane
        # shifts per band are sliced from the in-register band value, and the
        # accumulation is SMEM-scalar * tile FMAs on the VPU.
        acc = jnp.zeros((Bt, H, W), jnp.float32)
        for c in range(2):
            for kh in range(K):
                band = pad_ref[:, c, kh:kh + H, :]               # (Bt, H, Wp)
                for kw in range(K):
                    wv = wsa_ref[c * K * K + kh * K + kw]        # SMEM scalar
                    acc = acc + wv * band[:, :, kw:kw + W]
        sa = jax.nn.sigmoid(acc).reshape(Bt, HW)                 # (Bt, HW)

        # In-place per-pixel gate on the lane-dense output block.
        o_ref[...] = o_ref[...] * sa[:, None, :]

    elems = B * C * HW
    cost = pl.CostEstimate(
        flops=int(2 * elems                      # squeeze (ones matmul)
                  + 4 * B * C * Cr               # excitation MLP
                  + elems                        # channel gate
                  + 2 * elems                    # channel-wise mean + max
                  + 4 * B * HW * K * K           # 7x7 conv (2 maps, FMA = 2)
                  + elems),                      # spatial gate
        transcendentals=int(B * C + B * HW),     # sigmoids
        bytes_accessed=int(2 * elems * 4 + 2 * C * Cr * 4 + 2 * K * K * 4),
    )

    out3 = pl.pallas_call(
        kernel,
        out_shape=jax.ShapeDtypeStruct((B, C, HW), x.dtype),
        grid=(B // Bt,),
        in_specs=[
            pl.BlockSpec((Bt, C, HW), lambda b: (b, 0, 0)),       # lane-dense x
            pl.BlockSpec((C, Cr), lambda b: (0, 0)),              # resident fc1
            pl.BlockSpec((Cr, C), lambda b: (0, 0)),              # resident fc2
            pl.BlockSpec(memory_space=pltpu.MemorySpace.SMEM),    # conv taps
        ],
        out_specs=pl.BlockSpec((Bt, C, HW), lambda b: (b, 0, 0)),
        scratch_shapes=[pltpu.VMEM((Bt, 2, Hp, Wp), jnp.float32)],
        compiler_params=pltpu.CompilerParams(
            dimension_semantics=("parallel",)),
        cost_estimate=cost,
    )(x3, w1_k, w2_k, wsa_flat)

    return out3.reshape(B, C, H, W)


def _reference(x, w1, w2, w_sa):
    """Pure-JAX reference mirroring the PyTorch CBAMBlock forward."""
    hi = jax.lax.Precision.HIGHEST
    sq = x.mean(axis=(2, 3))                                       # (B, C)
    h = jnp.maximum(jnp.dot(sq, w1.T, precision=hi), 0.0)          # (B, Cr)
    ca = jax.nn.sigmoid(jnp.dot(h, w2.T, precision=hi))            # (B, C)
    x = x * ca[:, :, None, None]

    avg_map = jnp.mean(x, axis=1, keepdims=True)                   # (B,1,H,W)
    max_map = jnp.max(x, axis=1, keepdims=True)                    # (B,1,H,W)
    sa_in = jnp.concatenate([avg_map, max_map], axis=1)            # (B,2,H,W)
    logits = jax.lax.conv_general_dilated(
        sa_in, w_sa[None],                                         # (1,2,K,K)
        window_strides=(1, 1), padding="SAME",
        dimension_numbers=("NCHW", "OIHW", "NCHW"), precision=hi)
    sa = jax.nn.sigmoid(logits)                                    # (B,1,H,W)
    return x * sa


if __name__ == "__main__":
    B, C, H, W = 2, 4, 16, 16
    reduction = 2                 # default 16 would zero-out Cr for C=4
    Cr = C // reduction
    K = 7

    key = jax.random.PRNGKey(0)
    kx, k1, k2, k3 = jax.random.split(key, 4)

    x = jax.random.normal(kx, (B, C, H, W), dtype=jnp.float32)
    # Weights in PyTorch-native (out, in[, kh, kw]) orientation, squeezed.
    w1 = jax.random.normal(k1, (Cr, C), dtype=jnp.float32) * 0.5      # fc1
    w2 = jax.random.normal(k2, (C, Cr), dtype=jnp.float32) * 0.5      # fc2
    w_sa = jax.random.normal(k3, (2, K, K), dtype=jnp.float32) * 0.2  # 7x7

    out = jax.block_until_ready(cbam_block(x, w1, w2, w_sa))
    ref = jax.block_until_ready(_reference(x, w1, w2, w_sa))

    assert out.shape == (B, C, H, W)
    # Tolerance covers MXU f32 matmul pass differences vs. HIGHEST-precision
    # XLA reference; semantic errors would be orders of magnitude larger.
    assert jnp.allclose(out, ref, atol=2e-3, rtol=2e-3), "mismatch vs reference"

    print("KERNEL_OK")
</pallas_src>

<mosaic_0001>
module attributes {stable_mosaic.version = 11 : i64} {
  func.func @kernel(%arg0: i32, %arg1: memref<2x4x256xf32, #tpu.memory_space<vmem>>, %arg2: memref<4x2xf32, #tpu.memory_space<vmem>>, %arg3: memref<2x4xf32, #tpu.memory_space<vmem>>, %arg4: memref<98xf32, #tpu.memory_space<smem>>, %arg5: memref<2x4x256xf32, #tpu.memory_space<vmem>>, %arg6: memref<2x2x22x22xf32, #tpu.memory_space<vmem>>) attributes {dimension_semantics = [#tpu.dimension_semantics<parallel>], iteration_bounds = array<i64: 1>, scalar_prefetch = 0 : i64, scratch_operands = 1 : i64, tpu.core_type = #tpu.core_type<tc>, window_params = [{transform_indices = @transform_0, window_bounds = array<i64: 2, 4, 256>}, {pipeline_mode = #tpu.pipeline_mode<synchronous>, transform_indices = @transform_1, window_bounds = array<i64: 4, 2>}, {pipeline_mode = #tpu.pipeline_mode<synchronous>, transform_indices = @transform_2, window_bounds = array<i64: 2, 4>}, {transform_indices = @transform_3, window_bounds = array<i64: 98>}, {transform_indices = @transform_4, window_bounds = array<i64: 2, 4, 256>}]} {
    %c0 = arith.constant 0 : index
    %c0_0 = arith.constant 0 : index
    %c0_1 = arith.constant 0 : index
    %0 = vector.load %arg1[%c0, %c0_0, %c0_1] : memref<2x4x256xf32, #tpu.memory_space<vmem>>, vector<2x4x256xf32>
    %cst = arith.constant 1.000000e+00 : f32
    %1 = vector.broadcast %cst : f32 to vector<256x1xf32>
    %2 = vector.shape_cast %0 : vector<2x4x256xf32> to vector<8x256xf32>
    %cst_2 = arith.constant dense<0.000000e+00> : vector<8x1xf32>
    %3 = tpu.matmul %2, %1, %cst_2 {dimension_numbers = #tpu.dot_dimension_numbers<[1], [0], [0], [1], [0, 0, 1, 1], [], []>} : vector<8x256xf32>, vector<256x1xf32>, vector<8x1xf32> -> vector<8x1xf32>
    %4 = vector.shape_cast %3 : vector<8x1xf32> to vector<2x4xf32>
    %cst_3 = arith.constant 3.906250e-03 : f32
    %5 = vector.broadcast %cst_3 : f32 to vector<2x4xf32>
    %6 = arith.mulf %4, %5 : vector<2x4xf32>
    %c0_4 = arith.constant 0 : index
    %c0_5 = arith.constant 0 : index
    %7 = vector.load %arg2[%c0_4, %c0_5] : memref<4x2xf32, #tpu.memory_space<vmem>>, vector<4x2xf32>
    %cst_6 = arith.constant dense<0.000000e+00> : vector<2x2xf32>
    %8 = tpu.matmul %6, %7, %cst_6 {dimension_numbers = #tpu.dot_dimension_numbers<[1], [0], [0], [1], [0, 0, 1, 1], [], []>} : vector<2x4xf32>, vector<4x2xf32>, vector<2x2xf32> -> vector<2x2xf32>
    %cst_7 = arith.constant 0.000000e+00 : f32
    %9 = vector.broadcast %cst_7 : f32 to vector<2x2xf32>
    %10 = arith.maximumf %8, %9 : vector<2x2xf32>
    %c0_8 = arith.constant 0 : index
    %c0_9 = arith.constant 0 : index
    %11 = vector.load %arg3[%c0_8, %c0_9] : memref<2x4xf32, #tpu.memory_space<vmem>>, vector<2x4xf32>
    %cst_10 = arith.constant dense<0.000000e+00> : vector<2x4xf32>
    %12 = tpu.matmul %10, %11, %cst_10 {dimension_numbers = #tpu.dot_dimension_numbers<[1], [0], [0], [1], [0, 0, 1, 1], [], []>} : vector<2x2xf32>, vector<2x4xf32>, vector<2x4xf32> -> vector<2x4xf32>
    %13 = arith.negf %12 : vector<2x4xf32>
    %14 = math.exp %13 : vector<2x4xf32>
    %cst_11 = arith.constant 1.000000e+00 : f32
    %15 = vector.broadcast %cst_11 : f32 to vector<2x4xf32>
    %16 = arith.addf %15, %14 : vector<2x4xf32>
    %17 = arith.divf %15, %16 : vector<2x4xf32>
    %18 = vector.shape_cast %17 : vector<2x4xf32> to vector<2x4x1xf32>
    %19 = vector.broadcast %18 : vector<2x4x1xf32> to vector<2x4x256xf32>
    %20 = arith.mulf %0, %19 : vector<2x4x256xf32>
    %c0_12 = arith.constant 0 : index
    %c0_13 = arith.constant 0 : index
    %c0_14 = arith.constant 0 : index
    %21 = vector.load %arg5[%c0_12, %c0_13, %c0_14] : memref<2x4x256xf32, #tpu.memory_space<vmem>>, vector<2x4x256xf32>
    tpu.vector_store %arg5[%c0_12, %c0_13, %c0_14], %20 {strides = array<i32>} : memref<2x4x256xf32, #tpu.memory_space<vmem>>, vector<2x4x256xf32>,
    %cst_15 = arith.constant dense<0.000000e+00> : vector<2x256xf32>
    %22 = vector.multi_reduction <add>, %20, %cst_15 [1] : vector<2x4x256xf32> to vector<2x256xf32>
    %cst_16 = arith.constant 2.500000e-01 : f32
    %23 = vector.broadcast %cst_16 : f32 to vector<2x256xf32>
    %24 = arith.mulf %22, %23 : vector<2x256xf32>
    %25 = vector.shape_cast %24 : vector<2x256xf32> to vector<2x16x16xf32>
    %cst_17 = arith.constant dense<0xFF800000> : vector<2x256xf32>
    %26 = vector.multi_reduction <maximumf>, %20, %cst_17 [1] : vector<2x4x256xf32> to vector<2x256xf32>
    %27 = vector.shape_cast %26 : vector<2x256xf32> to vector<2x16x16xf32>
    %cst_18 = arith.constant 0.000000e+00 : f32
    %28 = vector.broadcast %cst_18 : f32 to vector<2x2x3x22xf32>
    %cst_19 = arith.constant 0.000000e+00 : f32
    %29 = vector.broadcast %cst_19 : f32 to vector<2x2x16x3xf32>
    %c0_20 = arith.constant 0 : index
    %c0_21 = arith.constant 0 : index
    %c0_22 = arith.constant 0 : index
    %c0_23 = arith.constant 0 : index
    %30 = vector.load %arg6[%c0_20, %c0_21, %c0_22, %c0_23] : memref<2x2x22x22xf32, #tpu.memory_space<vmem>>, vector<2x2x3x22xf32>
    tpu.vector_store %arg6[%c0_20, %c0_21, %c0_22, %c0_23], %28 {strides = array<i32>} : memref<2x2x22x22xf32, #tpu.memory_space<vmem>>, vector<2x2x3x22xf32>,
    %c0_24 = arith.constant 0 : index
    %c0_25 = arith.constant 0 : index
    %c19 = arith.constant 19 : index
    %c0_26 = arith.constant 0 : index
    %31 = vector.load %arg6[%c0_24, %c0_25, %c19, %c0_26] : memref<2x2x22x22xf32, #tpu.memory_space<vmem>>, vector<2x2x3x22xf32>
    tpu.vector_store %arg6[%c0_24, %c0_25, %c19, %c0_26], %28 {strides = array<i32>} : memref<2x2x22x22xf32, #tpu.memory_space<vmem>>, vector<2x2x3x22xf32>,
    %c0_27 = arith.constant 0 : index
    %c0_28 = arith.constant 0 : index
    %c3 = arith.constant 3 : index
    %c0_29 = arith.constant 0 : index
    %32 = vector.load %arg6[%c0_27, %c0_28, %c3, %c0_29] : memref<2x2x22x22xf32, #tpu.memory_space<vmem>>, vector<2x2x16x3xf32>
    tpu.vector_store %arg6[%c0_27, %c0_28, %c3, %c0_29], %29 {strides = array<i32>} : memref<2x2x22x22xf32, #tpu.memory_space<vmem>>, vector<2x2x16x3xf32>,
    %c0_30 = arith.constant 0 : index
    %c0_31 = arith.constant 0 : index
    %c3_32 = arith.constant 3 : index
    %c19_33 = arith.constant 19 : index
    %33 = vector.load %arg6[%c0_30, %c0_31, %c3_32, %c19_33] : memref<2x2x22x22xf32, #tpu.memory_space<vmem>>, vector<2x2x16x3xf32>
    tpu.vector_store %arg6[%c0_30, %c0_31, %c3_32, %c19_33], %29 {strides = array<i32>} : memref<2x2x22x22xf32, #tpu.memory_space<vmem>>, vector<2x2x16x3xf32>,
    %c0_34 = arith.constant 0 : index
    %c0_35 = arith.constant 0 : index
    %c3_36 = arith.constant 3 : index
    %c3_37 = arith.constant 3 : index
    %34 = vector.load %arg6[%c0_34, %c0_35, %c3_36, %c3_37] : memref<2x2x22x22xf32, #tpu.memory_space<vmem>>, vector<2x1x16x16xf32>
    %35 = vector.shape_cast %34 : vector<2x1x16x16xf32> to vector<2x16x16xf32>
    %36 = vector.shape_cast %25 : vector<2x16x16xf32> to vector<2x1x16x16xf32>
    tpu.vector_store %arg6[%c0_34, %c0_35, %c3_36, %c3_37], %36 {strides = array<i32>} : memref<2x2x22x22xf32, #tpu.memory_space<vmem>>, vector<2x1x16x16xf32>,
    %c0_38 = arith.constant 0 : index
    %c1 = arith.constant 1 : index
    %c3_39 = arith.constant 3 : index
    %c3_40 = arith.constant 3 : index
    %37 = vector.load %arg6[%c0_38, %c1, %c3_39, %c3_40] : memref<2x2x22x22xf32, #tpu.memory_space<vmem>>, vector<2x1x16x16xf32>
    %38 = vector.shape_cast %37 : vector<2x1x16x16xf32> to vector<2x16x16xf32>
    %39 = vector.shape_cast %27 : vector<2x16x16xf32> to vector<2x1x16x16xf32>
    tpu.vector_store %arg6[%c0_38, %c1, %c3_39, %c3_40], %39 {strides = array<i32>} : memref<2x2x22x22xf32, #tpu.memory_space<vmem>>, vector<2x1x16x16xf32>,
    %cst_41 = arith.constant 0.000000e+00 : f32
    %40 = vector.broadcast %cst_41 : f32 to vector<2x16x16xf32>
    %c0_42 = arith.constant 0 : index
    %c0_43 = arith.constant 0 : index
    %c0_44 = arith.constant 0 : index
    %c0_45 = arith.constant 0 : index
    %41 = vector.load %arg6[%c0_42, %c0_43, %c0_44, %c0_45] : memref<2x2x22x22xf32, #tpu.memory_space<vmem>>, vector<2x1x16x22xf32>
    %42 = vector.shape_cast %41 : vector<2x1x16x22xf32> to vector<2x16x22xf32>
    %c0_46 = arith.constant 0 : index
    %43 = memref.load %arg4[%c0_46] : memref<98xf32, #tpu.memory_space<smem>>
    %44 = vector.extract_strided_slice %42 {offsets = [0, 0, 0], sizes = [2, 16, 16], strides = [1, 1, 1]} : vector<2x16x22xf32> to vector<2x16x16xf32>
    %45 = vector.broadcast %43 : f32 to vector<2x16x16xf32>
    %46 = arith.mulf %45, %44 : vector<2x16x16xf32>
    %47 = arith.addf %40, %46 : vector<2x16x16xf32>
    %c1_47 = arith.constant 1 : index
    %48 = memref.load %arg4[%c1_47] : memref<98xf32, #tpu.memory_space<smem>>
    %49 = vector.extract_strided_slice %42 {offsets = [0, 0, 1], sizes = [2, 16, 16], strides = [1, 1, 1]} : vector<2x16x22xf32> to vector<2x16x16xf32>
    %50 = vector.broadcast %48 : f32 to vector<2x16x16xf32>
    %51 = arith.mulf %50, %49 : vector<2x16x16xf32>
    %52 = arith.addf %47, %51 : vector<2x16x16xf32>
    %c2 = arith.constant 2 : index
    %53 = memref.load %arg4[%c2] : memref<98xf32, #tpu.memory_space<smem>>
    %54 = vector.extract_strided_slice %42 {offsets = [0, 0, 2], sizes = [2, 16, 16], strides = [1, 1, 1]} : vector<2x16x22xf32> to vector<2x16x16xf32>
    %55 = vector.broadcast %53 : f32 to vector<2x16x16xf32>
    %56 = arith.mulf %55, %54 : vector<2x16x16xf32>
    %57 = arith.addf %52, %56 : vector<2x16x16xf32>
    %c3_48 = arith.constant 3 : index
    %58 = memref.load %arg4[%c3_48] : memref<98xf32, #tpu.memory_space<smem>>
    %59 = vector.extract_strided_slice %42 {offsets = [0, 0, 3], sizes = [2, 16, 16], strides = [1, 1, 1]} : vector<2x16x22xf32> to vector<2x16x16xf32>
    %60 = vector.broadcast %58 : f32 to vector<2x16x16xf32>
    %61 = arith.mulf %60, %59 : vector<2x16x16xf32>
    %62 = arith.addf %57, %61 : vector<2x16x16xf32>
    %c4 = arith.constant 4 : index
    %63 = memref.load %arg4[%c4] : memref<98xf32, #tpu.memory_space<smem>>
    %64 = vector.extract_strided_slice %42 {offsets = [0, 0, 4], sizes = [2, 16, 16], strides = [1, 1, 1]} : vector<2x16x22xf32> to vector<2x16x16xf32>
    %65 = vector.broadcast %63 : f32 to vector<2x16x16xf32>
    %66 = arith.mulf %65, %64 : vector<2x16x16xf32>
    %67 = arith.addf %62, %66 : vector<2x16x16xf32>
    %c5 = arith.constant 5 : index
    %68 = memref.load %arg4[%c5] : memref<98xf32, #tpu.memory_space<smem>>
    %69 = vector.extract_strided_slice %42 {offsets = [0, 0, 5], sizes = [2, 16, 16], strides = [1, 1, 1]} : vector<2x16x22xf32> to vector<2x16x16xf32>
    %70 = vector.broadcast %68 : f32 to vector<2x16x16xf32>
    %71 = arith.mulf %70, %69 : vector<2x16x16xf32>
    %72 = arith.addf %67, %71 : vector<2x16x16xf32>
    %c6 = arith.constant 6 : index
    %73 = memref.load %arg4[%c6] : memref<98xf32, #tpu.memory_space<smem>>
    %74 = vector.extract_strided_slice %42 {offsets = [0, 0, 6], sizes = [2, 16, 16], strides = [1, 1, 1]} : vector<2x16x22xf32> to vector<2x16x16xf32>
    %75 = vector.broadcast %73 : f32 to vector<2x16x16xf32>
    %76 = arith.mulf %75, %74 : vector<2x16x16xf32>
    %77 = arith.addf %72, %76 : vector<2x16x16xf32>
    %c0_49 = arith.constant 0 : index
    %c0_50 = arith.constant 0 : index
    %c1_51 = arith.constant 1 : index
    %c0_52 = arith.constant 0 : index
    %78 = vector.load %arg6[%c0_49, %c0_50, %c1_51, %c0_52] : memref<2x2x22x22xf32, #tpu.memory_space<vmem>>, vector<2x1x16x22xf32>
    %79 = vector.shape_cast %78 : vector<2x1x16x22xf32> to vector<2x16x22xf32>
    %c7 = arith.constant 7 : index
    %80 = memref.load %arg4[%c7] : memref<98xf32, #tpu.memory_space<smem>>
    %81 = vector.extract_strided_slice %79 {offsets = [0, 0, 0], sizes = [2, 16, 16], strides = [1, 1, 1]} : vector<2x16x22xf32> to vector<2x16x16xf32>
    %82 = vector.broadcast %80 : f32 to vector<2x16x16xf32>
    %83 = arith.mulf %82, %81 : vector<2x16x16xf32>
    %84 = arith.addf %77, %83 : vector<2x16x16xf32>
    %c8 = arith.constant 8 : index
    %85 = memref.load %arg4[%c8] : memref<98xf32, #tpu.memory_space<smem>>
    %86 = vector.extract_strided_slice %79 {offsets = [0, 0, 1], sizes = [2, 16, 16], strides = [1, 1, 1]} : vector<2x16x22xf32> to vector<2x16x16xf32>
    %87 = vector.broadcast %85 : f32 to vector<2x16x16xf32>
    %88 = arith.mulf %87, %86 : vector<2x16x16xf32>
    %89 = arith.addf %84, %88 : vector<2x16x16xf32>
    %c9 = arith.constant 9 : index
    %90 = memref.load %arg4[%c9] : memref<98xf32, #tpu.memory_space<smem>>
    %91 = vector.extract_strided_slice %79 {offsets = [0, 0, 2], sizes = [2, 16, 16], strides = [1, 1, 1]} : vector<2x16x22xf32> to vector<2x16x16xf32>
    %92 = vector.broadcast %90 : f32 to vector<2x16x16xf32>
    %93 = arith.mulf %92, %91 : vector<2x16x16xf32>
    %94 = arith.addf %89, %93 : vector<2x16x16xf32>
    %c10 = arith.constant 10 : index
    %95 = memref.load %arg4[%c10] : memref<98xf32, #tpu.memory_space<smem>>
    %96 = vector.extract_strided_slice %79 {offsets = [0, 0, 3], sizes = [2, 16, 16], strides = [1, 1, 1]} : vector<2x16x22xf32> to vector<2x16x16xf32>
    %97 = vector.broadcast %95 : f32 to vector<2x16x16xf32>
    %98 = arith.mulf %97, %96 : vector<2x16x16xf32>
    %99 = arith.addf %94, %98 : vector<2x16x16xf32>
    %c11 = arith.constant 11 : index
    %100 = memref.load %arg4[%c11] : memref<98xf32, #tpu.memory_space<smem>>
    %101 = vector.extract_strided_slice %79 {offsets = [0, 0, 4], sizes = [2, 16, 16], strides = [1, 1, 1]} : vector<2x16x22xf32> to vector<2x16x16xf32>
    %102 = vector.broadcast %100 : f32 to vector<2x16x16xf32>
    %103 = arith.mulf %102, %101 : vector<2x16x16xf32>
    %104 = arith.addf %99, %103 : vector<2x16x16xf32>
    %c12 = arith.constant 12 : index
    %105 = memref.load %arg4[%c12] : memref<98xf32, #tpu.memory_space<smem>>
    %106 = vector.extract_strided_slice %79 {offsets = [0, 0, 5], sizes = [2, 16, 16], strides = [1, 1, 1]} : vector<2x16x22xf32> to vector<2x16x16xf32>
    %107 = vector.broadcast %105 : f32 to vector<2x16x16xf32>
    %108 = arith.mulf %107, %106 : vector<2x16x16xf32>
    %109 = arith.addf %104, %108 : vector<2x16x16xf32>
    %c13 = arith.constant 13 : index
    %110 = memref.load %arg4[%c13] : memref<98xf32, #tpu.memory_space<smem>>
    %111 = vector.extract_strided_slice %79 {offsets = [0, 0, 6], sizes = [2, 16, 16], strides = [1, 1, 1]} : vector<2x16x22xf32> to vector<2x16x16xf32>
    %112 = vector.broadcast %110 : f32 to vector<2x16x16xf32>
    %113 = arith.mulf %112, %111 : vector<2x16x16xf32>
    %114 = arith.addf %109, %113 : vector<2x16x16xf32>
    %c0_53 = arith.constant 0 : index
    %c0_54 = arith.constant 0 : index
    %c2_55 = arith.constant 2 : index
    %c0_56 = arith.constant 0 : index
    %115 = vector.load %arg6[%c0_53, %c0_54, %c2_55, %c0_56] : memref<2x2x22x22xf32, #tpu.memory_space<vmem>>, vector<2x1x16x22xf32>
    %116 = vector.shape_cast %115 : vector<2x1x16x22xf32> to vector<2x16x22xf32>
    %c14 = arith.constant 14 : index
    %117 = memref.load %arg4[%c14] : memref<98xf32, #tpu.memory_space<smem>>
    %118 = vector.extract_strided_slice %116 {offsets = [0, 0, 0], sizes = [2, 16, 16], strides = [1, 1, 1]} : vector<2x16x22xf32> to vector<2x16x16xf32>
    %119 = vector.broadcast %117 : f32 to vector<2x16x16xf32>
    %120 = arith.mulf %119, %118 : vector<2x16x16xf32>
    %121 = arith.addf %114, %120 : vector<2x16x16xf32>
    %c15 = arith.constant 15 : index
    %122 = memref.load %arg4[%c15] : memref<98xf32, #tpu.memory_space<smem>>
    %123 = vector.extract_strided_slice %116 {offsets = [0, 0, 1], sizes = [2, 16, 16], strides = [1, 1, 1]} : vector<2x16x22xf32> to vector<2x16x16xf32>
    %124 = vector.broadcast %122 : f32 to vector<2x16x16xf32>
    %125 = arith.mulf %124, %123 : vector<2x16x16xf32>
    %126 = arith.addf %121, %125 : vector<2x16x16xf32>
    %c16 = arith.constant 16 : index
    %127 = memref.load %arg4[%c16] : memref<98xf32, #tpu.memory_space<smem>>
    %128 = vector.extract_strided_slice %116 {offsets = [0, 0, 2], sizes = [2, 16, 16], strides = [1, 1, 1]} : vector<2x16x22xf32> to vector<2x16x16xf32>
    %129 = vector.broadcast %127 : f32 to vector<2x16x16xf32>
    %130 = arith.mulf %129, %128 : vector<2x16x16xf32>
    %131 = arith.addf %126, %130 : vector<2x16x16xf32>
    %c17 = arith.constant 17 : index
    %132 = memref.load %arg4[%c17] : memref<98xf32, #tpu.memory_space<smem>>
    %133 = vector.extract_strided_slice %116 {offsets = [0, 0, 3], sizes = [2, 16, 16], strides = [1, 1, 1]} : vector<2x16x22xf32> to vector<2x16x16xf32>
    %134 = vector.broadcast %132 : f32 to vector<2x16x16xf32>
    %135 = arith.mulf %134, %133 : vector<2x16x16xf32>
    %136 = arith.addf %131, %135 : vector<2x16x16xf32>
    %c18 = arith.constant 18 : index
    %137 = memref.load %arg4[%c18] : memref<98xf32, #tpu.memory_space<smem>>
    %138 = vector.extract_strided_slice %116 {offsets = [0, 0, 4], sizes = [2, 16, 16], strides = [1, 1, 1]} : vector<2x16x22xf32> to vector<2x16x16xf32>
    %139 = vector.broadcast %137 : f32 to vector<2x16x16xf32>
    %140 = arith.mulf %139, %138 : vector<2x16x16xf32>
    %141 = arith.addf %136, %140 : vector<2x16x16xf32>
    %c19_57 = arith.constant 19 : index
    %142 = memref.load %arg4[%c19_57] : memref<98xf32, #tpu.memory_space<smem>>
    %143 = vector.extract_strided_slice %116 {offsets = [0, 0, 5], sizes = [2, 16, 16], strides = [1, 1, 1]} : vector<2x16x22xf32> to vector<2x16x16xf32>
    %144 = vector.broadcast %142 : f32 to vector<2x16x16xf32>
    %145 = arith.mulf %144, %143 : vector<2x16x16xf32>
    %146 = arith.addf %141, %145 : vector<2x16x16xf32>
    %c20 = arith.constant 20 : index
    %147 = memref.load %arg4[%c20] : memref<98xf32, #tpu.memory_space<smem>>
    %148 = vector.extract_strided_slice %116 {offsets = [0, 0, 6], sizes = [2, 16, 16], strides = [1, 1, 1]} : vector<2x16x22xf32> to vector<2x16x16xf32>
    %149 = vector.broadcast %147 : f32 to vector<2x16x16xf32>
    %150 = arith.mulf %149, %148 : vector<2x16x16xf32>
    %151 = arith.addf %146, %150 : vector<2x16x16xf32>
    %c0_58 = arith.constant 0 : index
    %c0_59 = arith.constant 0 : index
    %c3_60 = arith.constant 3 : index
    %c0_61 = arith.constant 0 : index
    %152 = vector.load %arg6[%c0_58, %c0_59, %c3_60, %c0_61] : memref<2x2x22x22xf32, #tpu.memory_space<vmem>>, vector<2x1x16x22xf32>
    %153 = vector.shape_cast %152 : vector<2x1x16x22xf32> to vector<2x16x22xf32>
    %c21 = arith.constant 21 : index
    %154 = memref.load %arg4[%c21] : memref<98xf32, #tpu.memory_space<smem>>
    %155 = vector.extract_strided_slice %153 {offsets = [0, 0, 0], sizes = [2, 16, 16], strides = [1, 1, 1]} : vector<2x16x22xf32> to vector<2x16x16xf32>
    %156 = vector.broadcast %154 : f32 to vector<2x16x16xf32>
    %157 = arith.mulf %156, %155 : vector<2x16x16xf32>
    %158 = arith.addf %151, %157 : vector<2x16x16xf32>
    %c22 = arith.constant 22 : index
    %159 = memref.load %arg4[%c22] : memref<98xf32, #tpu.memory_space<smem>>
    %160 = vector.extract_strided_slice %153 {offsets = [0, 0, 1], sizes = [2, 16, 16], strides = [1, 1, 1]} : vector<2x16x22xf32> to vector<2x16x16xf32>
    %161 = vector.broadcast %159 : f32 to vector<2x16x16xf32>
    %162 = arith.mulf %161, %160 : vector<2x16x16xf32>
    %163 = arith.addf %158, %162 : vector<2x16x16xf32>
    %c23 = arith.constant 23 : index
    %164 = memref.load %arg4[%c23] : memref<98xf32, #tpu.memory_space<smem>>
    %165 = vector.extract_strided_slice %153 {offsets = [0, 0, 2], sizes = [2, 16, 16], strides = [1, 1, 1]} : vector<2x16x22xf32> to vector<2x16x16xf32>
    %166 = vector.broadcast %164 : f32 to vector<2x16x16xf32>
    %167 = arith.mulf %166, %165 : vector<2x16x16xf32>
    %168 = arith.addf %163, %167 : vector<2x16x16xf32>
    %c24 = arith.constant 24 : index
    %169 = memref.load %arg4[%c24] : memref<98xf32, #tpu.memory_space<smem>>
    %170 = vector.extract_strided_slice %153 {offsets = [0, 0, 3], sizes = [2, 16, 16], strides = [1, 1, 1]} : vector<2x16x22xf32> to vector<2x16x16xf32>
    %171 = vector.broadcast %169 : f32 to vector<2x16x16xf32>
    %172 = arith.mulf %171, %170 : vector<2x16x16xf32>
    %173 = arith.addf %168, %172 : vector<2x16x16xf32>
    %c25 = arith.constant 25 : index
    %174 = memref.load %arg4[%c25] : memref<98xf32, #tpu.memory_space<smem>>
    %175 = vector.extract_strided_slice %153 {offsets = [0, 0, 4], sizes = [2, 16, 16], strides = [1, 1, 1]} : vector<2x16x22xf32> to vector<2x16x16xf32>
    %176 = vector.broadcast %174 : f32 to vector<2x16x16xf32>
    %177 = arith.mulf %176, %175 : vector<2x16x16xf32>
    %178 = arith.addf %173, %177 : vector<2x16x16xf32>
    %c26 = arith.constant 26 : index
    %179 = memref.load %arg4[%c26] : memref<98xf32, #tpu.memory_space<smem>>
    %180 = vector.extract_strided_slice %153 {offsets = [0, 0, 5], sizes = [2, 16, 16], strides = [1, 1, 1]} : vector<2x16x22xf32> to vector<2x16x16xf32>
    %181 = vector.broadcast %179 : f32 to vector<2x16x16xf32>
    %182 = arith.mulf %181, %180 : vector<2x16x16xf32>
    %183 = arith.addf %178, %182 : vector<2x16x16xf32>
    %c27 = arith.constant 27 : index
    %184 = memref.load %arg4[%c27] : memref<98xf32, #tpu.memory_space<smem>>
    %185 = vector.extract_strided_slice %153 {offsets = [0, 0, 6], sizes = [2, 16, 16], strides = [1, 1, 1]} : vector<2x16x22xf32> to vector<2x16x16xf32>
    %186 = vector.broadcast %184 : f32 to vector<2x16x16xf32>
    %187 = arith.mulf %186, %185 : vector<2x16x16xf32>
    %188 = arith.addf %183, %187 : vector<2x16x16xf32>
    %c0_62 = arith.constant 0 : index
    %c0_63 = arith.constant 0 : index
    %c4_64 = arith.constant 4 : index
    %c0_65 = arith.constant 0 : index
    %189 = vector.load %arg6[%c0_62, %c0_63, %c4_64, %c0_65] : memref<2x2x22x22xf32, #tpu.memory_space<vmem>>, vector<2x1x16x22xf32>
    %190 = vector.shape_cast %189 : vector<2x1x16x22xf32> to vector<2x16x22xf32>
    %c28 = arith.constant 28 : index
    %191 = memref.load %arg4[%c28] : memref<98xf32, #tpu.memory_space<smem>>
    %192 = vector.extract_strided_slice %190 {offsets = [0, 0, 0], sizes = [2, 16, 16], strides = [1, 1, 1]} : vector<2x16x22xf32> to vector<2x16x16xf32>
    %193 = vector.broadcast %191 : f32 to vector<2x16x16xf32>
    %194 = arith.mulf %193, %192 : vector<2x16x16xf32>
    %195 = arith.addf %188, %194 : vector<2x16x16xf32>
    %c29 = arith.constant 29 : index
    %196 = memref.load %arg4[%c29] : memref<98xf32, #tpu.memory_space<smem>>
    %197 = vector.extract_strided_slice %190 {offsets = [0, 0, 1], sizes = [2, 16, 16], strides = [1, 1, 1]} : vector<2x16x22xf32> to vector<2x16x16xf32>
    %198 = vector.broadcast %196 : f32 to vector<2x16x16xf32>
    %199 = arith.mulf %198, %197 : vector<2x16x16xf32>
    %200 = arith.addf %195, %199 : vector<2x16x16xf32>
    %c30 = arith.constant 30 : index
    %201 = memref.load %arg4[%c30] : memref<98xf32, #tpu.memory_space<smem>>
    %202 = vector.extract_strided_slice %190 {offsets = [0, 0, 2], sizes = [2, 16, 16], strides = [1, 1, 1]} : vector<2x16x22xf32> to vector<2x16x16xf32>
    %203 = vector.broadcast %201 : f32 to vector<2x16x16xf32>
    %204 = arith.mulf %203, %202 : vector<2x16x16xf32>
    %205 = arith.addf %200, %204 : vector<2x16x16xf32>
    %c31 = arith.constant 31 : index
    %206 = memref.load %arg4[%c31] : memref<98xf32, #tpu.memory_space<smem>>
    %207 = vector.extract_strided_slice %190 {offsets = [0, 0, 3], sizes = [2, 16, 16], strides = [1, 1, 1]} : vector<2x16x22xf32> to vector<2x16x16xf32>
    %208 = vector.broadcast %206 : f32 to vector<2x16x16xf32>
    %209 = arith.mulf %208, %207 : vector<2x16x16xf32>
    %210 = arith.addf %205, %209 : vector<2x16x16xf32>
    %c32 = arith.constant 32 : index
    %211 = memref.load %arg4[%c32] : memref<98xf32, #tpu.memory_space<smem>>
    %212 = vector.extract_strided_slice %190 {offsets = [0, 0, 4], sizes = [2, 16, 16], strides = [1, 1, 1]} : vector<2x16x22xf32> to vector<2x16x16xf32>
    %213 = vector.broadcast %211 : f32 to vector<2x16x16xf32>
    %214 = arith.mulf %213, %212 : vector<2x16x16xf32>
    %215 = arith.addf %210, %214 : vector<2x16x16xf32>
    %c33 = arith.constant 33 : index
    %216 = memref.load %arg4[%c33] : memref<98xf32, #tpu.memory_space<smem>>
    %217 = vector.extract_strided_slice %190 {offsets = [0, 0, 5], sizes = [2, 16, 16], strides = [1, 1, 1]} : vector<2x16x22xf32> to vector<2x16x16xf32>
    %218 = vector.broadcast %216 : f32 to vector<2x16x16xf32>
    %219 = arith.mulf %218, %217 : vector<2x16x16xf32>
    %220 = arith.addf %215, %219 : vector<2x16x16xf32>
    %c34 = arith.constant 34 : index
    %221 = memref.load %arg4[%c34] : memref<98xf32, #tpu.memory_space<smem>>
    %222 = vector.extract_strided_slice %190 {offsets = [0, 0, 6], sizes = [2, 16, 16], strides = [1, 1, 1]} : vector<2x16x22xf32> to vector<2x16x16xf32>
    %223 = vector.broadcast %221 : f32 to vector<2x16x16xf32>
    %224 = arith.mulf %223, %222 : vector<2x16x16xf32>
    %225 = arith.addf %220, %224 : vector<2x16x16xf32>
    %c0_66 = arith.constant 0 : index
    %c0_67 = arith.constant 0 : index
    %c5_68 = arith.constant 5 : index
    %c0_69 = arith.constant 0 : index
    %226 = vector.load %arg6[%c0_66, %c0_67, %c5_68, %c0_69] : memref<2x2x22x22xf32, #tpu.memory_space<vmem>>, vector<2x1x16x22xf32>
    %227 = vector.shape_cast %226 : vector<2x1x16x22xf32> to vector<2x16x22xf32>
    %c35 = arith.constant 35 : index
    %228 = memref.load %arg4[%c35] : memref<98xf32, #tpu.memory_space<smem>>
    %229 = vector.extract_strided_slice %227 {offsets = [0, 0, 0], sizes = [2, 16, 16], strides = [1, 1, 1]} : vector<2x16x22xf32> to vector<2x16x16xf32>
    %230 = vector.broadcast %228 : f32 to vector<2x16x16xf32>
    %231 = arith.mulf %230, %229 : vector<2x16x16xf32>
    %232 = arith.addf %225, %231 : vector<2x16x16xf32>
    %c36 = arith.constant 36 : index
    %233 = memref.load %arg4[%c36] : memref<98xf32, #tpu.memory_space<smem>>
    %234 = vector.extract_strided_slice %227 {offsets = [0, 0, 1], sizes = [2, 16, 16], strides = [1, 1, 1]} : vector<2x16x22xf32> to vector<2x16x16xf32>
    %235 = vector.broadcast %233 : f32 to vector<2x16x16xf32>
    %236 = arith.mulf %235, %234 : vector<2x16x16xf32>
    %237 = arith.addf %232, %236 : vector<2x16x16xf32>
    %c37 = arith.constant 37 : index
    %238 = memref.load %arg4[%c37] : memref<98xf32, #tpu.memory_space<smem>>
    %239 = vector.extract_strided_slice %227 {offsets = [0, 0, 2], sizes = [2, 16, 16], strides = [1, 1, 1]} : vector<2x16x22xf32> to vector<2x16x16xf32>
    %240 = vector.broadcast %238 : f32 to vector<2x16x16xf32>
    %241 = arith.mulf %240, %239 : vector<2x16x16xf32>
    %242 = arith.addf %237, %241 : vector<2x16x16xf32>
    %c38 = arith.constant 38 : index
    %243 = memref.load %arg4[%c38] : memref<98xf32, #tpu.memory_space<smem>>
    %244 = vector.extract_strided_slice %227 {offsets = [0, 0, 3], sizes = [2, 16, 16], strides = [1, 1, 1]} : vector<2x16x22xf32> to vector<2x16x16xf32>
    %245 = vector.broadcast %243 : f32 to vector<2x16x16xf32>
    %246 = arith.mulf %245, %244 : vector<2x16x16xf32>
    %247 = arith.addf %242, %246 : vector<2x16x16xf32>
    %c39 = arith.constant 39 : index
    %248 = memref.load %arg4[%c39] : memref<98xf32, #tpu.memory_space<smem>>
    %249 = vector.extract_strided_slice %227 {offsets = [0, 0, 4], sizes = [2, 16, 16], strides = [1, 1, 1]} : vector<2x16x22xf32> to vector<2x16x16xf32>
    %250 = vector.broadcast %248 : f32 to vector<2x16x16xf32>
    %251 = arith.mulf %250, %249 : vector<2x16x16xf32>
    %252 = arith.addf %247, %251 : vector<2x16x16xf32>
    %c40 = arith.constant 40 : index
    %253 = memref.load %arg4[%c40] : memref<98xf32, #tpu.memory_space<smem>>
    %254 = vector.extract_strided_slice %227 {offsets = [0, 0, 5], sizes = [2, 16, 16], strides = [1, 1, 1]} : vector<2x16x22xf32> to vector<2x16x16xf32>
    %255 = vector.broadcast %253 : f32 to vector<2x16x16xf32>
    %256 = arith.mulf %255, %254 : vector<2x16x16xf32>
    %257 = arith.addf %252, %256 : vector<2x16x16xf32>
    %c41 = arith.constant 41 : index
    %258 = memref.load %arg4[%c41] : memref<98xf32, #tpu.memory_space<smem>>
    %259 = vector.extract_strided_slice %227 {offsets = [0, 0, 6], sizes = [2, 16, 16], strides = [1, 1, 1]} : vector<2x16x22xf32> to vector<2x16x16xf32>
    %260 = vector.broadcast %258 : f32 to vector<2x16x16xf32>
    %261 = arith.mulf %260, %259 : vector<2x16x16xf32>
    %262 = arith.addf %257, %261 : vector<2x16x16xf32>
    %c0_70 = arith.constant 0 : index
    %c0_71 = arith.constant 0 : index
    %c6_72 = arith.constant 6 : index
    %c0_73 = arith.constant 0 : index
    %263 = vector.load %arg6[%c0_70, %c0_71, %c6_72, %c0_73] : memref<2x2x22x22xf32, #tpu.memory_space<vmem>>, vector<2x1x16x22xf32>
    %264 = vector.shape_cast %263 : vector<2x1x16x22xf32> to vector<2x16x22xf32>
    %c42 = arith.constant 42 : index
    %265 = memref.load %arg4[%c42] : memref<98xf32, #tpu.memory_space<smem>>
    %266 = vector.extract_strided_slice %264 {offsets = [0, 0, 0], sizes = [2, 16, 16], strides = [1, 1, 1]} : vector<2x16x22xf32> to vector<2x16x16xf32>
    %267 = vector.broadcast %265 : f32 to vector<2x16x16xf32>
    %268 = arith.mulf %267, %266 : vector<2x16x16xf32>
    %269 = arith.addf %262, %268 : vector<2x16x16xf32>
    %c43 = arith.constant 43 : index
    %270 = memref.load %arg4[%c43] : memref<98xf32, #tpu.memory_space<smem>>
    %271 = vector.extract_strided_slice %264 {offsets = [0, 0, 1], sizes = [2, 16, 16], strides = [1, 1, 1]} : vector<2x16x22xf32> to vector<2x16x16xf32>
    %272 = vector.broadcast %270 : f32 to vector<2x16x16xf32>
    %273 = arith.mulf %272, %271 : vector<2x16x16xf32>
    %274 = arith.addf %269, %273 : vector<2x16x16xf32>
    %c44 = arith.constant 44 : index
    %275 = memref.load %arg4[%c44] : memref<98xf32, #tpu.memory_space<smem>>
    %276 = vector.extract_strided_slice %264 {offsets = [0, 0, 2], sizes = [2, 16, 16], strides = [1, 1, 1]} : vector<2x16x22xf32> to vector<2x16x16xf32>
    %277 = vector.broadcast %275 : f32 to vector<2x16x16xf32>
    %278 = arith.mulf %277, %276 : vector<2x16x16xf32>
    %279 = arith.addf %274, %278 : vector<2x16x16xf32>
    %c45 = arith.constant 45 : index
    %280 = memref.load %arg4[%c45] : memref<98xf32, #tpu.memory_space<smem>>
    %281 = vector.extract_strided_slice %264 {offsets = [0, 0, 3], sizes = [2, 16, 16], strides = [1, 1, 1]} : vector<2x16x22xf32> to vector<2x16x16xf32>
    %282 = vector.broadcast %280 : f32 to vector<2x16x16xf32>
    %283 = arith.mulf %282, %281 : vector<2x16x16xf32>
    %284 = arith.addf %279, %283 : vector<2x16x16xf32>
    %c46 = arith.constant 46 : index
    %285 = memref.load %arg4[%c46] : memref<98xf32, #tpu.memory_space<smem>>
    %286 = vector.extract_strided_slice %264 {offsets = [0, 0, 4], sizes = [2, 16, 16], strides = [1, 1, 1]} : vector<2x16x22xf32> to vector<2x16x16xf32>
    %287 = vector.broadcast %285 : f32 to vector<2x16x16xf32>
    %288 = arith.mulf %287, %286 : vector<2x16x16xf32>
    %289 = arith.addf %284, %288 : vector<2x16x16xf32>
    %c47 = arith.constant 47 : index
    %290 = memref.load %arg4[%c47] : memref<98xf32, #tpu.memory_space<smem>>
    %291 = vector.extract_strided_slice %264 {offsets = [0, 0, 5], sizes = [2, 16, 16], strides = [1, 1, 1]} : vector<2x16x22xf32> to vector<2x16x16xf32>
    %292 = vector.broadcast %290 : f32 to vector<2x16x16xf32>
    %293 = arith.mulf %292, %291 : vector<2x16x16xf32>
    %294 = arith.addf %289, %293 : vector<2x16x16xf32>
    %c48 = arith.constant 48 : index
    %295 = memref.load %arg4[%c48] : memref<98xf32, #tpu.memory_space<smem>>
    %296 = vector.extract_strided_slice %264 {offsets = [0, 0, 6], sizes = [2, 16, 16], strides = [1, 1, 1]} : vector<2x16x22xf32> to vector<2x16x16xf32>
    %297 = vector.broadcast %295 : f32 to vector<2x16x16xf32>
    %298 = arith.mulf %297, %296 : vector<2x16x16xf32>
    %299 = arith.addf %294, %298 : vector<2x16x16xf32>
    %c0_74 = arith.constant 0 : index
    %c1_75 = arith.constant 1 : index
    %c0_76 = arith.constant 0 : index
    %c0_77 = arith.constant 0 : index
    %300 = vector.load %arg6[%c0_74, %c1_75, %c0_76, %c0_77] : memref<2x2x22x22xf32, #tpu.memory_space<vmem>>, vector<2x1x16x22xf32>
    %301 = vector.shape_cast %300 : vector<2x1x16x22xf32> to vector<2x16x22xf32>
    %c49 = arith.constant 49 : index
    %302 = memref.load %arg4[%c49] : memref<98xf32, #tpu.memory_space<smem>>
    %303 = vector.extract_strided_slice %301 {offsets = [0, 0, 0], sizes = [2, 16, 16], strides = [1, 1, 1]} : vector<2x16x22xf32> to vector<2x16x16xf32>
    %304 = vector.broadcast %302 : f32 to vector<2x16x16xf32>
    %305 = arith.mulf %304, %303 : vector<2x16x16xf32>
    %306 = arith.addf %299, %305 : vector<2x16x16xf32>
    %c50 = arith.constant 50 : index
    %307 = memref.load %arg4[%c50] : memref<98xf32, #tpu.memory_space<smem>>
    %308 = vector.extract_strided_slice %301 {offsets = [0, 0, 1], sizes = [2, 16, 16], strides = [1, 1, 1]} : vector<2x16x22xf32> to vector<2x16x16xf32>
    %309 = vector.broadcast %307 : f32 to vector<2x16x16xf32>
    %310 = arith.mulf %309, %308 : vector<2x16x16xf32>
    %311 = arith.addf %306, %310 : vector<2x16x16xf32>
    %c51 = arith.constant 51 : index
    %312 = memref.load %arg4[%c51] : memref<98xf32, #tpu.memory_space<smem>>
    %313 = vector.extract_strided_slice %301 {offsets = [0, 0, 2], sizes = [2, 16, 16], strides = [1, 1, 1]} : vector<2x16x22xf32> to vector<2x16x16xf32>
    %314 = vector.broadcast %312 : f32 to vector<2x16x16xf32>
    %315 = arith.mulf %314, %313 : vector<2x16x16xf32>
    %316 = arith.addf %311, %315 : vector<2x16x16xf32>
    %c52 = arith.constant 52 : index
    %317 = memref.load %arg4[%c52] : memref<98xf32, #tpu.memory_space<smem>>
    %318 = vector.extract_strided_slice %301 {offsets = [0, 0, 3], sizes = [2, 16, 16], strides = [1, 1, 1]} : vector<2x16x22xf32> to vector<2x16x16xf32>
    %319 = vector.broadcast %317 : f32 to vector<2x16x16xf32>
    %320 = arith.mulf %319, %318 : vector<2x16x16xf32>
    %321 = arith.addf %316, %320 : vector<2x16x16xf32>
    %c53 = arith.constant 53 : index
    %322 = memref.load %arg4[%c53] : memref<98xf32, #tpu.memory_space<smem>>
    %323 = vector.extract_strided_slice %301 {offsets = [0, 0, 4], sizes = [2, 16, 16], strides = [1, 1, 1]} : vector<2x16x22xf32> to vector<2x16x16xf32>
    %324 = vector.broadcast %322 : f32 to vector<2x16x16xf32>
    %325 = arith.mulf %324, %323 : vector<2x16x16xf32>
    %326 = arith.addf %321, %325 : vector<2x16x16xf32>
    %c54 = arith.constant 54 : index
    %327 = memref.load %arg4[%c54] : memref<98xf32, #tpu.memory_space<smem>>
    %328 = vector.extract_strided_slice %301 {offsets = [0, 0, 5], sizes = [2, 16, 16], strides = [1, 1, 1]} : vector<2x16x22xf32> to vector<2x16x16xf32>
    %329 = vector.broadcast %327 : f32 to vector<2x16x16xf32>
    %330 = arith.mulf %329, %328 : vector<2x16x16xf32>
    %331 = arith.addf %326, %330 : vector<2x16x16xf32>
    %c55 = arith.constant 55 : index
    %332 = memref.load %arg4[%c55] : memref<98xf32, #tpu.memory_space<smem>>
    %333 = vector.extract_strided_slice %301 {offsets = [0, 0, 6], sizes = [2, 16, 16], strides = [1, 1, 1]} : vector<2x16x22xf32> to vector<2x16x16xf32>
    %334 = vector.broadcast %332 : f32 to vector<2x16x16xf32>
    %335 = arith.mulf %334, %333 : vector<2x16x16xf32>
    %336 = arith.addf %331, %335 : vector<2x16x16xf32>
    %c0_78 = arith.constant 0 : index
    %c1_79 = arith.constant 1 : index
    %c1_80 = arith.constant 1 : index
    %c0_81 = arith.constant 0 : index
    %337 = vector.load %arg6[%c0_78, %c1_79, %c1_80, %c0_81] : memref<2x2x22x22xf32, #tpu.memory_space<vmem>>, vector<2x1x16x22xf32>
    %338 = vector.shape_cast %337 : vector<2x1x16x22xf32> to vector<2x16x22xf32>
    %c56 = arith.constant 56 : index
    %339 = memref.load %arg4[%c56] : memref<98xf32, #tpu.memory_space<smem>>
    %340 = vector.extract_strided_slice %338 {offsets = [0, 0, 0], sizes = [2, 16, 16], strides = [1, 1, 1]} : vector<2x16x22xf32> to vector<2x16x16xf32>
    %341 = vector.broadcast %339 : f32 to vector<2x16x16xf32>
    %342 = arith.mulf %341, %340 : vector<2x16x16xf32>
    %343 = arith.addf %336, %342 : vector<2x16x16xf32>
    %c57 = arith.constant 57 : index
    %344 = memref.load %arg4[%c57] : memref<98xf32, #tpu.memory_space<smem>>
    %345 = vector.extract_strided_slice %338 {offsets = [0, 0, 1], sizes = [2, 16, 16], strides = [1, 1, 1]} : vector<2x16x22xf32> to vector<2x16x16xf32>
    %346 = vector.broadcast %344 : f32 to vector<2x16x16xf32>
    %347 = arith.mulf %346, %345 : vector<2x16x16xf32>
    %348 = arith.addf %343, %347 : vector<2x16x16xf32>
    %c58 = arith.constant 58 : index
    %349 = memref.load %arg4[%c58] : memref<98xf32, #tpu.memory_space<smem>>
    %350 = vector.extract_strided_slice %338 {offsets = [0, 0, 2], sizes = [2, 16, 16], strides = [1, 1, 1]} : vector<2x16x22xf32> to vector<2x16x16xf32>
    %351 = vector.broadcast %349 : f32 to vector<2x16x16xf32>
    %352 = arith.mulf %351, %350 : vector<2x16x16xf32>
    %353 = arith.addf %348, %352 : vector<2x16x16xf32>
    %c59 = arith.constant 59 : index
    %354 = memref.load %arg4[%c59] : memref<98xf32, #tpu.memory_space<smem>>
    %355 = vector.extract_strided_slice %338 {offsets = [0, 0, 3], sizes = [2, 16, 16], strides = [1, 1, 1]} : vector<2x16x22xf32> to vector<2x16x16xf32>
    %356 = vector.broadcast %354 : f32 to vector<2x16x16xf32>
    %357 = arith.mulf %356, %355 : vector<2x16x16xf32>
    %358 = arith.addf %353, %357 : vector<2x16x16xf32>
    %c60 = arith.constant 60 : index
    %359 = memref.load %arg4[%c60] : memref<98xf32, #tpu.memory_space<smem>>
    %360 = vector.extract_strided_slice %338 {offsets = [0, 0, 4], sizes = [2, 16, 16], strides = [1, 1, 1]} : vector<2x16x22xf32> to vector<2x16x16xf32>
    %361 = vector.broadcast %359 : f32 to vector<2x16x16xf32>
    %362 = arith.mulf %361, %360 : vector<2x16x16xf32>
    %363 = arith.addf %358, %362 : vector<2x16x16xf32>
    %c61 = arith.constant 61 : index
    %364 = memref.load %arg4[%c61] : memref<98xf32, #tpu.memory_space<smem>>
    %365 = vector.extract_strided_slice %338 {offsets = [0, 0, 5], sizes = [2, 16, 16], strides = [1, 1, 1]} : vector<2x16x22xf32> to vector<2x16x16xf32>
    %366 = vector.broadcast %364 : f32 to vector<2x16x16xf32>
    %367 = arith.mulf %366, %365 : vector<2x16x16xf32>
    %368 = arith.addf %363, %367 : vector<2x16x16xf32>
    %c62 = arith.constant 62 : index
    %369 = memref.load %arg4[%c62] : memref<98xf32, #tpu.memory_space<smem>>
    %370 = vector.extract_strided_slice %338 {offsets = [0, 0, 6], sizes = [2, 16, 16], strides = [1, 1, 1]} : vector<2x16x22xf32> to vector<2x16x16xf32>
    %371 = vector.broadcast %369 : f32 to vector<2x16x16xf32>
    %372 = arith.mulf %371, %370 : vector<2x16x16xf32>
    %373 = arith.addf %368, %372 : vector<2x16x16xf32>
    %c0_82 = arith.constant 0 : index
    %c1_83 = arith.constant 1 : index
    %c2_84 = arith.constant 2 : index
    %c0_85 = arith.constant 0 : index
    %374 = vector.load %arg6[%c0_82, %c1_83, %c2_84, %c0_85] : memref<2x2x22x22xf32, #tpu.memory_space<vmem>>, vector<2x1x16x22xf32>
    %375 = vector.shape_cast %374 : vector<2x1x16x22xf32> to vector<2x16x22xf32>
    %c63 = arith.constant 63 : index
    %376 = memref.load %arg4[%c63] : memref<98xf32, #tpu.memory_space<smem>>
    %377 = vector.extract_strided_slice %375 {offsets = [0, 0, 0], sizes = [2, 16, 16], strides = [1, 1, 1]} : vector<2x16x22xf32> to vector<2x16x16xf32>
    %378 = vector.broadcast %376 : f32 to vector<2x16x16xf32>
    %379 = arith.mulf %378, %377 : vector<2x16x16xf32>
    %380 = arith.addf %373, %379 : vector<2x16x16xf32>
    %c64 = arith.constant 64 : index
    %381 = memref.load %arg4[%c64] : memref<98xf32, #tpu.memory_space<smem>>
    %382 = vector.extract_strided_slice %375 {offsets = [0, 0, 1], sizes = [2, 16, 16], strides = [1, 1, 1]} : vector<2x16x22xf32> to vector<2x16x16xf32>
    %383 = vector.broadcast %381 : f32 to vector<2x16x16xf32>
    %384 = arith.mulf %383, %382 : vector<2x16x16xf32>
    %385 = arith.addf %380, %384 : vector<2x16x16xf32>
    %c65 = arith.constant 65 : index
    %386 = memref.load %arg4[%c65] : memref<98xf32, #tpu.memory_space<smem>>
    %387 = vector.extract_strided_slice %375 {offsets = [0, 0, 2], sizes = [2, 16, 16], strides = [1, 1, 1]} : vector<2x16x22xf32> to vector<2x16x16xf32>
    %388 = vector.broadcast %386 : f32 to vector<2x16x16xf32>
    %389 = arith.mulf %388, %387 : vector<2x16x16xf32>
    %390 = arith.addf %385, %389 : vector<2x16x16xf32>
    %c66 = arith.constant 66 : index
    %391 = memref.load %arg4[%c66] : memref<98xf32, #tpu.memory_space<smem>>
    %392 = vector.extract_strided_slice %375 {offsets = [0, 0, 3], sizes = [2, 16, 16], strides = [1, 1, 1]} : vector<2x16x22xf32> to vector<2x16x16xf32>
    %393 = vector.broadcast %391 : f32 to vector<2x16x16xf32>
    %394 = arith.mulf %393, %392 : vector<2x16x16xf32>
    %395 = arith.addf %390, %394 : vector<2x16x16xf32>
    %c67 = arith.constant 67 : index
    %396 = memref.load %arg4[%c67] : memref<98xf32, #tpu.memory_space<smem>>
    %397 = vector.extract_strided_slice %375 {offsets = [0, 0, 4], sizes = [2, 16, 16], strides = [1, 1, 1]} : vector<2x16x22xf32> to vector<2x16x16xf32>
    %398 = vector.broadcast %396 : f32 to vector<2x16x16xf32>
    %399 = arith.mulf %398, %397 : vector<2x16x16xf32>
    %400 = arith.addf %395, %399 : vector<2x16x16xf32>
    %c68 = arith.constant 68 : index
    %401 = memref.load %arg4[%c68] : memref<98xf32, #tpu.memory_space<smem>>
    %402 = vector.extract_strided_slice %375 {offsets = [0, 0, 5], sizes = [2, 16, 16], strides = [1, 1, 1]} : vector<2x16x22xf32> to vector<2x16x16xf32>
    %403 = vector.broadcast %401 : f32 to vector<2x16x16xf32>
    %404 = arith.mulf %403, %402 : vector<2x16x16xf32>
    %405 = arith.addf %400, %404 : vector<2x16x16xf32>
    %c69 = arith.constant 69 : index
    %406 = memref.load %arg4[%c69] : memref<98xf32, #tpu.memory_space<smem>>
    %407 = vector.extract_strided_slice %375 {offsets = [0, 0, 6], sizes = [2, 16, 16], strides = [1, 1, 1]} : vector<2x16x22xf32> to vector<2x16x16xf32>
    %408 = vector.broadcast %406 : f32 to vector<2x16x16xf32>
    %409 = arith.mulf %408, %407 : vector<2x16x16xf32>
    %410 = arith.addf %405, %409 : vector<2x16x16xf32>
    %c0_86 = arith.constant 0 : index
    %c1_87 = arith.constant 1 : index
    %c3_88 = arith.constant 3 : index
    %c0_89 = arith.constant 0 : index
    %411 = vector.load %arg6[%c0_86, %c1_87, %c3_88, %c0_89] : memref<2x2x22x22xf32, #tpu.memory_space<vmem>>, vector<2x1x16x22xf32>
    %412 = vector.shape_cast %411 : vector<2x1x16x22xf32> to vector<2x16x22xf32>
    %c70 = arith.constant 70 : index
    %413 = memref.load %arg4[%c70] : memref<98xf32, #tpu.memory_space<smem>>
    %414 = vector.extract_strided_slice %412 {offsets = [0, 0, 0], sizes = [2, 16, 16], strides = [1, 1, 1]} : vector<2x16x22xf32> to vector<2x16x16xf32>
    %415 = vector.broadcast %413 : f32 to vector<2x16x16xf32>
    %416 = arith.mulf %415, %414 : vector<2x16x16xf32>
    %417 = arith.addf %410, %416 : vector<2x16x16xf32>
    %c71 = arith.constant 71 : index
    %418 = memref.load %arg4[%c71] : memref<98xf32, #tpu.memory_space<smem>>
    %419 = vector.extract_strided_slice %412 {offsets = [0, 0, 1], sizes = [2, 16, 16], strides = [1, 1, 1]} : vector<2x16x22xf32> to vector<2x16x16xf32>
    %420 = vector.broadcast %418 : f32 to vector<2x16x16xf32>
    %421 = arith.mulf %420, %419 : vector<2x16x16xf32>
    %422 = arith.addf %417, %421 : vector<2x16x16xf32>
    %c72 = arith.constant 72 : index
    %423 = memref.load %arg4[%c72] : memref<98xf32, #tpu.memory_space<smem>>
    %424 = vector.extract_strided_slice %412 {offsets = [0, 0, 2], sizes = [2, 16, 16], strides = [1, 1, 1]} : vector<2x16x22xf32> to vector<2x16x16xf32>
    %425 = vector.broadcast %423 : f32 to vector<2x16x16xf32>
    %426 = arith.mulf %425, %424 : vector<2x16x16xf32>
    %427 = arith.addf %422, %426 : vector<2x16x16xf32>
    %c73 = arith.constant 73 : index
    %428 = memref.load %arg4[%c73] : memref<98xf32, #tpu.memory_space<smem>>
    %429 = vector.extract_strided_slice %412 {offsets = [0, 0, 3], sizes = [2, 16, 16], strides = [1, 1, 1]} : vector<2x16x22xf32> to vector<2x16x16xf32>
    %430 = vector.broadcast %428 : f32 to vector<2x16x16xf32>
    %431 = arith.mulf %430, %429 : vector<2x16x16xf32>
    %432 = arith.addf %427, %431 : vector<2x16x16xf32>
    %c74 = arith.constant 74 : index
    %433 = memref.load %arg4[%c74] : memref<98xf32, #tpu.memory_space<smem>>
    %434 = vector.extract_strided_slice %412 {offsets = [0, 0, 4], sizes = [2, 16, 16], strides = [1, 1, 1]} : vector<2x16x22xf32> to vector<2x16x16xf32>
    %435 = vector.broadcast %433 : f32 to vector<2x16x16xf32>
    %436 = arith.mulf %435, %434 : vector<2x16x16xf32>
    %437 = arith.addf %432, %436 : vector<2x16x16xf32>
    %c75 = arith.constant 75 : index
    %438 = memref.load %arg4[%c75] : memref<98xf32, #tpu.memory_space<smem>>
    %439 = vector.extract_strided_slice %412 {offsets = [0, 0, 5], sizes = [2, 16, 16], strides = [1, 1, 1]} : vector<2x16x22xf32> to vector<2x16x16xf32>
    %440 = vector.broadcast %438 : f32 to vector<2x16x16xf32>
    %441 = arith.mulf %440, %439 : vector<2x16x16xf32>
    %442 = arith.addf %437, %441 : vector<2x16x16xf32>
    %c76 = arith.constant 76 : index
    %443 = memref.load %arg4[%c76] : memref<98xf32, #tpu.memory_space<smem>>
    %444 = vector.extract_strided_slice %412 {offsets = [0, 0, 6], sizes = [2, 16, 16], strides = [1, 1, 1]} : vector<2x16x22xf32> to vector<2x16x16xf32>
    %445 = vector.broadcast %443 : f32 to vector<2x16x16xf32>
    %446 = arith.mulf %445, %444 : vector<2x16x16xf32>
    %447 = arith.addf %442, %446 : vector<2x16x16xf32>
    %c0_90 = arith.constant 0 : index
    %c1_91 = arith.constant 1 : index
    %c4_92 = arith.constant 4 : index
    %c0_93 = arith.constant 0 : index
    %448 = vector.load %arg6[%c0_90, %c1_91, %c4_92, %c0_93] : memref<2x2x22x22xf32, #tpu.memory_space<vmem>>, vector<2x1x16x22xf32>
    %449 = vector.shape_cast %448 : vector<2x1x16x22xf32> to vector<2x16x22xf32>
    %c77 = arith.constant 77 : index
    %450 = memref.load %arg4[%c77] : memref<98xf32, #tpu.memory_space<smem>>
    %451 = vector.extract_strided_slice %449 {offsets = [0, 0, 0], sizes = [2, 16, 16], strides = [1, 1, 1]} : vector<2x16x22xf32> to vector<2x16x16xf32>
    %452 = vector.broadcast %450 : f32 to vector<2x16x16xf32>
    %453 = arith.mulf %452, %451 : vector<2x16x16xf32>
    %454 = arith.addf %447, %453 : vector<2x16x16xf32>
    %c78 = arith.constant 78 : index
    %455 = memref.load %arg4[%c78] : memref<98xf32, #tpu.memory_space<smem>>
    %456 = vector.extract_strided_slice %449 {offsets = [0, 0, 1], sizes = [2, 16, 16], strides = [1, 1, 1]} : vector<2x16x22xf32> to vector<2x16x16xf32>
    %457 = vector.broadcast %455 : f32 to vector<2x16x16xf32>
    %458 = arith.mulf %457, %456 : vector<2x16x16xf32>
    %459 = arith.addf %454, %458 : vector<2x16x16xf32>
    %c79 = arith.constant 79 : index
    %460 = memref.load %arg4[%c79] : memref<98xf32, #tpu.memory_space<smem>>
    %461 = vector.extract_strided_slice %449 {offsets = [0, 0, 2], sizes = [2, 16, 16], strides = [1, 1, 1]} : vector<2x16x22xf32> to vector<2x16x16xf32>
    %462 = vector.broadcast %460 : f32 to vector<2x16x16xf32>
    %463 = arith.mulf %462, %461 : vector<2x16x16xf32>
    %464 = arith.addf %459, %463 : vector<2x16x16xf32>
    %c80 = arith.constant 80 : index
    %465 = memref.load %arg4[%c80] : memref<98xf32, #tpu.memory_space<smem>>
    %466 = vector.extract_strided_slice %449 {offsets = [0, 0, 3], sizes = [2, 16, 16], strides = [1, 1, 1]} : vector<2x16x22xf32> to vector<2x16x16xf32>
    %467 = vector.broadcast %465 : f32 to vector<2x16x16xf32>
    %468 = arith.mulf %467, %466 : vector<2x16x16xf32>
    %469 = arith.addf %464, %468 : vector<2x16x16xf32>
    %c81 = arith.constant 81 : index
    %470 = memref.load %arg4[%c81] : memref<98xf32, #tpu.memory_space<smem>>
    %471 = vector.extract_strided_slice %449 {offsets = [0, 0, 4], sizes = [2, 16, 16], strides = [1, 1, 1]} : vector<2x16x22xf32> to vector<2x16x16xf32>
    %472 = vector.broadcast %470 : f32 to vector<2x16x16xf32>
    %473 = arith.mulf %472, %471 : vector<2x16x16xf32>
    %474 = arith.addf %469, %473 : vector<2x16x16xf32>
    %c82 = arith.constant 82 : index
    %475 = memref.load %arg4[%c82] : memref<98xf32, #tpu.memory_space<smem>>
    %476 = vector.extract_strided_slice %449 {offsets = [0, 0, 5], sizes = [2, 16, 16], strides = [1, 1, 1]} : vector<2x16x22xf32> to vector<2x16x16xf32>
    %477 = vector.broadcast %475 : f32 to vector<2x16x16xf32>
    %478 = arith.mulf %477, %476 : vector<2x16x16xf32>
    %479 = arith.addf %474, %478 : vector<2x16x16xf32>
    %c83 = arith.constant 83 : index
    %480 = memref.load %arg4[%c83] : memref<98xf32, #tpu.memory_space<smem>>
    %481 = vector.extract_strided_slice %449 {offsets = [0, 0, 6], sizes = [2, 16, 16], strides = [1, 1, 1]} : vector<2x16x22xf32> to vector<2x16x16xf32>
    %482 = vector.broadcast %480 : f32 to vector<2x16x16xf32>
    %483 = arith.mulf %482, %481 : vector<2x16x16xf32>
    %484 = arith.addf %479, %483 : vector<2x16x16xf32>
    %c0_94 = arith.constant 0 : index
    %c1_95 = arith.constant 1 : index
    %c5_96 = arith.constant 5 : index
    %c0_97 = arith.constant 0 : index
    %485 = vector.load %arg6[%c0_94, %c1_95, %c5_96, %c0_97] : memref<2x2x22x22xf32, #tpu.memory_space<vmem>>, vector<2x1x16x22xf32>
    %486 = vector.shape_cast %485 : vector<2x1x16x22xf32> to vector<2x16x22xf32>
    %c84 = arith.constant 84 : index
    %487 = memref.load %arg4[%c84] : memref<98xf32, #tpu.memory_space<smem>>
    %488 = vector.extract_strided_slice %486 {offsets = [0, 0, 0], sizes = [2, 16, 16], strides = [1, 1, 1]} : vector<2x16x22xf32> to vector<2x16x16xf32>
    %489 = vector.broadcast %487 : f32 to vector<2x16x16xf32>
    %490 = arith.mulf %489, %488 : vector<2x16x16xf32>
    %491 = arith.addf %484, %490 : vector<2x16x16xf32>
    %c85 = arith.constant 85 : index
    %492 = memref.load %arg4[%c85] : memref<98xf32, #tpu.memory_space<smem>>
    %493 = vector.extract_strided_slice %486 {offsets = [0, 0, 1], sizes = [2, 16, 16], strides = [1, 1, 1]} : vector<2x16x22xf32> to vector<2x16x16xf32>
    %494 = vector.broadcast %492 : f32 to vector<2x16x16xf32>
    %495 = arith.mulf %494, %493 : vector<2x16x16xf32>
    %496 = arith.addf %491, %495 : vector<2x16x16xf32>
    %c86 = arith.constant 86 : index
    %497 = memref.load %arg4[%c86] : memref<98xf32, #tpu.memory_space<smem>>
    %498 = vector.extract_strided_slice %486 {offsets = [0, 0, 2], sizes = [2, 16, 16], strides = [1, 1, 1]} : vector<2x16x22xf32> to vector<2x16x16xf32>
    %499 = vector.broadcast %497 : f32 to vector<2x16x16xf32>
    %500 = arith.mulf %499, %498 : vector<2x16x16xf32>
    %501 = arith.addf %496, %500 : vector<2x16x16xf32>
    %c87 = arith.constant 87 : index
    %502 = memref.load %arg4[%c87] : memref<98xf32, #tpu.memory_space<smem>>
    %503 = vector.extract_strided_slice %486 {offsets = [0, 0, 3], sizes = [2, 16, 16], strides = [1, 1, 1]} : vector<2x16x22xf32> to vector<2x16x16xf32>
    %504 = vector.broadcast %502 : f32 to vector<2x16x16xf32>
    %505 = arith.mulf %504, %503 : vector<2x16x16xf32>
    %506 = arith.addf %501, %505 : vector<2x16x16xf32>
    %c88 = arith.constant 88 : index
    %507 = memref.load %arg4[%c88] : memref<98xf32, #tpu.memory_space<smem>>
    %508 = vector.extract_strided_slice %486 {offsets = [0, 0, 4], sizes = [2, 16, 16], strides = [1, 1, 1]} : vector<2x16x22xf32> to vector<2x16x16xf32>
    %509 = vector.broadcast %507 : f32 to vector<2x16x16xf32>
    %510 = arith.mulf %509, %508 : vector<2x16x16xf32>
    %511 = arith.addf %506, %510 : vector<2x16x16xf32>
    %c89 = arith.constant 89 : index
    %512 = memref.load %arg4[%c89] : memref<98xf32, #tpu.memory_space<smem>>
    %513 = vector.extract_strided_slice %486 {offsets = [0, 0, 5], sizes = [2, 16, 16], strides = [1, 1, 1]} : vector<2x16x22xf32> to vector<2x16x16xf32>
    %514 = vector.broadcast %512 : f32 to vector<2x16x16xf32>
    %515 = arith.mulf %514, %513 : vector<2x16x16xf32>
    %516 = arith.addf %511, %515 : vector<2x16x16xf32>
    %c90 = arith.constant 90 : index
    %517 = memref.load %arg4[%c90] : memref<98xf32, #tpu.memory_space<smem>>
    %518 = vector.extract_strided_slice %486 {offsets = [0, 0, 6], sizes = [2, 16, 16], strides = [1, 1, 1]} : vector<2x16x22xf32> to vector<2x16x16xf32>
    %519 = vector.broadcast %517 : f32 to vector<2x16x16xf32>
    %520 = arith.mulf %519, %518 : vector<2x16x16xf32>
    %521 = arith.addf %516, %520 : vector<2x16x16xf32>
    %c0_98 = arith.constant 0 : index
    %c1_99 = arith.constant 1 : index
    %c6_100 = arith.constant 6 : index
    %c0_101 = arith.constant 0 : index
    %522 = vector.load %arg6[%c0_98, %c1_99, %c6_100, %c0_101] : memref<2x2x22x22xf32, #tpu.memory_space<vmem>>, vector<2x1x16x22xf32>
    %523 = vector.shape_cast %522 : vector<2x1x16x22xf32> to vector<2x16x22xf32>
    %c91 = arith.constant 91 : index
    %524 = memref.load %arg4[%c91] : memref<98xf32, #tpu.memory_space<smem>>
    %525 = vector.extract_strided_slice %523 {offsets = [0, 0, 0], sizes = [2, 16, 16], strides = [1, 1, 1]} : vector<2x16x22xf32> to vector<2x16x16xf32>
    %526 = vector.broadcast %524 : f32 to vector<2x16x16xf32>
    %527 = arith.mulf %526, %525 : vector<2x16x16xf32>
    %528 = arith.addf %521, %527 : vector<2x16x16xf32>
    %c92 = arith.constant 92 : index
    %529 = memref.load %arg4[%c92] : memref<98xf32, #tpu.memory_space<smem>>
    %530 = vector.extract_strided_slice %523 {offsets = [0, 0, 1], sizes = [2, 16, 16], strides = [1, 1, 1]} : vector<2x16x22xf32> to vector<2x16x16xf32>
    %531 = vector.broadcast %529 : f32 to vector<2x16x16xf32>
    %532 = arith.mulf %531, %530 : vector<2x16x16xf32>
    %533 = arith.addf %528, %532 : vector<2x16x16xf32>
    %c93 = arith.constant 93 : index
    %534 = memref.load %arg4[%c93] : memref<98xf32, #tpu.memory_space<smem>>
    %535 = vector.extract_strided_slice %523 {offsets = [0, 0, 2], sizes = [2, 16, 16], strides = [1, 1, 1]} : vector<2x16x22xf32> to vector<2x16x16xf32>
    %536 = vector.broadcast %534 : f32 to vector<2x16x16xf32>
    %537 = arith.mulf %536, %535 : vector<2x16x16xf32>
    %538 = arith.addf %533, %537 : vector<2x16x16xf32>
    %c94 = arith.constant 94 : index
    %539 = memref.load %arg4[%c94] : memref<98xf32, #tpu.memory_space<smem>>
    %540 = vector.extract_strided_slice %523 {offsets = [0, 0, 3], sizes = [2, 16, 16], strides = [1, 1, 1]} : vector<2x16x22xf32> to vector<2x16x16xf32>
    %541 = vector.broadcast %539 : f32 to vector<2x16x16xf32>
    %542 = arith.mulf %541, %540 : vector<2x16x16xf32>
    %543 = arith.addf %538, %542 : vector<2x16x16xf32>
    %c95 = arith.constant 95 : index
    %544 = memref.load %arg4[%c95] : memref<98xf32, #tpu.memory_space<smem>>
    %545 = vector.extract_strided_slice %523 {offsets = [0, 0, 4], sizes = [2, 16, 16], strides = [1, 1, 1]} : vector<2x16x22xf32> to vector<2x16x16xf32>
    %546 = vector.broadcast %544 : f32 to vector<2x16x16xf32>
    %547 = arith.mulf %546, %545 : vector<2x16x16xf32>
    %548 = arith.addf %543, %547 : vector<2x16x16xf32>
    %c96 = arith.constant 96 : index
    %549 = memref.load %arg4[%c96] : memref<98xf32, #tpu.memory_space<smem>>
    %550 = vector.extract_strided_slice %523 {offsets = [0, 0, 5], sizes = [2, 16, 16], strides = [1, 1, 1]} : vector<2x16x22xf32> to vector<2x16x16xf32>
    %551 = vector.broadcast %549 : f32 to vector<2x16x16xf32>
    %552 = arith.mulf %551, %550 : vector<2x16x16xf32>
    %553 = arith.addf %548, %552 : vector<2x16x16xf32>
    %c97 = arith.constant 97 : index
    %554 = memref.load %arg4[%c97] : memref<98xf32, #tpu.memory_space<smem>>
    %555 = vector.extract_strided_slice %523 {offsets = [0, 0, 6], sizes = [2, 16, 16], strides = [1, 1, 1]} : vector<2x16x22xf32> to vector<2x16x16xf32>
    %556 = vector.broadcast %554 : f32 to vector<2x16x16xf32>
    %557 = arith.mulf %556, %555 : vector<2x16x16xf32>
    %558 = arith.addf %553, %557 : vector<2x16x16xf32>
    %559 = arith.negf %558 : vector<2x16x16xf32>
    %560 = math.exp %559 : vector<2x16x16xf32>
    %cst_102 = arith.constant 1.000000e+00 : f32
    %561 = vector.broadcast %cst_102 : f32 to vector<2x16x16xf32>
    %562 = arith.addf %561, %560 : vector<2x16x16xf32>
    %563 = arith.divf %561, %562 : vector<2x16x16xf32>
    %564 = vector.shape_cast %563 : vector<2x16x16xf32> to vector<2x256xf32>
    %c0_103 = arith.constant 0 : index
    %c0_104 = arith.constant 0 : index
    %c0_105 = arith.constant 0 : index
    %565 = vector.load %arg5[%c0_103, %c0_104, %c0_105] : memref<2x4x256xf32, #tpu.memory_space<vmem>>, vector<2x4x256xf32>
    %566 = vector.shape_cast %564 : vector<2x256xf32> to vector<2x1x256xf32>
    %567 = vector.broadcast %566 : vector<2x1x256xf32> to vector<2x4x256xf32>
    %568 = arith.mulf %565, %567 : vector<2x4x256xf32>
    %c0_106 = arith.constant 0 : index
    %c0_107 = arith.constant 0 : index
    %c0_108 = arith.constant 0 : index
    %569 = vector.load %arg5[%c0_106, %c0_107, %c0_108] : memref<2x4x256xf32, #tpu.memory_space<vmem>>, vector<2x4x256xf32>
    tpu.vector_store %arg5[%c0_106, %c0_107, %c0_108], %568 {strides = array<i32>} : memref<2x4x256xf32, #tpu.memory_space<vmem>>, vector<2x4x256xf32>,
    return
  }
  func.func @transform_0(%arg0: i32) -> (i32, i32, i32) {
    %c0_i32 = arith.constant 0 : i32
    %c0_i32_0 = arith.constant 0 : i32
    %c0_i32_1 = arith.constant 0 : i32
    return %arg0, %c0_i32, %c0_i32_0 : i32, i32, i32
  }
  func.func @transform_1(%arg0: i32) -> (i32, i32) {
    %c0_i32 = arith.constant 0 : i32
    %c0_i32_0 = arith.constant 0 : i32
    %c0_i32_1 = arith.constant 0 : i32
    return %c0_i32, %c0_i32_0 : i32, i32
  }
  func.func @transform_2(%arg0: i32) -> (i32, i32) {
    %c0_i32 = arith.constant 0 : i32
    %c0_i32_0 = arith.constant 0 : i32
    %c0_i32_1 = arith.constant 0 : i32
    return %c0_i32, %c0_i32_0 : i32, i32
  }
  func.func @transform_3(%arg0: i32) -> i32 {
    %c0_i32 = arith.constant 0 : i32
    %c0_i32_0 = arith.constant 0 : i32
    return %c0_i32 : i32
  }
  func.func @transform_4(%arg0: i32) -> (i32, i32, i32) {
    %c0_i32 = arith.constant 0 : i32
    %c0_i32_0 = arith.constant 0 : i32
    %c0_i32_1 = arith.constant 0 : i32
    return %arg0, %c0_i32, %c0_i32_0 : i32, i32, i32
  }
}

</mosaic_0001>

<bundles_post_ra>
// kernel: tpu_custom_call.1
= control target key start
LH: loop header
LB: loop body
LE: loop exit
PB: predicated region body
PF: predicated region fallthrough
CT: control target
= control target key end

     0   :  { %9 = vsyncpa [#allocation4], 0  ;;  %s6461_s0 = inlined_call_operand.hbm [shape: f32[2,4,256], index: 0, kind: input, shape index: {}]   ;;  %s6462_s1 = inlined_call_operand.vmem [shape: f32[4,2], index: 1, kind: input, shape index: {}]   ;;  %s6463_s2 = inlined_call_operand.vmem [shape: f32[2,4], index: 2, kind: input, shape index: {}]   ;;  %s6464_s3 = inlined_call_operand.vmem [shape: f32[98], index: 3, kind: input, shape index: {}]   ;;  %s6465_s4 = inlined_call_operand.hbm [shape: f32[2,4,256], index: 4, kind: output, shape index: {}]  }
   0x1   :  { %10 = vsyncpa [#allocation6], 0 }
   0x2   :  { %11 = vsyncpa [#allocation5], 0  ;;  %s3997_s15 = smov [#allocation3]   ;;  %s34_s19 = sshll.u32 %s6464_s3, 4  ;;  %s35_s19 = int_to_ptr.vmem [resolvable:$true] %s34_s19 }
   0x3   :  { %s17_s16 = sshll.u32 %s3997_s15, 4  ;;  %s3935_s22 = scalar_lea.hbm %s6461_s0, 256  ;;  %s18_s16 = int_to_ptr.vmem [resolvable:$true] %s17_s16 }
   0x4   :  { %p3936_p0 = scmp.ne.s32.totalorder %s6461_s0, %s3935_s22  ;;  %p3939_p1 = scmp.lt.u32.totalorder %s3935_s22, %s6461_s0 }
   0x6   :  { %p3941_p2 = pnand %p3939_p1, %p3936_p0 }
   0x8   :  { %3944 = shalt.err (!%p3941_p2)
}
   0x9   :  { %s3945_s27 = scalar_lea.vmem %s18_s16, 256  ;;  %p3950_p4 = scmp.lt.s32.totalorder %s18_s16, %s18_s16 }
   0xa   :  { %p3946_p3 = scmp.ne.s32.totalorder %s18_s16, %s3945_s27  ;;  %p3951_p5 = scmp.lt.s32.totalorder %s3945_s27, %s3945_s27 }
   0xc   :  { %p3952_p6 = por %p3951_p5, %p3950_p4 }
   0xe   :  { %p3953_p7 = pnand %p3952_p6, %p3946_p3 }
  0x10   :  { %3956 = shalt.err (!%p3953_p7)
}
  0x11   :  { %s3998_s3 = smov 128   ;;  %s3999_s28 = smov 8  }
  0x12   :  { %23 = dma.hbm_to_vmem [thread:$0]  %s6461_s0, 256, %s18_s16, [#allocation4], %s3998_s3, %s3998_s3, %s3999_s28  }
  0x13   :  { %s3957_s5 = scalar_lea.vmem %s35_s19, 16  ;;  %p3962_p9 = scmp.lt.s32.totalorder %s35_s19, %s35_s19 }
  0x14   :  { %p3958_p8 = scmp.ne.s32.totalorder %s35_s19, %s3957_s5  ;;  %p3963_p10 = scmp.lt.s32.totalorder %s3957_s5, %s3957_s5 }
  0x16   :  { %p3964_p11 = por %p3963_p10, %p3962_p9 }
  0x18   :  { %p3965_p12 = pnand %p3964_p11, %p3958_p8 }
  0x1a   :  { %3968 = shalt.err (!%p3965_p12)
}
  0x1b   :  { %s4000_s6 = smov [#allocation7]  }
  0x1c   :  { %37 = dma.vmem_to_smem %s35_s19, 16, %s4000_s6, [#allocation6]  }
  0x1d   :  { %3991 = dma.done.wait [#allocation4], 256  }
  0x1e   :  { %3992 = vsyncadd [#allocation4], 4294967040 }
  0x1f   :  { %3993 = dma.done.wait [#allocation6], 16  }
  0x20   :  { %3994 = vsyncadd [#allocation6], 4294967280 }
  0x21   :  { %44 = sfence }
  0x22   :  { %v4066_v0 = vld [vmem:[#allocation3] sm:$0xff]  ;;  %v4068_v1 = vld [vmem:[#allocation3 + $0x8] sm:$0xff]  ;;  %v4001_v2 = vmov 1.0|1.0   ;;  %v4002_v5 = vmov 0   ;;  %vm152_vm0 = vcmask 1043456   ;;  %v137_v14 = vlaneseq }
  0x23   :  { %3849 = vmatprep.subr.bf16.mxu0 %v4001_v2  ;;  %v50_v3 = vcombine.high %v4066_v0, %v4068_v1  ;;  %v49_v4 = vcombine.low %v4066_v0, %v4068_v1  ;;  %3891 = vset.pattern.permute.xlu0 %v4002_v5  ;;  %v128_v12 = vld [vmem:[%s6462_s1] sm:$0xf]  ;;  %v6466_v13 = vmov 0.0   ;;  %vm4004_vm1 = vmmov 0   ;;  %s4007_s9 = smov 96   ;;  %s4008_s10 = smov 80  }
  0x24   :  { %3850 = vmatpush3.bf16.msra.mxu0 %v4001_v2  ;;  %3839 = vmatprep.subr.mxu1 %v6466_v13  ;;  %v138_v15 = vand.u32 127, %v137_v14  ;;  %v4082_v16 = vshrl.u32 %v137_v14, 7  ;;  %vm147_vm2 = vcmask 1041409   ;;  %vm149_vm3 = vcmask 31744   ;;  %v227_v22 = vld [vmem:[%s6463_s2] sm:$0x3] }
  0x25   :  { %3851 = vmatprep.subr.bf16.mxu0 %v4001_v2  ;;  %117 = vmatprep.mubr.f32.mxu0 %v50_v3  ;;  %vm232_vm4 = vcmask 1041408   ;;  %vm228_vm5 = vcmask 15360   ;;  %v4005_v37 = vmov 839922192   ;;  %s4006_s2 = smov 112   ;;  %s4009_s11 = smov 64  }
  0x26   :  { %3841 = vmatprep.mubr.msk.f32.mxu1 %vm4004_vm1, %v6466_v13  ;;  %3840 = vmatpush3.msk.msra.mxu1 %vm152_vm0, %v128_v12  ;;  %v141_v18 = vsub.s32 %v138_v15, %v4082_v16  ;;  %v4092_v32 = vsub.s32 0, %v4082_v16  ;;  %v321_v35 = vsub.s32 1, %v4082_v16  ;;  %v329_v38 = vunpack.c.l.s4 %v4005_v37  ;;  %s4010_s12 = smov 48   ;;  %s4011_s13 = smov 32  }
  0x27   :  { %3844 = vmatprep.subr.mxu1 %v6466_v13  ;;  %s4012_s14 = smov 16   ;;  %vm423_vm6 = vcmask 23552   ;;  %vm432_vm7 = vcmask 179352   ;;  %vm414_vm8 = vcmask 174080   ;;  %s4015_s15 = smov 3   ;;  %vm665_vm9 = vcmask 154648  }
  0x28   :  { %3852 = vmatpush3.bf16.msra.mxu0 %v4001_v2  ;;  %6474 = vst [vmem:[#allocation12_spill] sm:$0xff] %v4092_v32  ;;  %v330_v39 = vunpack.c.0.s8 %v329_v38  ;;  %426 = vst.msk [vmem:[#allocation2 + $0x1b] sm:$0xff] %vm423_vm6, %v6466_v13  ;;  %s3748_s16 = sld [smem:[#allocation7 + $0x32]]  ;;  %s3749_s17 = sld [smem:[#allocation7 + $0x33]]  ;;  %vm3613_vm10 = vcmask 130048   ;;  %vm3616_vm11 = vcmask 261120  }
  0x29   :  { %3853 = vmatprep.subr.bf16.mxu0 %v4001_v2  ;;  %424 = vst.msk [vmem:[#allocation2 + $0x3] sm:$0xff] %vm423_vm6, %v6466_v13  ;;  %425 = vst.msk [vmem:[#allocation2 + $0xb] sm:$0xff] %vm423_vm6, %v6466_v13  ;;  %s4016_s18 = smov 127   ;;  %s3750_s19 = sld [smem:[#allocation7 + $0x34]]  ;;  %vm3619_vm12 = vcmask 392192   ;;  %vm3622_vm13 = vcmask 523264  }
  0x2a   :  { %v333_v40 = vsub.s32 %v330_v39, %v4082_v16  ;;  %427 = vst.msk [vmem:[#allocation2 + $0x23] sm:$0xff] %vm423_vm6, %v6466_v13  ;;  %428 = vst.msk [vmem:[#allocation2 + $0x33] sm:$0xff] %vm423_vm6, %v6466_v13  ;;  %s4017_s20 = smov 126   ;;  %s3751_s21 = sld [smem:[#allocation7 + $0x35]]  ;;  %vm3625_vm14 = vcmask 654336   ;;  %vm3628_vm15 = vcmask 785408  }
  0x2b   :  { %429 = vst.msk [vmem:[#allocation2 + $0x3b] sm:$0xff] %vm423_vm6, %v6466_v13  ;;  %430 = vst.msk [vmem:[#allocation2 + $0x4b] sm:$0xff] %vm423_vm6, %v6466_v13  ;;  %s4018_s22 = smov 125   ;;  %s3752_s23 = sld [smem:[#allocation7 + $0x36]] }
  0x2c   :  { %3854 = vmatpush3.bf16.msra.mxu0 %v4001_v2  ;;  %431 = vst.msk [vmem:[#allocation2 + $0x53] sm:$0xff] %vm423_vm6, %v6466_v13  ;;  %s4019_s24 = smov 124   ;;  %s3753_s25 = sld [smem:[#allocation7 + $0x37]] }
  0x2d   :  { %3855 = vmatprep.subr.bf16.mxu0 %v4001_v2  ;;  %435 = vst.msk [vmem:[#allocation2 + $0x1b] sm:$0xff] %vm432_vm7, %v6466_v13  ;;  %439 = vst.msk [vmem:[#allocation2 + $0x4b] sm:$0xff] %vm432_vm7, %v6466_v13  ;;  %s4020_s26 = smov 123   ;;  %s3755_s27 = sld [smem:[#allocation7 + $0x39]] }
  0x2e   :  { %433 = vst.msk [vmem:[#allocation2 + $0x3] sm:$0xff] %vm432_vm7, %v6466_v13  ;;  %434 = vst.msk [vmem:[#allocation2 + $0xb] sm:$0xff] %vm432_vm7, %v6466_v13  ;;  %s4021_s29 = smov 122   ;;  %s3756_s30 = sld [smem:[#allocation7 + $0x3a]] }
  0x2f   :  { %436 = vst.msk [vmem:[#allocation2 + $0x23] sm:$0xff] %vm432_vm7, %v6466_v13  ;;  %437 = vst.msk [vmem:[#allocation2 + $0x33] sm:$0xff] %vm432_vm7, %v6466_v13  ;;  %s3757_s5 = sld [smem:[#allocation7 + $0x3b]]  ;;  %s3758_s6 = sld [smem:[#allocation7 + $0x3c]] }
  0x30   :  { %3856 = vmatpush3.bf16.msra.mxu0 %v4001_v2  ;;  %438 = vst.msk [vmem:[#allocation2 + $0x3b] sm:$0xff] %vm432_vm7, %v6466_v13  ;;  %440 = vst.msk [vmem:[#allocation2 + $0x53] sm:$0xff] %vm432_vm7, %v6466_v13  ;;  %s3781_s0 = sld [smem:[#allocation7 + $0x53]]  ;;  %s3759_s7 = sld [smem:[#allocation7 + $0x3d]] }
  0x31   :  { %3857 = vmatprep.subr.bf16.mxu0 %v4001_v2  ;;  %416 = vst.msk [vmem:[#allocation2 + $0x18] sm:$0x7] %vm414_vm8, %v6466_v13  ;;  %415 = vst.msk [vmem:[#allocation2] sm:$0x7] %vm414_vm8, %v6466_v13  ;;  %s3760_s1 = sld [smem:[#allocation7 + $0x3e]]  ;;  %s3762_s8 = sld [smem:[#allocation7 + $0x40]] }
  0x32   :  { %417 = vst.msk [vmem:[#allocation2 + $0x30] sm:$0x7] %vm414_vm8, %v6466_v13  ;;  %418 = vst.msk [vmem:[#allocation2 + $0x48] sm:$0x7] %vm414_vm8, %v6466_v13 }
  0x33   :  { %419 = vst.msk [vmem:[#allocation2 + $0x13] sm:$0x7] %vm414_vm8, %v6466_v13  ;;  %420 = vst.msk [vmem:[#allocation2 + $0x2b] sm:$0x7] %vm414_vm8, %v6466_v13 }
  0x34   :  { %3858 = vmatpush3.bf16.msra.mxu0 %v4001_v2  ;;  %421 = vst.msk [vmem:[#allocation2 + $0x43] sm:$0x7] %vm414_vm8, %v6466_v13  ;;  %422 = vst.msk [vmem:[#allocation2 + $0x5b] sm:$0x7] %vm414_vm8, %v6466_v13 }
  0x35   :  { %3859 = vmatprep.subr.bf16.mxu0 %v4001_v2 }
  0x38   :  { %3860 = vmatpush3.bf16.msra.mxu0 %v4001_v2 }
  0x39   :  { %3861 = vmatprep.subr.bf16.mxu0 %v4001_v2 }
  0x3c   :  { %3862 = vmatpush3.bf16.msra.mxu0 %v4001_v2 }
  0x3d   :  { %3863 = vmatprep.subr.bf16.mxu0 %v4001_v2 }
  0x40   :  { %3864 = vmatpush3.bf16.msra.mxu0 %v4001_v2 }
  0x43   :  { %118 = vmatmul.mubr.f32.vlgmr.msra.gmra.mrb[0].mxu0 %v49_v4 }
 0x116   :  { %v3832_v6 = vpop.f32.mrb[0].mxu0 }
 0x117   :  { %v3833_v7 = vpop.f32.mrb[1].mxu0 }
 0x118   :  { %v3834_v8 = vadd.f32 %v3833_v7, %v3832_v6 }
 0x11a   :  { %v124_v9 = vcombine.high %v3834_v8, %v3834_v8  ;;  %v126_v10 = vmul.f32 0.00390625, %v3834_v8 }
 0x11c   :  { %132 = vperm.xlu0 %3891, %v126_v10   ;;  %v127_v11 = vmul.f32 0.00390625, %v124_v9 }
 0x120   :  { %135 = vperm.xlu0 %3891, %v127_v11  }
 0x19b   :  { %v133_v17 = vpop.permute.xlu0 %132 }
 0x19c   :  { %v142_v20 = vrot.slane %v133_v17, %v141_v18 }
 0x19f   :  { %v136_v19 = vpop.permute.xlu0 %135 }
 0x1a0   :  { %v146_v21 = vrot.slane %v136_v19, %v141_v18 }
 0x1a2   :  { %v148_v23 = vsel %vm147_vm2, %v146_v21, %v142_v20 }
 0x1a3   :  { %3842 = vmatmul.mubr.msk.f32.vlgmr.msra.gmra.mrb[0].mxu1 %vm149_vm3, %v148_v23 }
 0x1a4   :  { %3845 = vmatpush3.msk.msra.mxu1 %vm232_vm4, %v227_v22  ;;  %3846 = vmatprep.mubr.msk.f32.mxu1 %vm4004_vm1, %v6466_v13 }
 0x276   :  { %v222_v24 = vpop.f32.mrb[0].mxu1 }
 0x277   :  { %v226_v25 = vmax.f32 %v222_v24, 0.0  ;;  %v3843_v26 = vpop.f32.mrb[1].mxu1 }
 0x279   :  { %3847 = vmatmul.mubr.msk.f32.vlgmr.msra.gmra.mrb[2].mxu1 %vm228_vm5, %v226_v25 }
 0x34c   :  { %v302_v27 = vpop.f32.mrb[2].mxu1 }
 0x34d   :  { %v3698_v28 = vmul.f32 -1.442695, %v302_v27  ;;  %v3848_v29 = vpop.f32.mrb[3].mxu1 }
 0x34f   :  { %3894 = vpow2.f32 %v3698_v28 }
 0x359   :  { %v3895_v30 = vpop.eup %3894 }
 0x35a   :  { %v309_v31 = vadd.f32 1.0, %v3895_v30 }
 0x35c   :  { %3896 = vrcp.f32 %v309_v31 }
 0x366   :  { %v3897_v33 = vpop.eup %3896 }
 0x367   :  { %v315_v34 = vrot.slane %v3897_v33, %v4092_v32  ;;  %v322_v36 = vrot.slane %v3897_v33, %v321_v35 }
 0x369   :  { %317 = vbcast.lane.b32.xlu1 %v315_v34, 256 }
 0x36d   :  { %324 = vbcast.lane.b32.xlu1 %v322_v36, 256 }
 0x3db   :  { %v318_v41 = vpop.permute.xlu1 %317 }
 0x3dc   :  { %v334_v42 = vrot.slane %v318_v41, %v333_v40 }
 0x3de   :  { %v344_v43 = vmul.f32 %v334_v42, %v4066_v0 }
 0x3df   :  { %v325_v44 = vpop.permute.xlu1 %324 }
 0x3e0   :  { %v354_v45 = vsel %vm152_vm0, %v344_v43, 0.0  ;;  %v386_v46 = vsel %vm152_vm0, %v344_v43, -inf  ;;  %346 = vst [vmem:[#allocation8] sm:$0xff] %v344_v43  ;;  %v341_v47 = vrot.slane %v325_v44, %v333_v40  ;;  %v350_v19 = vcombine.high %v344_v43, %v344_v43 }
 0x3e1   :  { %v355_v48 = vrot.slane %v354_v45, 4  ;;  %v387_v49 = vrot.slane %v386_v46, 4 }
 0x3e2   :  { %v345_v50 = vmul.f32 %v341_v47, %v4068_v1  ;;  %v393_v20 = vsel %vm152_vm0, %v350_v19, -inf  ;;  %v361_v34 = vsel %vm152_vm0, %v350_v19, 0.0 }
 0x3e3   :  { %v356_v51 = vadd.f32 %v355_v48, %v354_v45  ;;  %v388_v52 = vmax.f32 %v386_v46, %v387_v49  ;;  %v394_v22 = vrot.slane %v393_v20, 4  ;;  %v362_v36 = vrot.slane %v361_v34, 4 }
 0x3e4   :  { %v368_v53 = vsel %vm152_vm0, %v345_v50, 0.0  ;;  %v400_v54 = vsel %vm152_vm0, %v345_v50, -inf  ;;  %347 = vst [vmem:[#allocation8 + $0x8] sm:$0xff] %v345_v50  ;;  %v351_v21 = vcombine.high %v345_v50, %v345_v50 }
 0x3e5   :  { %v357_v55 = vrot.slane %v356_v51, 2  ;;  %v389_v56 = vrot.slane %v388_v52, 2  ;;  %v369_v57 = vrot.slane %v368_v53, 4  ;;  %v401_v58 = vrot.slane %v400_v54, 4 }
 0x3e6   :  { %v407_v23 = vsel %vm152_vm0, %v351_v21, -inf  ;;  %v395_v24 = vmax.f32 %v393_v20, %v394_v22  ;;  %v375_v38 = vsel %vm152_vm0, %v351_v21, 0.0  ;;  %v363_v39 = vadd.f32 %v362_v36, %v361_v34 }
 0x3e7   :  { %v390_v59 = vmax.f32 %v388_v52, %v389_v56  ;;  %v358_v60 = vadd.f32 %v357_v55, %v356_v51  ;;  %v370_v61 = vadd.f32 %v369_v57, %v368_v53  ;;  %v402_v62 = vmax.f32 %v400_v54, %v401_v58 }
 0x3e8   :  { %v408_v25 = vrot.slane %v407_v23, 4  ;;  %v396_v26 = vrot.slane %v395_v24, 2  ;;  %v376_v40 = vrot.slane %v375_v38, 4  ;;  %v364_v41 = vrot.slane %v363_v39, 2 }
 0x3e9   :  { %v391_v63 = vrot.slane %v390_v59, 1  ;;  %v371_v0 = vrot.slane %v370_v61, 2  ;;  %v403_v2 = vrot.slane %v402_v62, 2  ;;  %v359_v1 = vrot.slane %v358_v60, 1 }
 0x3ea   :  { %v409_v27 = vmax.f32 %v407_v23, %v408_v25  ;;  %v397_v28 = vmax.f32 %v395_v24, %v396_v26  ;;  %v377_v42 = vadd.f32 %v376_v40, %v375_v38  ;;  %v365_v43 = vadd.f32 %v364_v41, %v363_v39 }
 0x3eb   :  { %v392_v3 = vmax.f32 %v390_v59, %v391_v63  ;;  %v372_v4 = vadd.f32 %v371_v0, %v370_v61  ;;  %v404_v5 = vmax.f32 %v402_v62, %v403_v2  ;;  %v360_v8 = vadd.f32 %v359_v1, %v358_v60 }
 0x3ec   :  { %v410_v29 = vrot.slane %v409_v27, 2  ;;  %v398_v30 = vrot.slane %v397_v28, 1  ;;  %v378_v44 = vrot.slane %v377_v42, 2  ;;  %v366_v45 = vrot.slane %v365_v43, 1 }
 0x3ed   :  { %672 = vrot.lane.b32.xlu0 %v392_v3, %s4006_s2  ;;  %v373_v6 = vrot.slane %v372_v4, 1  ;;  %v405_v7 = vrot.slane %v404_v5, 1  ;;  %v382_v14 = vmul.f32 0.25, %v360_v8  ;;  %v4013_v63 = vmov 1983009808  }
 0x3ee   :  { %v411_v31 = vmax.f32 %v409_v27, %v410_v29  ;;  %v4138_v33 = vmax.f32 %v397_v28, %v398_v30  ;;  %v379_v46 = vadd.f32 %v378_v44, %v377_v42  ;;  %v367_v47 = vadd.f32 %v366_v45, %v365_v43 }
 0x3ef   :  { %v374_v9 = vadd.f32 %v373_v6, %v372_v4  ;;  %v406_v10 = vmax.f32 %v404_v5, %v405_v7  ;;  %v551_v0 = vunpack.c.l.s4 %v4013_v63  ;;  %vm3631_vm0 = vcmask 916480  }
 0x3f0   :  { %v412_v35 = vrot.slane %v411_v31, 1  ;;  %v380_v48 = vrot.slane %v379_v46, 1  ;;  %v4171_v49 = vmul.f32 0.25, %v367_v47 }
 0x3f1   :  { %676 = vrot.lane.b32.xlu0 %v392_v3, %s4007_s9  ;;  %v384_v11 = vmul.f32 0.25, %v374_v9  ;;  %674 = vrot.lane.b32.xlu1 %v406_v10, %s4006_s2  ;;  %v730_v12 = vrot.slane %v406_v10, 7  ;;  %v552_v6 = vunpack.c.0.s8 %v551_v0 }
 0x3f2   :  { %v4144_v37 = vmax.f32 %v411_v31, %v412_v35  ;;  %v381_v50 = vadd.f32 %v380_v48, %v379_v46 }
 0x3f3   :  { %v4107_v15 = vsel %vm147_vm2, %v730_v12, %v392_v3  ;;  %v501_v17 = vrot.slane %v384_v11, 7  ;;  %v4014_v12 = vmov 1934713408   ;;  %v4234_v22 = vsub.s32 %v552_v6, %v4082_v16 }
 0x3f4   :  { %v4177_v51 = vmul.f32 0.25, %v381_v50 }
 0x3f5   :  { %680 = vrot.lane.b32.xlu0 %v392_v3, %s4008_s10  ;;  %678 = vrot.lane.b32.xlu1 %v406_v10, %s4007_s9  ;;  %v4112_v18 = vsel %vm147_vm2, %v501_v17, %v382_v14  ;;  %6475 = vst [vmem:[#allocation13_spill] sm:$0xff] %v4234_v22 }
 0x3f9   :  { %684 = vrot.lane.b32.xlu0 %v392_v3, %s4009_s11  ;;  %682 = vrot.lane.b32.xlu1 %v406_v10, %s4008_s10 }
 0x3fd   :  { %688 = vrot.lane.b32.xlu0 %v392_v3, %s4010_s12  ;;  %686 = vrot.lane.b32.xlu1 %v406_v10, %s4009_s11 }
 0x401   :  { %692 = vrot.lane.b32.xlu0 %v392_v3, %s4011_s13  ;;  %690 = vrot.lane.b32.xlu1 %v406_v10, %s4010_s12 }
 0x405   :  { %696 = vrot.lane.b32.xlu0 %v392_v3, %s4012_s14  ;;  %694 = vrot.lane.b32.xlu1 %v406_v10, %s4011_s13 }
 0x409   :  { %443 = vrot.lane.b32.xlu0 %v382_v14, %s4006_s2  ;;  %698 = vrot.lane.b32.xlu1 %v406_v10, %s4012_s14 }
 0x40d   :  { %447 = vrot.lane.b32.xlu0 %v382_v14, %s4007_s9  ;;  %445 = vrot.lane.b32.xlu1 %v384_v11, %s4006_s2 }
 0x411   :  { %451 = vrot.lane.b32.xlu0 %v382_v14, %s4008_s10  ;;  %449 = vrot.lane.b32.xlu1 %v384_v11, %s4007_s9 }
 0x415   :  { %455 = vrot.lane.b32.xlu0 %v382_v14, %s4009_s11  ;;  %453 = vrot.lane.b32.xlu1 %v384_v11, %s4008_s10 }
 0x419   :  { %459 = vrot.lane.b32.xlu0 %v382_v14, %s4010_s12  ;;  %457 = vrot.lane.b32.xlu1 %v384_v11, %s4009_s11 }
 0x41d   :  { %463 = vrot.lane.b32.xlu0 %v382_v14, %s4011_s13  ;;  %461 = vrot.lane.b32.xlu1 %v384_v11, %s4010_s12 }
 0x421   :  { %467 = vrot.lane.b32.xlu0 %v382_v14, %s4012_s14  ;;  %465 = vrot.lane.b32.xlu1 %v384_v11, %s4011_s13  ;;  %v583_v14 = vunpack.c.l.s4 %v4014_v12 }
 0x425   :  { %702 = vrot.lane.b32.xlu0 %v4138_v33, %s4006_s2  ;;  %469 = vrot.lane.b32.xlu1 %v384_v11, %s4012_s14 }
 0x429   :  { %706 = vrot.lane.b32.xlu0 %v4138_v33, %s4007_s9  ;;  %704 = vrot.lane.b32.xlu1 %v4144_v37, %s4006_s2 }
 0x42d   :  { %710 = vrot.lane.b32.xlu0 %v4138_v33, %s4008_s10  ;;  %708 = vrot.lane.b32.xlu1 %v4144_v37, %s4007_s9 }
 0x431   :  { %714 = vrot.lane.b32.xlu0 %v4138_v33, %s4009_s11  ;;  %712 = vrot.lane.b32.xlu1 %v4144_v37, %s4008_s10 }
 0x435   :  { %718 = vrot.lane.b32.xlu0 %v4138_v33, %s4010_s12  ;;  %716 = vrot.lane.b32.xlu1 %v4144_v37, %s4009_s11 }
 0x439   :  { %722 = vrot.lane.b32.xlu0 %v4138_v33, %s4011_s13  ;;  %720 = vrot.lane.b32.xlu1 %v4144_v37, %s4010_s12 }
 0x43d   :  { %726 = vrot.lane.b32.xlu0 %v4138_v33, %s4012_s14  ;;  %724 = vrot.lane.b32.xlu1 %v4144_v37, %s4011_s13 }
 0x441   :  { %473 = vrot.lane.b32.xlu0 %v4171_v49, %s4006_s2  ;;  %728 = vrot.lane.b32.xlu1 %v4144_v37, %s4012_s14 }
 0x445   :  { %477 = vrot.lane.b32.xlu0 %v4171_v49, %s4007_s9  ;;  %475 = vrot.lane.b32.xlu1 %v4177_v51, %s4006_s2 }
 0x449   :  { %481 = vrot.lane.b32.xlu0 %v4171_v49, %s4008_s10  ;;  %479 = vrot.lane.b32.xlu1 %v4177_v51, %s4007_s9 }
 0x44d   :  { %485 = vrot.lane.b32.xlu0 %v4171_v49, %s4009_s11  ;;  %483 = vrot.lane.b32.xlu1 %v4177_v51, %s4008_s10 }
 0x451   :  { %489 = vrot.lane.b32.xlu0 %v4171_v49, %s4010_s12  ;;  %487 = vrot.lane.b32.xlu1 %v4177_v51, %s4009_s11 }
 0x455   :  { %493 = vrot.lane.b32.xlu0 %v4171_v49, %s4011_s13  ;;  %491 = vrot.lane.b32.xlu1 %v4177_v51, %s4010_s12 }
 0x459   :  { %497 = vrot.lane.b32.xlu0 %v4171_v49, %s4012_s14  ;;  %495 = vrot.lane.b32.xlu1 %v4177_v51, %s4011_s13 }
 0x45d   :  { %499 = vrot.lane.b32.xlu1 %v4177_v51, %s4012_s14 }
 0x45f   :  { %v673_v52 = vpop.permute.xlu0 %672 }
 0x463   :  { %v677_v53 = vpop.permute.xlu0 %676  ;;  %v675_v54 = vpop.permute.xlu1 %674 }
 0x464   :  { %v732_v3 = vrot.slane %v675_v54, 7 }
 0x466   :  { %v733_v8 = vsel %vm147_vm2, %v732_v3, %v673_v52 }
 0x467   :  { %v681_v55 = vpop.permute.xlu0 %680  ;;  %v679_v56 = vpop.permute.xlu1 %678 }
 0x468   :  { %v734_v1 = vrot.slane %v679_v56, 7 }
 0x46a   :  { %v735_v9 = vsel %vm147_vm2, %v734_v1, %v677_v53 }
 0x46b   :  { %v685_v57 = vpop.permute.xlu0 %684  ;;  %v683_v58 = vpop.permute.xlu1 %682  ;;  %v778_v23 = vcombine.low %v4107_v15, %v735_v9  ;;  %v584_v15 = vunpack.c.0.s8 %v583_v14 }
 0x46c   :  { %v736_v61 = vrot.slane %v683_v58, 7 }
 0x46d   :  { %v785_v34 = vrot.slane %v778_v23, %v4234_v22  ;;  %v4251_v38 = vsub.s32 %v584_v15, %v4082_v16 }
 0x46e   :  { %v737_v4 = vsel %vm147_vm2, %v736_v61, %v681_v55 }
 0x46f   :  { %v689_v59 = vpop.permute.xlu0 %688  ;;  %v687_v60 = vpop.permute.xlu1 %686  ;;  %v786_v17 = vcombine.low %v733_v8, %v737_v4  ;;  %6476 = vst [vmem:[#allocation14_spill] sm:$0xff] %v4251_v38 }
 0x470   :  { %v738_v10 = vrot.slane %v687_v60, 7 }
 0x471   :  { %v793_v27 = vrot.slane %v786_v17, %v4234_v22 }
 0x472   :  { %v739_v25 = vsel %vm147_vm2, %v738_v10, %v685_v57 }
 0x473   :  { %v693_v62 = vpop.permute.xlu0 %692  ;;  %v691_v2 = vpop.permute.xlu1 %690  ;;  %v810_v41 = vcombine.low %v785_v34, %v793_v27 }
 0x474   :  { %v740_v19 = vrot.slane %v691_v2, 7 }
 0x475   :  { %v817_v45 = vrot.slane %v810_v41, %v4251_v38 }
 0x476   :  { %v741_v29 = vsel %vm147_vm2, %v740_v19, %v689_v59 }
 0x477   :  { %v697_v5 = vpop.permute.xlu0 %696  ;;  %v695_v7 = vpop.permute.xlu1 %694 }
 0x478   :  { %v742_v11 = vrot.slane %v695_v7, 7 }
 0x47a   :  { %v743_v20 = vsel %vm147_vm2, %v742_v11, %v693_v62 }
 0x47b   :  { %v444_v21 = vpop.permute.xlu0 %443  ;;  %v699_v24 = vpop.permute.xlu1 %698  ;;  %v794_v28 = vcombine.low %v739_v25, %v743_v20 }
 0x47c   :  { %v744_v26 = vrot.slane %v699_v24, 7 }
 0x47d   :  { %v801_v39 = vrot.slane %v794_v28, %v4234_v22 }
 0x47e   :  { %v745_v30 = vsel %vm147_vm2, %v744_v26, %v697_v5 }
 0x47f   :  { %v448_v31 = vpop.permute.xlu0 %447  ;;  %v802_v35 = vcombine.low %v741_v29, %v745_v30  ;;  %v446_v36 = vpop.permute.xlu1 %445 }
 0x480   :  { %v503_v57 = vrot.slane %v446_v36, 7 }
 0x481   :  { %v809_v40 = vrot.slane %v802_v35, %v4234_v22 }
 0x482   :  { %v504_v62 = vsel %vm147_vm2, %v503_v57, %v444_v21 }
 0x483   :  { %v452_v42 = vpop.permute.xlu0 %451  ;;  %v450_v43 = vpop.permute.xlu1 %449  ;;  %v818_v44 = vcombine.low %v801_v39, %v809_v40 }
 0x484   :  { %v505_v58 = vrot.slane %v450_v43, 7 }
 0x485   :  { %v825_v46 = vrot.slane %v818_v44, %v4251_v38  ;;  %v746_v44 = vrot.slane %v4144_v37, 7 }
 0x486   :  { %v506_v63 = vsel %vm147_vm2, %v505_v58, %v448_v31 }
 0x487   :  { %v456_v47 = vpop.permute.xlu0 %455  ;;  %v454_v48 = vpop.permute.xlu1 %453  ;;  %v826_v50 = vcombine.low %v817_v45, %v825_v46  ;;  %v827_v53 = vcombine.high %v817_v45, %v825_v46  ;;  %v549_v6 = vcombine.low %v4112_v18, %v506_v63 }
 0x488   :  { %v507_v54 = vrot.slane %v454_v48, 7 }
 0x489   :  { %882 = vrot.lane.b32.xlu0 %v826_v50, %s4015_s15  ;;  %v556_v19 = vrot.slane %v549_v6, %v4234_v22 }
 0x48a   :  { %v508_v59 = vsel %vm147_vm2, %v507_v54, %v452_v42  ;;  %v747_v54 = vsel %vm147_vm2, %v746_v44, %v4138_v33 }
 0x48b   :  { %v460_v16 = vpop.permute.xlu0 %459  ;;  %v458_v52 = vpop.permute.xlu1 %457  ;;  %v557_v3 = vcombine.low %v504_v62, %v508_v59 }
 0x48c   :  { %v509_v0 = vrot.slane %v458_v52, 7 }
 0x48d   :  { %886 = vrot.lane.b32.xlu0 %v827_v53, %s4015_s15  ;;  %v564_v10 = vrot.slane %v557_v3, %v4234_v22 }
 0x48e   :  { %v510_v8 = vsel %vm147_vm2, %v509_v0, %v456_v47 }
 0x48f   :  { %v464_v55 = vpop.permute.xlu0 %463  ;;  %v462_v56 = vpop.permute.xlu1 %461  ;;  %v581_v24 = vcombine.low %v556_v19, %v564_v10 }
 0x490   :  { %v511_v1 = vrot.slane %v462_v56, 7 }
 0x491   :  { %v588_v27 = vrot.slane %v581_v24, %v4251_v38 }
 0x492   :  { %v512_v12 = vsel %vm147_vm2, %v511_v1, %v460_v16 }
 0x493   :  { %v468_v60 = vpop.permute.xlu0 %467  ;;  %v466_v61 = vpop.permute.xlu1 %465 }
 0x494   :  { %v513_v2 = vrot.slane %v466_v61, 7 }
 0x496   :  { %v514_v4 = vsel %vm147_vm2, %v513_v2, %v464_v55 }
 0x497   :  { %v703_v5 = vpop.permute.xlu0 %702  ;;  %v470_v7 = vpop.permute.xlu1 %469  ;;  %v565_v11 = vcombine.low %v510_v8, %v514_v4 }
 0x498   :  { %v515_v9 = vrot.slane %v470_v7, 7 }
 0x499   :  { %v572_v23 = vrot.slane %v565_v11, %v4234_v22 }
 0x49a   :  { %v516_v14 = vsel %vm147_vm2, %v515_v9, %v468_v60 }
 0x49b   :  { %v707_v17 = vpop.permute.xlu0 %706  ;;  %v573_v20 = vcombine.low %v512_v12, %v516_v14  ;;  %v705_v21 = vpop.permute.xlu1 %704 }
 0x49c   :  { %v748_v42 = vrot.slane %v705_v21, 7 }
 0x49d   :  { %v580_v18 = vrot.slane %v573_v20, %v4234_v22 }
 0x49e   :  { %v749_v48 = vsel %vm147_vm2, %v748_v42, %v703_v5 }
 0x49f   :  { %v711_v25 = vpop.permute.xlu0 %710  ;;  %v709_v26 = vpop.permute.xlu1 %708  ;;  %v589_v15 = vcombine.low %v572_v23, %v580_v18 }
 0x4a0   :  { %v750_v43 = vrot.slane %v709_v26, 7  ;;  %v517_v26 = vrot.slane %v4177_v51, 7 }
 0x4a1   :  { %v596_v28 = vrot.slane %v589_v15, %v4251_v38 }
 0x4a2   :  { %v751_v50 = vsel %vm147_vm2, %v750_v43, %v707_v17 }
 0x4a3   :  { %v715_v29 = vpop.permute.xlu0 %714  ;;  %v713_v30 = vpop.permute.xlu1 %712  ;;  %v597_v31 = vcombine.low %v588_v27, %v596_v28  ;;  %v598_v36 = vcombine.high %v588_v27, %v596_v28  ;;  %v828_v58 = vcombine.low %v747_v54, %v751_v50 }
 0x4a4   :  { %v752_v39 = vrot.slane %v713_v30, 7 }
 0x4a5   :  { %653 = vrot.lane.b32.xlu0 %v597_v31, %s4015_s15  ;;  %v835_v3 = vrot.slane %v828_v58, %v4234_v22 }
 0x4a6   :  { %v753_v45 = vsel %vm147_vm2, %v752_v39, %v711_v25 }
 0x4a7   :  { %v719_v34 = vpop.permute.xlu0 %718  ;;  %v717_v35 = vpop.permute.xlu1 %716  ;;  %v836_v53 = vcombine.low %v749_v48, %v753_v45 }
 0x4a8   :  { %v754_v16 = vrot.slane %v717_v35, 7 }
 0x4a9   :  { %657 = vrot.lane.b32.xlu0 %v598_v36, %s4015_s15  ;;  %v843_v61 = vrot.slane %v836_v53, %v4234_v22  ;;  %v518_v36 = vsel %vm147_vm2, %v517_v26, %v4171_v49 }
 0x4aa   :  { %v755_v59 = vsel %vm147_vm2, %v754_v16, %v715_v29 }
 0x4ab   :  { %v723_v40 = vpop.permute.xlu0 %722  ;;  %v721_v41 = vpop.permute.xlu1 %720  ;;  %v860_v6 = vcombine.low %v835_v3, %v843_v61 }
 0x4ac   :  { %v756_v55 = vrot.slane %v721_v41, 7 }
 0x4ad   :  { %v867_v10 = vrot.slane %v860_v6, %v4251_v38 }
 0x4ae   :  { %v757_v63 = vsel %vm147_vm2, %v756_v55, %v719_v34 }
 0x4af   :  { %v727_v46 = vpop.permute.xlu0 %726  ;;  %v725_v47 = vpop.permute.xlu1 %724 }
 0x4b0   :  { %v758_v52 = vrot.slane %v725_v47, 7 }
 0x4b2   :  { %v759_v56 = vsel %vm147_vm2, %v758_v52, %v723_v40 }
 0x4b3   :  { %v474_v57 = vpop.permute.xlu0 %473  ;;  %v729_v37 = vpop.permute.xlu1 %728  ;;  %v844_v62 = vcombine.low %v755_v59, %v759_v56 }
 0x4b4   :  { %v760_v60 = vrot.slane %v729_v37, 7 }
 0x4b5   :  { %v851_v4 = vrot.slane %v844_v62, %v4234_v22 }
 0x4b6   :  { %v761_v0 = vsel %vm147_vm2, %v760_v60, %v727_v46  ;;  %v4313_v60 = vstv %s3748_s16  ;;  %s3764_s16 = sld [smem:[#allocation7 + $0x42]] }
 0x4b7   :  { %v478_v2 = vpop.permute.xlu0 %477  ;;  %v852_v33 = vcombine.low %v757_v63, %v761_v0  ;;  %v476_v1 = vpop.permute.xlu1 %475 }
 0x4b8   :  { %v519_v24 = vrot.slane %v476_v1, 7  ;;  %v4324_v1 = vstv %s3750_s19  ;;  %s3766_s19 = sld [smem:[#allocation7 + $0x44]] }
 0x4b9   :  { %v859_v5 = vrot.slane %v852_v33, %v4234_v22 }
 0x4ba   :  { %v520_v29 = vsel %vm147_vm2, %v519_v24, %v474_v57 }
 0x4bb   :  { %v482_v7 = vpop.permute.xlu0 %481  ;;  %v480_v8 = vpop.permute.xlu1 %479  ;;  %v868_v9 = vcombine.low %v851_v4, %v859_v5 }
 0x4bc   :  { %v521_v25 = vrot.slane %v480_v8, 7 }
 0x4bd   :  { %v875_v11 = vrot.slane %v868_v9, %v4251_v38 }
 0x4be   :  { %v522_v30 = vsel %vm147_vm2, %v521_v25, %v478_v2  ;;  %v4318_v2 = vstv %s3749_s17  ;;  %s3765_s17 = sld [smem:[#allocation7 + $0x43]] }
 0x4bf   :  { %v486_v12 = vpop.permute.xlu0 %485  ;;  %v484_v14 = vpop.permute.xlu1 %483  ;;  %v876_v17 = vcombine.low %v867_v10, %v875_v11  ;;  %v877_v20 = vcombine.high %v867_v10, %v875_v11  ;;  %v599_v41 = vcombine.low %v518_v36, %v522_v30  ;;  %v4338_v11 = vstv %s3752_s23  ;;  %s3769_s23 = sld [smem:[#allocation7 + $0x47]] }
 0x4c0   :  { %v523_v23 = vrot.slane %v484_v14, 7  ;;  %v4381_v36 = vstv %s3757_s5  ;;  %s3773_s5 = sld [smem:[#allocation7 + $0x4b]] }
 0x4c1   :  { %884 = vrot.lane.b32.xlu1 %v876_v17, %s4015_s15  ;;  %v606_v50 = vrot.slane %v599_v41, %v4234_v22  ;;  %v4344_v17 = vstv %s3753_s25  ;;  %s3770_s25 = sld [smem:[#allocation7 + $0x48]] }
 0x4c2   :  { %v524_v15 = vsel %vm147_vm2, %v523_v23, %v482_v7  ;;  %v4331_v7 = vstv %s3751_s21  ;;  %v4352_v23 = vstv %s3755_s27  ;;  %s3767_s21 = sld [smem:[#allocation7 + $0x45]]  ;;  %s3771_s27 = sld [smem:[#allocation7 + $0x49]] }
 0x4c3   :  { %v488_v19 = vpop.permute.xlu1 %487  ;;  %v490_v21 = vpop.permute.xlu0 %489  ;;  %v607_v35 = vcombine.low %v520_v29, %v524_v15 }
 0x4c4   :  { %v525_v31 = vrot.slane %v488_v19, 7 }
 0x4c5   :  { %888 = vrot.lane.b32.xlu1 %v877_v20, %s4015_s15  ;;  %v614_v44 = vrot.slane %v607_v35, %v4234_v22 }
 0x4c6   :  { %v526_v51 = vsel %vm147_vm2, %v525_v31, %v486_v12 }
 0x4c7   :  { %v492_v18 = vpop.permute.xlu1 %491  ;;  %v494_v27 = vpop.permute.xlu0 %493  ;;  %v631_v53 = vcombine.low %v606_v50, %v614_v44 }
 0x4c8   :  { %v527_v39 = vrot.slane %v492_v18, 7 }
 0x4c9   :  { %v638_v55 = vrot.slane %v631_v53, %v4251_v38 }
 0x4ca   :  { %v528_v47 = vsel %vm147_vm2, %v527_v39, %v490_v21 }
 0x4cb   :  { %v496_v28 = vpop.permute.xlu1 %495  ;;  %v498_v45 = vpop.permute.xlu0 %497 }
 0x4cc   :  { %v529_v34 = vrot.slane %v496_v28, 7 }
 0x4ce   :  { %v530_v40 = vsel %vm147_vm2, %v529_v34, %v494_v27  ;;  %v4364_v27 = vstv %s3756_s30  ;;  %s3772_s30 = sld [smem:[#allocation7 + $0x4a]] }
 0x4cf   :  { %v500_v42 = vpop.permute.xlu1 %499  ;;  %v615_v46 = vcombine.low %v526_v51, %v530_v40  ;;  %v4395_v51 = vstv %s3758_s6  ;;  %s3774_s6 = sld [smem:[#allocation7 + $0x4c]] }
 0x4d0   :  { %v531_v43 = vrot.slane %v500_v42, 7 }
 0x4d1   :  { %v622_v49 = vrot.slane %v615_v46, %v4234_v22  ;;  %v4405_v46 = vstv %s3781_s0  ;;  %s3699_s0 = sld [smem:[#allocation7 + $0x1]] }
 0x4d2   :  { %v532_v48 = vsel %vm147_vm2, %v531_v43, %v498_v45 }
 0x4d3   :  { %v623_v16 = vcombine.low %v528_v47, %v532_v48 }
 0x4d5   :  { %v630_v52 = vrot.slane %v623_v16, %v4234_v22 }
 0x4d7   :  { %v639_v54 = vcombine.low %v622_v49, %v630_v52  ;;  %v4417_v52 = vstv %s3759_s7  ;;  %s3700_s7 = sld [smem:[#allocation7 + $0x2]] }
 0x4d9   :  { %v646_v56 = vrot.slane %v639_v54, %v4251_v38 }
 0x4db   :  { %v647_v57 = vcombine.low %v638_v55, %v646_v56  ;;  %v648_v58 = vcombine.high %v638_v55, %v646_v56 }
 0x4dd   :  { %655 = vrot.lane.b32.xlu1 %v647_v57, %s4015_s15 }
 0x4e1   :  { %659 = vrot.lane.b32.xlu1 %v648_v58, %s4015_s15  ;;  %s3763_s15 = sld [smem:[#allocation7 + $0x41]] }
 0x4fb   :  { %v883_v37 = vpop.permute.xlu0 %882 }
 0x4fc   :  { %895 = vst.msk [vmem:[#allocation2 + $0x1b] sm:$0xff] %vm665_vm9, %v883_v37  ;;  %v4436_v37 = vstv %s3760_s1  ;;  %s3701_s1 = sld [smem:[#allocation7 + $0x3]] }
 0x4ff   :  { %v887_v59 = vpop.permute.xlu0 %886 }
 0x500   :  { %897 = vst.msk [vmem:[#allocation2 + $0x4b] sm:$0xff] %vm665_vm9, %v887_v59 }
 0x503   :  { %v2089_v61 = vld [vmem:[#allocation2 + $0x18] sm:$0xff] }
 0x504   :  { %v2105_v62 = vmul.f32 %v4313_v60, %v2089_v61  ;;  %v2131_v3 = vmul.f32 %v4318_v2, %v2089_v61  ;;  %v2157_v4 = vmul.f32 %v4324_v1, %v2089_v61  ;;  %v2183_v9 = vmul.f32 %v4331_v7, %v2089_v61  ;;  %v4350_v21 = vld [vmem:[#allocation2 + $0x19] sm:$0xff] }
 0x505   :  { %v2209_v12 = vmul.f32 %v4338_v11, %v2089_v61  ;;  %v2235_v19 = vmul.f32 %v4344_v17, %v2089_v61  ;;  %v2275_v24 = vmul.f32 %v4352_v23, %v4350_v21  ;;  %v2301_v29 = vmul.f32 %v4364_v27, %v4350_v21 }
 0x506   :  { %2113 = vrot.lane.b32.xlu0 %v2105_v62, %s4016_s18  ;;  %v2327_v39 = vmul.f32 %v4381_v36, %v4350_v21  ;;  %v2353_v43 = vmul.f32 %v4395_v51, %v4350_v21  ;;  %v2379_v55 = vmul.f32 %v4417_v52, %v4350_v21  ;;  %v2405_v59 = vmul.f32 %v4436_v37, %v4350_v21 }
 0x507   :  { %v2091_v63 = vld [vmem:[#allocation2 + $0x48] sm:$0xff] }
 0x508   :  { %v2107_v0 = vmul.f32 %v4313_v60, %v2091_v63  ;;  %v2133_v33 = vmul.f32 %v4318_v2, %v2091_v63  ;;  %v2159_v6 = vmul.f32 %v4324_v1, %v2091_v63  ;;  %v2185_v10 = vmul.f32 %v4331_v7, %v2091_v63  ;;  %v4358_v25 = vld [vmem:[#allocation2 + $0x49] sm:$0xff] }
 0x509   :  { %v2211_v14 = vmul.f32 %v4338_v11, %v2091_v63  ;;  %v2237_v20 = vmul.f32 %v4344_v17, %v2091_v63  ;;  %v2277_v15 = vmul.f32 %v4352_v23, %v4358_v25  ;;  %v2303_v34 = vmul.f32 %v4364_v27, %v4358_v25  ;;  %v4450_v63 = vld [vmem:[#allocation2 + $0x1a] sm:$0xff] }
 0x50a   :  { %2117 = vrot.lane.b32.xlu0 %v2107_v0, %s4016_s18  ;;  %v2329_v41 = vmul.f32 %v4381_v36, %v4358_v25  ;;  %v2355_v50 = vmul.f32 %v4395_v51, %v4358_v25  ;;  %v2381_v57 = vmul.f32 %v4417_v52, %v4358_v25  ;;  %v2407_v61 = vmul.f32 %v4436_v37, %v4358_v25 }
 0x50b   :  { %v4452_v0 = vstv %s3762_s8  ;;  %s3702_s8 = sld [smem:[#allocation7 + $0x4]] }
 0x50e   :  { %2139 = vrot.lane.b32.xlu0 %v2131_v3, %s4017_s20 }
 0x512   :  { %2143 = vrot.lane.b32.xlu0 %v2133_v33, %s4017_s20  ;;  %v2431_v33 = vld [vmem:[#allocation2 + $0x4a] sm:$0xff] }
 0x516   :  { %2165 = vrot.lane.b32.xlu0 %v2157_v4, %s4018_s22 }
 0x517   :  { %v654_v5 = vpop.permute.xlu0 %653 }
 0x518   :  { %666 = vst.msk [vmem:[#allocation2 + $0x3] sm:$0xff] %vm665_vm9, %v654_v5  ;;  %v4465_v5 = vstv %s3763_s15  ;;  %s3703_s15 = sld [smem:[#allocation7 + $0x5]] }
 0x51a   :  { %2169 = vrot.lane.b32.xlu0 %v2159_v6, %s4018_s22 }
 0x51b   :  { %v658_v8 = vpop.permute.xlu0 %657 }
 0x51c   :  { %668 = vst.msk [vmem:[#allocation2 + $0x33] sm:$0xff] %vm665_vm9, %v658_v8 }
 0x51e   :  { %2191 = vrot.lane.b32.xlu0 %v2183_v9, %s4019_s24  ;;  %v4770_v13 = vstv %s3703_s15  ;;  %s3715_s15 = sld [smem:[#allocation7 + $0x11]] }
 0x522   :  { %2195 = vrot.lane.b32.xlu0 %v2185_v10, %s4019_s24  ;;  %v2473_v10 = vmul.f32 %v4465_v5, %v2431_v33 }
 0x526   :  { %2217 = vrot.lane.b32.xlu0 %v2209_v12, %s4020_s26  ;;  %v4482_v12 = vstv %s3764_s16  ;;  %s3704_s16 = sld [smem:[#allocation7 + $0x6]] }
 0x52a   :  { %2221 = vrot.lane.b32.xlu0 %v2211_v14, %s4020_s26  ;;  %v2497_v14 = vmul.f32 %v4482_v12, %v4450_v63 }
 0x52e   :  { %2243 = vrot.lane.b32.xlu0 %v2235_v19, %s4021_s29 }
 0x532   :  { %2247 = vrot.lane.b32.xlu0 %v2237_v20, %s4021_s29  ;;  %v2499_v20 = vmul.f32 %v4482_v12, %v2431_v33 }
 0x533   :  { %v885_v18 = vpop.permute.xlu1 %884 }
 0x534   :  { %896 = vst.msk [vmem:[#allocation2 + $0x23] sm:$0xff] %vm665_vm9, %v885_v18 }
 0x536   :  { %2283 = vrot.lane.b32.xlu0 %v2275_v24, %s4016_s18 }
 0x537   :  { %v889_v26 = vpop.permute.xlu1 %888 }
 0x538   :  { %898 = vst.msk [vmem:[#allocation2 + $0x53] sm:$0xff] %vm665_vm9, %v889_v26 }
 0x53a   :  { %2287 = vrot.lane.b32.xlu0 %v2277_v15, %s4016_s18 }
 0x53b   :  { %v4367_v28 = vld [vmem:[#allocation2 + $0x20] sm:$0xff] }
 0x53c   :  { %v2106_v30 = vmul.f32 %v4313_v60, %v4367_v28  ;;  %v2132_v40 = vmul.f32 %v4318_v2, %v4367_v28  ;;  %v2158_v44 = vmul.f32 %v4324_v1, %v4367_v28  ;;  %v2184_v56 = vmul.f32 %v4331_v7, %v4367_v28  ;;  %v4467_v6 = vld [vmem:[#allocation2 + $0x21] sm:$0xff] }
 0x53d   :  { %v2236_v3 = vmul.f32 %v4344_v17, %v4367_v28  ;;  %v2276_v8 = vmul.f32 %v4352_v23, %v4467_v6  ;;  %v2328_v25 = vmul.f32 %v4381_v36, %v4467_v6 }
 0x53e   :  { %2309 = vrot.lane.b32.xlu0 %v2301_v29, %s4017_s20  ;;  %2115 = vrot.lane.b32.xlu1 %v2106_v30, %s4016_s18 }
 0x53f   :  { %v4375_v31 = vld [vmem:[#allocation2 + $0x50] sm:$0xff] }
 0x540   :  { %v2108_v35 = vmul.f32 %v4313_v60, %v4375_v31  ;;  %v2134_v42 = vmul.f32 %v4318_v2, %v4375_v31  ;;  %v2771_v45 = vld [vmem:[#allocation2 + $0x4c] sm:$0xff]  ;;  %v2160_v16 = vmul.f32 %v4324_v1, %v4375_v31  ;;  %v4415_v49 = vld [vmem:[#allocation2 + $0x54] sm:$0xff]  ;;  %v2186_v58 = vmul.f32 %v4331_v7, %v4375_v31 }
 0x541   :  { %v4408_v48 = vmul.f32 %v4405_v46, %v2771_v45  ;;  %v4423_v54 = vmul.f32 %v4405_v46, %v4415_v49  ;;  %v2210_v60 = vmul.f32 %v4338_v11, %v4367_v28  ;;  %v2212_v62 = vmul.f32 %v4338_v11, %v4375_v31  ;;  %v4475_v9 = vld [vmem:[#allocation2 + $0x51] sm:$0xff]  ;;  %v4548_v45 = vld [vmem:[#allocation2 + $0x1b] sm:$0xff] }
 0x542   :  { %2313 = vrot.lane.b32.xlu0 %v2303_v34, %s4017_s20  ;;  %2119 = vrot.lane.b32.xlu1 %v2108_v35, %s4016_s18  ;;  %v2445_v2 = vmul.f32 %v4452_v0, %v4450_v63  ;;  %v2447_v1 = vmul.f32 %v4452_v0, %v2431_v33  ;;  %v2238_v4 = vmul.f32 %v4344_v17, %v4375_v31  ;;  %v4514_v28 = vstv %s3766_s19  ;;  %s3707_s19 = sld [smem:[#allocation7 + $0x9]] }
 0x543   :  { %v2471_v7 = vmul.f32 %v4465_v5, %v4450_v63  ;;  %v2278_v11 = vmul.f32 %v4352_v23, %v4475_v9  ;;  %v2302_v17 = vmul.f32 %v4364_v27, %v4467_v6  ;;  %v2304_v21 = vmul.f32 %v4364_v27, %v4475_v9 }
 0x544   :  { %v4497_v23 = vstv %s3765_s17  ;;  %v2330_v27 = vmul.f32 %v4381_v36, %v4475_v9  ;;  %v2549_v30 = vmul.f32 %v4514_v28, %v4450_v63  ;;  %v2354_v31 = vmul.f32 %v4395_v51, %v4467_v6  ;;  %s3706_s17 = sld [smem:[#allocation7 + $0x8]] }
 0x545   :  { %v2523_v24 = vmul.f32 %v4497_v23, %v4450_v63  ;;  %v2525_v15 = vmul.f32 %v4497_v23, %v2431_v33  ;;  %v2551_v35 = vmul.f32 %v4514_v28, %v2431_v33  ;;  %v2356_v36 = vmul.f32 %v4395_v51, %v4475_v9 }
 0x546   :  { %2335 = vrot.lane.b32.xlu0 %v2327_v39, %s4018_s22  ;;  %2141 = vrot.lane.b32.xlu1 %v2132_v40, %s4017_s20  ;;  %v4531_v39 = vstv %s3767_s21  ;;  %s3776_s21 = sld [smem:[#allocation7 + $0x4e]] }
 0x54a   :  { %2339 = vrot.lane.b32.xlu0 %v2329_v41, %s4018_s22  ;;  %2145 = vrot.lane.b32.xlu1 %v2134_v42, %s4017_s20  ;;  %v2575_v41 = vmul.f32 %v4531_v39, %v4450_v63  ;;  %v2380_v42 = vmul.f32 %v4417_v52, %v4467_v6  ;;  %v4582_v63 = vld [vmem:[#allocation2 + $0x52] sm:$0xff] }
 0x54e   :  { %2361 = vrot.lane.b32.xlu0 %v2353_v43, %s4019_s24  ;;  %2167 = vrot.lane.b32.xlu1 %v2158_v44, %s4018_s22  ;;  %v2577_v43 = vmul.f32 %v4531_v39, %v2431_v33  ;;  %v2382_v44 = vmul.f32 %v4417_v52, %v4475_v9  ;;  %v4592_v33 = vstv %s3771_s27  ;;  %s3709_s27 = sld [smem:[#allocation7 + $0xb]] }
 0x54f   :  { %v656_v47 = vpop.permute.xlu1 %655 }
 0x550   :  { %667 = vst.msk [vmem:[#allocation2 + $0xb] sm:$0xff] %vm665_vm9, %v656_v47  ;;  %v4550_v47 = vstv %s3769_s23  ;;  %s3708_s23 = sld [smem:[#allocation7 + $0xa]] }
 0x552   :  { %2365 = vrot.lane.b32.xlu0 %v2355_v50, %s4019_s24  ;;  %2171 = vrot.lane.b32.xlu1 %v2160_v16, %s4018_s22  ;;  %v2615_v16 = vmul.f32 %v4550_v47, %v4548_v45 }
 0x553   :  { %v660_v53 = vpop.permute.xlu1 %659 }
 0x554   :  { %669 = vst.msk [vmem:[#allocation2 + $0x3b] sm:$0xff] %vm665_vm9, %v660_v53  ;;  %v2406_v53 = vmul.f32 %v4436_v37, %v4467_v6 }
 0x556   :  { %2387 = vrot.lane.b32.xlu0 %v2379_v55, %s4020_s26  ;;  %2193 = vrot.lane.b32.xlu1 %v2184_v56, %s4019_s24  ;;  %v4560_v55 = vld [vmem:[#allocation2 + $0x4b] sm:$0xff] }
 0x557   :  { %v2617_v56 = vmul.f32 %v4550_v47, %v4560_v55 }
 0x55a   :  { %2391 = vrot.lane.b32.xlu0 %v2381_v57, %s4020_s26  ;;  %2197 = vrot.lane.b32.xlu1 %v2186_v58, %s4019_s24  ;;  %v2408_v57 = vmul.f32 %v4436_v37, %v4475_v9  ;;  %v4570_v58 = vstv %s3770_s25  ;;  %v4610_v9 = vstv %s3772_s30  ;;  %s3777_s25 = sld [smem:[#allocation7 + $0x4f]]  ;;  %s3778_s30 = sld [smem:[#allocation7 + $0x50]] }
 0x55e   :  { %2413 = vrot.lane.b32.xlu0 %v2405_v59, %s4021_s29  ;;  %2219 = vrot.lane.b32.xlu1 %v2210_v60, %s4020_s26  ;;  %v4572_v59 = vld [vmem:[#allocation2 + $0x22] sm:$0xff] }
 0x55f   :  { %v2472_v6 = vmul.f32 %v4465_v5, %v4572_v59 }
 0x562   :  { %2417 = vrot.lane.b32.xlu0 %v2407_v61, %s4021_s29  ;;  %2223 = vrot.lane.b32.xlu1 %v2212_v62, %s4020_s26  ;;  %v2641_v61 = vmul.f32 %v4570_v58, %v4548_v45  ;;  %v2446_v62 = vmul.f32 %v4452_v0, %v4572_v59 }
 0x566   :  { %2453 = vrot.lane.b32.xlu0 %v2445_v2, %s4016_s18  ;;  %2245 = vrot.lane.b32.xlu1 %v2236_v3, %s4021_s29  ;;  %v2643_v2 = vmul.f32 %v4570_v58, %v4560_v55  ;;  %v2448_v3 = vmul.f32 %v4452_v0, %v4582_v63 }
 0x56a   :  { %2457 = vrot.lane.b32.xlu0 %v2447_v1, %s4016_s18  ;;  %2249 = vrot.lane.b32.xlu1 %v2238_v4, %s4021_s29  ;;  %v2667_v4 = vmul.f32 %v4592_v33, %v4548_v45 }
 0x56e   :  { %2479 = vrot.lane.b32.xlu0 %v2471_v7, %s4017_s20  ;;  %2285 = vrot.lane.b32.xlu1 %v2276_v8, %s4016_s18  ;;  %v2669_v7 = vmul.f32 %v4592_v33, %v4560_v55  ;;  %v2474_v8 = vmul.f32 %v4465_v5, %v4582_v63 }
 0x572   :  { %2483 = vrot.lane.b32.xlu0 %v2473_v10, %s4017_s20  ;;  %2289 = vrot.lane.b32.xlu1 %v2278_v11, %s4016_s18  ;;  %v2693_v11 = vmul.f32 %v4610_v9, %v4548_v45 }
 0x576   :  { %2505 = vrot.lane.b32.xlu0 %v2497_v14, %s4018_s22  ;;  %2311 = vrot.lane.b32.xlu1 %v2302_v17, %s4017_s20  ;;  %v2498_v14 = vmul.f32 %v4482_v12, %v4572_v59 }
 0x578   :  { %v4492_v19 = vpop.permute.xlu0 %2113 }
 0x57a   :  { %2509 = vrot.lane.b32.xlu0 %v2499_v20, %s4018_s22  ;;  %2315 = vrot.lane.b32.xlu1 %v2304_v21, %s4017_s20  ;;  %v2695_v20 = vmul.f32 %v4610_v9, %v4560_v55  ;;  %v2500_v21 = vmul.f32 %v4482_v12, %v4582_v63 }
 0x57c   :  { %v4501_v18 = vpop.permute.xlu0 %2117 }
 0x57e   :  { %2531 = vrot.lane.b32.xlu0 %v2523_v24, %s4019_s24  ;;  %2337 = vrot.lane.b32.xlu1 %v2328_v25, %s4018_s22  ;;  %v4630_v24 = vstv %s3773_s5  ;;  %s3710_s5 = sld [smem:[#allocation7 + $0xc]] }
 0x580   :  { %v4509_v26 = vpop.permute.xlu0 %2139 }
 0x582   :  { %2535 = vrot.lane.b32.xlu0 %v2525_v15, %s4019_s24  ;;  %2341 = vrot.lane.b32.xlu1 %v2330_v27, %s4018_s22  ;;  %v2719_v27 = vmul.f32 %v4630_v24, %v4548_v45 }
 0x584   :  { %v4518_v29 = vpop.permute.xlu0 %2143 }
 0x586   :  { %2557 = vrot.lane.b32.xlu0 %v2549_v30, %s4020_s26  ;;  %2363 = vrot.lane.b32.xlu1 %v2354_v31, %s4019_s24  ;;  %v2524_v30 = vmul.f32 %v4497_v23, %v4572_v59 }
 0x588   :  { %v4526_v34 = vpop.permute.xlu0 %2165 }
 0x58a   :  { %2561 = vrot.lane.b32.xlu0 %v2551_v35, %s4020_s26  ;;  %2367 = vrot.lane.b32.xlu1 %v2356_v36, %s4019_s24  ;;  %v2721_v35 = vmul.f32 %v4630_v24, %v4560_v55  ;;  %v2526_v36 = vmul.f32 %v4497_v23, %v4582_v63 }
 0x58c   :  { %v4535_v40 = vpop.permute.xlu0 %2169 }
 0x58e   :  { %2583 = vrot.lane.b32.xlu0 %v2575_v41, %s4021_s29  ;;  %2389 = vrot.lane.b32.xlu1 %v2380_v42, %s4020_s26  ;;  %v4652_v41 = vstv %s3774_s6  ;;  %s3779_s6 = sld [smem:[#allocation7 + $0x51]] }
 0x590   :  { %v4543_v51 = vpop.permute.xlu0 %2191 }
 0x592   :  { %2587 = vrot.lane.b32.xlu0 %v2577_v43, %s4021_s29  ;;  %2393 = vrot.lane.b32.xlu1 %v2382_v44, %s4020_s26  ;;  %v2745_v44 = vmul.f32 %v4652_v41, %v4548_v45  ;;  %v4676_v45 = vstv %s3699_s0  ;;  %s3711_s0 = sld [smem:[#allocation7 + $0xd]] }
 0x594   :  { %v4554_v50 = vpop.permute.xlu0 %2195 }
 0x595   :  { %6477 = vst [vmem:[#allocation15_spill] sm:$0xff] %v4554_v50 }
 0x596   :  { %2623 = vrot.lane.b32.xlu0 %v2615_v16, %s4016_s18  ;;  %2415 = vrot.lane.b32.xlu1 %v2406_v53, %s4021_s29  ;;  %v2550_v16 = vmul.f32 %v4514_v28, %v4572_v59 }
 0x598   :  { %v4564_v52 = vpop.permute.xlu0 %2217 }
 0x59a   :  { %2627 = vrot.lane.b32.xlu0 %v2617_v56, %s4016_s18  ;;  %2419 = vrot.lane.b32.xlu1 %v2408_v57, %s4021_s29  ;;  %v2747_v56 = vmul.f32 %v4652_v41, %v4560_v55  ;;  %v2552_v57 = vmul.f32 %v4514_v28, %v4582_v63  ;;  %v2576_v55 = vmul.f32 %v4531_v39, %v4572_v59  ;;  %v4688_v28 = vld [vmem:[#allocation2 + $0x30] sm:$0xff] }
 0x59c   :  { %v4576_v60 = vpop.permute.xlu0 %2221 }
 0x59d   :  { %6478 = vst [vmem:[#allocation16_spill] sm:$0xff] %v4576_v60 }
 0x59e   :  { %2649 = vrot.lane.b32.xlu0 %v2641_v61, %s4017_s20  ;;  %2455 = vrot.lane.b32.xlu1 %v2446_v62, %s4016_s18  ;;  %v4674_v61 = vld [vmem:[#allocation2] sm:$0xff] }
 0x59f   :  { %v1019_v32 = vmul.f32 %v4770_v13, %v4674_v61 }
 0x5a0   :  { %v4586_v37 = vpop.permute.xlu0 %2243 }
 0x5a2   :  { %2653 = vrot.lane.b32.xlu0 %v2643_v2, %s4017_s20  ;;  %2459 = vrot.lane.b32.xlu1 %v2448_v3, %s4016_s18  ;;  %v915_v3 = vmul.f32 %v4676_v45, %v4674_v61 }
 0x5a4   :  { %v4596_v1 = vpop.permute.xlu0 %2247 }
 0x5a5   :  { %6479 = vst [vmem:[#allocation17_spill] sm:$0xff] %v4596_v1 }
 0x5a6   :  { %2675 = vrot.lane.b32.xlu0 %v2667_v4, %s4018_s22  ;;  %2481 = vrot.lane.b32.xlu1 %v2472_v6, %s4017_s20 }
 0x5a8   :  { %v4604_v0 = vpop.permute.xlu0 %2283 }
 0x5a9   :  { %6480 = vst [vmem:[#allocation18_spill] sm:$0xff] %v4604_v0 }
 0x5aa   :  { %2679 = vrot.lane.b32.xlu0 %v2669_v7, %s4018_s22  ;;  %2485 = vrot.lane.b32.xlu1 %v2474_v8, %s4017_s20  ;;  %v917_v7 = vmul.f32 %v4676_v45, %v4688_v28  ;;  %v2578_v8 = vmul.f32 %v4531_v39, %v4582_v63  ;;  %v4714_v39 = vld [vmem:[#allocation2 + $0x53] sm:$0xff] }
 0x5ac   :  { %v4614_v10 = vpop.permute.xlu0 %2287 }
 0x5ad   :  { %6481 = vst [vmem:[#allocation19_spill] sm:$0xff] %v4614_v10 }
 0x5ae   :  { %2701 = vrot.lane.b32.xlu0 %v2693_v11, %s4019_s24  ;;  %2507 = vrot.lane.b32.xlu1 %v2498_v14, %s4018_s22  ;;  %v4700_v11 = vstv %s3700_s7  ;;  %v4702_v14 = vld [vmem:[#allocation2 + $0x23] sm:$0xff]  ;;  %s3780_s7 = sld [smem:[#allocation7 + $0x52]] }
 0x5af   :  { %v2694_v38 = vmul.f32 %v4610_v9, %v4702_v14 }
 0x5b0   :  { %v4622_v5 = vpop.permute.xlu0 %2309  ;;  %v4624_v17 = vpop.permute.xlu1 %2115 }
 0x5b1   :  { %6482 = vst [vmem:[#allocation20_spill] sm:$0xff] %v4622_v5  ;;  %6483 = vst [vmem:[#allocation21_spill] sm:$0xff] %v4624_v17  ;;  %v4892_v17 = vstv %s3778_s30  ;;  %s3722_s30 = sld [smem:[#allocation7 + $0x18]] }
 0x5b2   :  { %2705 = vrot.lane.b32.xlu0 %v2695_v20, %s4019_s24  ;;  %2511 = vrot.lane.b32.xlu1 %v2500_v21, %s4018_s22  ;;  %v941_v21 = vmul.f32 %v4700_v11, %v4674_v61 }
 0x5b4   :  { %v4634_v25 = vpop.permute.xlu0 %2313  ;;  %v4636_v15 = vpop.permute.xlu1 %2119 }
 0x5b5   :  { %6484 = vst [vmem:[#allocation22_spill] sm:$0xff] %v4634_v25  ;;  %6485 = vst [vmem:[#allocation23_spill] sm:$0xff] %v4636_v15  ;;  %v5108_v25 = vld [vmem:[#allocation2 + $0x9] sm:$0xff] }
 0x5b6   :  { %2727 = vrot.lane.b32.xlu0 %v2719_v27, %s4020_s26  ;;  %2533 = vrot.lane.b32.xlu1 %v2524_v30, %s4019_s24  ;;  %v2616_v27 = vmul.f32 %v4550_v47, %v4702_v14 }
 0x5b8   :  { %v4644_v12 = vpop.permute.xlu0 %2335  ;;  %v4646_v31 = vpop.permute.xlu1 %2141 }
 0x5b9   :  { %6486 = vst [vmem:[#allocation24_spill] sm:$0xff] %v4644_v12  ;;  %6487 = vst [vmem:[#allocation25_spill] sm:$0xff] %v4646_v31  ;;  %v5123_v12 = vld [vmem:[#allocation2 + $0x39] sm:$0xff] }
 0x5ba   :  { %2731 = vrot.lane.b32.xlu0 %v2721_v35, %s4020_s26  ;;  %2537 = vrot.lane.b32.xlu1 %v2526_v36, %s4019_s24  ;;  %v943_v35 = vmul.f32 %v4700_v11, %v4688_v28  ;;  %v2618_v36 = vmul.f32 %v4550_v47, %v4714_v39 }
 0x5bc   :  { %v4656_v42 = vpop.permute.xlu0 %2339  ;;  %v4658_v43 = vpop.permute.xlu1 %2145 }
 0x5bd   :  { %6488 = vst [vmem:[#allocation26_spill] sm:$0xff] %v4656_v42  ;;  %6489 = vst [vmem:[#allocation27_spill] sm:$0xff] %v4658_v43 }
 0x5be   :  { %2753 = vrot.lane.b32.xlu0 %v2745_v44, %s4021_s29  ;;  %2559 = vrot.lane.b32.xlu1 %v2550_v16, %s4020_s26  ;;  %v4726_v44 = vstv %s3701_s1  ;;  %s3713_s1 = sld [smem:[#allocation7 + $0xf]] }
 0x5c0   :  { %v4666_v23 = vpop.permute.xlu0 %2361  ;;  %v4668_v53 = vpop.permute.xlu1 %2167 }
 0x5c1   :  { %6490 = vst [vmem:[#allocation28_spill] sm:$0xff] %v4666_v23  ;;  %6491 = vst [vmem:[#allocation29_spill] sm:$0xff] %v4668_v53  ;;  %v5110_v23 = vld [vmem:[#allocation2 + $0x33] sm:$0xff] }
 0x5c2   :  { %2757 = vrot.lane.b32.xlu0 %v2747_v56, %s4021_s29  ;;  %2563 = vrot.lane.b32.xlu1 %v2552_v57, %s4020_s26  ;;  %v967_v57 = vmul.f32 %v4726_v44, %v4674_v61 }
 0x5c4   :  { %v4680_v62 = vpop.permute.xlu0 %2365  ;;  %v4682_v2 = vpop.permute.xlu1 %2171 }
 0x5c5   :  { %6492 = vst [vmem:[#allocation30_spill] sm:$0xff] %v4680_v62  ;;  %6493 = vst [vmem:[#allocation31_spill] sm:$0xff] %v4682_v2  ;;  %v4840_v2 = vstv %s3707_s19  ;;  %s3718_s19 = sld [smem:[#allocation7 + $0x14]] }
 0x5c6   :  { %923 = vrot.lane.b32.xlu0 %v915_v3, %s4016_s18  ;;  %2585 = vrot.lane.b32.xlu1 %v2576_v55, %s4021_s29  ;;  %v2642_v3 = vmul.f32 %v4570_v58, %v4702_v14 }
 0x5c8   :  { %v4692_v4 = vpop.permute.xlu0 %2387  ;;  %v4694_v6 = vpop.permute.xlu1 %2193 }
 0x5c9   :  { %6494 = vst [vmem:[#allocation32_spill] sm:$0xff] %v4692_v4  ;;  %6495 = vst [vmem:[#allocation33_spill] sm:$0xff] %v4694_v6  ;;  %v4868_v6 = vstv %s3777_s25  ;;  %s3721_s25 = sld [smem:[#allocation7 + $0x17]] }
 0x5ca   :  { %927 = vrot.lane.b32.xlu0 %v917_v7, %s4016_s18  ;;  %2589 = vrot.lane.b32.xlu1 %v2578_v8, %s4021_s29  ;;  %v969_v7 = vmul.f32 %v4726_v44, %v4688_v28  ;;  %v2644_v8 = vmul.f32 %v4570_v58, %v4714_v39 }
 0x5cc   :  { %v4706_v59 = vpop.permute.xlu0 %2391  ;;  %v4708_v20 = vpop.permute.xlu1 %2197 }
 0x5cd   :  { %6496 = vst [vmem:[#allocation34_spill] sm:$0xff] %v4706_v59  ;;  %6497 = vst [vmem:[#allocation35_spill] sm:$0xff] %v4708_v20  ;;  %v4828_v20 = vld [vmem:[#allocation2 + $0x31] sm:$0xff] }
 0x5ce   :  { %949 = vrot.lane.b32.xlu0 %v941_v21, %s4017_s20  ;;  %2625 = vrot.lane.b32.xlu1 %v2616_v27, %s4016_s18  ;;  %v4748_v21 = vstv %s3702_s8  ;;  %s3714_s8 = sld [smem:[#allocation7 + $0x10]] }
 0x5d0   :  { %v4718_v63 = vpop.permute.xlu0 %2413  ;;  %v4720_v30 = vpop.permute.xlu1 %2219 }
 0x5d1   :  { %6498 = vst [vmem:[#allocation36_spill] sm:$0xff] %v4718_v63  ;;  %6499 = vst [vmem:[#allocation37_spill] sm:$0xff] %v4720_v30  ;;  %v4842_v30 = vld [vmem:[#allocation2 + $0x24] sm:$0xff] }
 0x5d2   :  { %953 = vrot.lane.b32.xlu0 %v943_v35, %s4017_s20  ;;  %2629 = vrot.lane.b32.xlu1 %v2618_v36, %s4016_s18  ;;  %v993_v36 = vmul.f32 %v4748_v21, %v4674_v61  ;;  %v2812_v15 = vmul.f32 %v4868_v6, %v4842_v30 }
 0x5d4   :  { %v4730_v16 = vpop.permute.xlu0 %2417  ;;  %v4732_v56 = vpop.permute.xlu1 %2223 }
 0x5d5   :  { %6500 = vst [vmem:[#allocation38_spill] sm:$0xff] %v4730_v16  ;;  %6501 = vst [vmem:[#allocation39_spill] sm:$0xff] %v4732_v56  ;;  %v4816_v56 = vstv %s3706_s17  ;;  %s3717_s17 = sld [smem:[#allocation7 + $0x13]] }
 0x5d6   :  { %975 = vrot.lane.b32.xlu0 %v967_v57, %s4018_s22  ;;  %2651 = vrot.lane.b32.xlu1 %v2642_v3, %s4017_s20  ;;  %v2668_v57 = vmul.f32 %v4592_v33, %v4702_v14 }
 0x5d8   :  { %v4740_v47 = vpop.permute.xlu0 %2453  ;;  %v4742_v55 = vpop.permute.xlu1 %2245 }
 0x5d9   :  { %6502 = vst [vmem:[#allocation40_spill] sm:$0xff] %v4740_v47  ;;  %6503 = vst [vmem:[#allocation41_spill] sm:$0xff] %v4742_v55 }
 0x5da   :  { %979 = vrot.lane.b32.xlu0 %v969_v7, %s4018_s22  ;;  %2655 = vrot.lane.b32.xlu1 %v2644_v8, %s4017_s20  ;;  %v995_v7 = vmul.f32 %v4748_v21, %v4688_v28  ;;  %v2670_v8 = vmul.f32 %v4592_v33, %v4714_v39 }
 0x5dc   :  { %v4752_v27 = vpop.permute.xlu0 %2457  ;;  %v4754_v35 = vpop.permute.xlu1 %2249 }
 0x5dd   :  { %6504 = vst [vmem:[#allocation42_spill] sm:$0xff] %v4752_v27  ;;  %6505 = vst [vmem:[#allocation43_spill] sm:$0xff] %v4754_v35  ;;  %v2720_v35 = vmul.f32 %v4630_v24, %v4702_v14 }
 0x5de   :  { %1001 = vrot.lane.b32.xlu0 %v993_v36, %s4019_s24  ;;  %2677 = vrot.lane.b32.xlu1 %v2668_v57, %s4018_s22 }
 0x5e0   :  { %v4762_v58 = vpop.permute.xlu0 %2479  ;;  %v4764_v3 = vpop.permute.xlu1 %2285 }
 0x5e1   :  { %6506 = vst [vmem:[#allocation44_spill] sm:$0xff] %v4762_v58  ;;  %6507 = vst [vmem:[#allocation45_spill] sm:$0xff] %v4764_v3 }
 0x5e2   :  { %1005 = vrot.lane.b32.xlu0 %v995_v7, %s4019_s24  ;;  %2681 = vrot.lane.b32.xlu1 %v2670_v8, %s4018_s22  ;;  %v1021_v7 = vmul.f32 %v4770_v13, %v4688_v28  ;;  %v2696_v8 = vmul.f32 %v4610_v9, %v4714_v39 }
 0x5e4   :  { %v4774_v36 = vpop.permute.xlu0 %2483  ;;  %v4776_v57 = vpop.permute.xlu1 %2289 }
 0x5e5   :  { %6508 = vst [vmem:[#allocation46_spill] sm:$0xff] %v4774_v36  ;;  %6509 = vst [vmem:[#allocation47_spill] sm:$0xff] %v4776_v57  ;;  %v4792_v57 = vstv %s3704_s16  ;;  %v4990_v36 = vld [vmem:[#allocation2 + $0x38] sm:$0xff]  ;;  %s3716_s16 = sld [smem:[#allocation7 + $0x12]] }
 0x5e6   :  { %1027 = vrot.lane.b32.xlu0 %v1019_v32, %s4020_s26  ;;  %2703 = vrot.lane.b32.xlu1 %v2694_v38, %s4019_s24 }
 0x5e8   :  { %v4784_v33 = vpop.permute.xlu0 %2505  ;;  %v4786_v22 = vpop.permute.xlu1 %2311 }
 0x5e9   :  { %6510 = vst [vmem:[#allocation48_spill] sm:$0xff] %v4784_v33  ;;  %6511 = vst [vmem:[#allocation49_spill] sm:$0xff] %v4786_v22  ;;  %v1045_v22 = vmul.f32 %v4792_v57, %v4674_v61 }
 0x5ea   :  { %1031 = vrot.lane.b32.xlu0 %v1021_v7, %s4020_s26  ;;  %2707 = vrot.lane.b32.xlu1 %v2696_v8, %s4019_s24  ;;  %v1047_v7 = vmul.f32 %v4792_v57, %v4688_v28  ;;  %v2722_v8 = vmul.f32 %v4630_v24, %v4714_v39  ;;  %v2746_v24 = vmul.f32 %v4652_v41, %v4702_v14  ;;  %v4844_v14 = vstv %s3776_s21  ;;  %s3720_s21 = sld [smem:[#allocation7 + $0x16]] }
 0x5ec   :  { %v4796_v32 = vpop.permute.xlu0 %2509  ;;  %v4798_v38 = vpop.permute.xlu1 %2315 }
 0x5ed   :  { %6512 = vst [vmem:[#allocation50_spill] sm:$0xff] %v4796_v32  ;;  %6513 = vst [vmem:[#allocation51_spill] sm:$0xff] %v4798_v38  ;;  %v4814_v38 = vld [vmem:[#allocation2 + $0x1] sm:$0xff] }
 0x5ee   :  { %1053 = vrot.lane.b32.xlu0 %v1045_v22, %s4021_s29  ;;  %2729 = vrot.lane.b32.xlu1 %v2720_v35, %s4020_s26 }
 0x5f0   :  { %v4806_v9 = vpop.permute.xlu0 %2531  ;;  %v4808_v3 = vpop.permute.xlu1 %2337  ;;  %v5094_v63 = vstv %s3720_s21  ;;  %s3732_s21 = sld [smem:[#allocation7 + $0x22]] }
 0x5f1   :  { %6514 = vst [vmem:[#allocation52_spill] sm:$0xff] %v4806_v9  ;;  %6515 = vst [vmem:[#allocation53_spill] sm:$0xff] %v4808_v3  ;;  %v1085_v3 = vmul.f32 %v4816_v56, %v4814_v38  ;;  %v4978_v9 = vld [vmem:[#allocation2 + $0x32] sm:$0xff] }
 0x5f2   :  { %1057 = vrot.lane.b32.xlu0 %v1047_v7, %s4021_s29  ;;  %2733 = vrot.lane.b32.xlu1 %v2722_v8, %s4020_s26  ;;  %v1087_v8 = vmul.f32 %v4816_v56, %v4828_v20 }
 0x5f4   :  { %v4820_v22 = vpop.permute.xlu0 %2535  ;;  %v4822_v35 = vpop.permute.xlu1 %2341 }
 0x5f5   :  { %6516 = vst [vmem:[#allocation54_spill] sm:$0xff] %v4820_v22  ;;  %6517 = vst [vmem:[#allocation55_spill] sm:$0xff] %v4822_v35  ;;  %v2748_v35 = vmul.f32 %v4652_v41, %v4714_v39  ;;  %v2786_v41 = vmul.f32 %v4844_v14, %v4842_v30 }
 0x5f6   :  { %1093 = vrot.lane.b32.xlu0 %v1085_v3, %s4016_s18  ;;  %2755 = vrot.lane.b32.xlu1 %v2746_v24, %s4021_s29 }
 0x5f8   :  { %v4832_v55 = vpop.permute.xlu0 %2557  ;;  %v4834_v7 = vpop.permute.xlu1 %2363 }
 0x5f9   :  { %6518 = vst [vmem:[#allocation56_spill] sm:$0xff] %v4832_v55  ;;  %6519 = vst [vmem:[#allocation57_spill] sm:$0xff] %v4834_v7  ;;  %v1111_v7 = vmul.f32 %v4840_v2, %v4814_v38 }
 0x5fa   :  { %1097 = vrot.lane.b32.xlu0 %v1087_v8, %s4016_s18  ;;  %2759 = vrot.lane.b32.xlu1 %v2748_v35, %s4021_s29  ;;  %v1113_v35 = vmul.f32 %v4840_v2, %v4828_v20  ;;  %v2788_v8 = vmul.f32 %v4844_v14, %v4415_v49 }
 0x5fc   :  { %v4848_v3 = vpop.permute.xlu0 %2561  ;;  %v4850_v24 = vpop.permute.xlu1 %2367 }
 0x5fd   :  { %6520 = vst [vmem:[#allocation58_spill] sm:$0xff] %v4848_v3  ;;  %6521 = vst [vmem:[#allocation59_spill] sm:$0xff] %v4850_v24  ;;  %v4866_v24 = vstv %s3708_s23  ;;  %s903_s23 = sld [smem:[#allocation7]] }
 0x5fe   :  { %1119 = vrot.lane.b32.xlu0 %v1111_v7, %s4017_s20  ;;  %2795 = vrot.lane.b32.xlu1 %v2786_v41, %s4016_s18 }
 0x600   :  { %v4858_v39 = vpop.permute.xlu0 %2583  ;;  %v4860_v43 = vpop.permute.xlu1 %2389 }
 0x601   :  { %6522 = vst [vmem:[#allocation60_spill] sm:$0xff] %v4858_v39  ;;  %6523 = vst [vmem:[#allocation61_spill] sm:$0xff] %v4860_v43  ;;  %v1137_v43 = vmul.f32 %v4866_v24, %v4814_v38 }
 0x602   :  { %1123 = vrot.lane.b32.xlu0 %v1113_v35, %s4017_s20  ;;  %2799 = vrot.lane.b32.xlu1 %v2788_v8, %s4016_s18  ;;  %v1139_v35 = vmul.f32 %v4866_v24, %v4828_v20  ;;  %v2814_v8 = vmul.f32 %v4868_v6, %v4415_v49 }
 0x603   :  { %v5096_v42 = vstv %s903_s23  ;;  %s3734_s23 = sld [smem:[#allocation7 + $0x24]] }
 0x604   :  { %v4872_v7 = vpop.permute.xlu0 %2587  ;;  %v4874_v41 = vpop.permute.xlu1 %2393  ;;  %v905_v4 = vmul.f32 %v5096_v42, %v4674_v61  ;;  %v1086_v61 = vmul.f32 %v4816_v56, %v5108_v25  ;;  %v907_v10 = vmul.f32 %v5096_v42, %v4688_v28  ;;  %v1088_v28 = vmul.f32 %v4816_v56, %v5123_v12 }
 0x605   :  { %6524 = vst [vmem:[#allocation62_spill] sm:$0xff] %v4872_v7  ;;  %6525 = vst [vmem:[#allocation63_spill] sm:$0xff] %v4874_v41  ;;  %v4890_v41 = vstv %s3709_s27  ;;  %s3705_s27 = sld [smem:[#allocation7 + $0x7]] }
 0x606   :  { %1145 = vrot.lane.b32.xlu0 %v1137_v43, %s4018_s22  ;;  %2821 = vrot.lane.b32.xlu1 %v2812_v15, %s4017_s20 }
 0x608   :  { %v4882_v53 = vpop.permute.xlu0 %2623  ;;  %v4884_v31 = vpop.permute.xlu1 %2415 }
 0x609   :  { %6526 = vst [vmem:[#allocation64_spill] sm:$0xff] %v4882_v53  ;;  %6527 = vst [vmem:[#allocation65_spill] sm:$0xff] %v4884_v31  ;;  %v1163_v31 = vmul.f32 %v4890_v41, %v4814_v38  ;;  %v2838_v53 = vmul.f32 %v4892_v17, %v4842_v30 }
 0x60a   :  { %1149 = vrot.lane.b32.xlu0 %v1139_v35, %s4018_s22  ;;  %2825 = vrot.lane.b32.xlu1 %v2814_v8, %s4017_s20  ;;  %v1165_v35 = vmul.f32 %v4890_v41, %v4828_v20  ;;  %v2840_v8 = vmul.f32 %v4892_v17, %v4415_v49 }
 0x60b   :  { %v5136_v0 = vstv %s3705_s27  ;;  %s3726_s27 = sld [smem:[#allocation7 + $0x1c]] }
 0x60c   :  { %v4896_v15 = vpop.permute.xlu0 %2627  ;;  %v4898_v43 = vpop.permute.xlu1 %2419 }
 0x60d   :  { %6528 = vst [vmem:[#allocation66_spill] sm:$0xff] %v4896_v15  ;;  %6529 = vst [vmem:[#allocation67_spill] sm:$0xff] %v4898_v43  ;;  %v4914_v43 = vstv %s3710_s5  ;;  %v4916_v15 = vstv %s3779_s6  ;;  %s3723_s5 = sld [smem:[#allocation7 + $0x19]]  ;;  %s3724_s6 = sld [smem:[#allocation7 + $0x1a]] }
 0x60e   :  { %1171 = vrot.lane.b32.xlu0 %v1163_v31, %s4019_s24  ;;  %2847 = vrot.lane.b32.xlu1 %v2838_v53, %s4018_s22 }
 0x610   :  { %v4906_v7 = vpop.permute.xlu0 %2649  ;;  %v4908_v3 = vpop.permute.xlu1 %2455 }
 0x611   :  { %6530 = vst [vmem:[#allocation68_spill] sm:$0xff] %v4906_v7  ;;  %6531 = vst [vmem:[#allocation69_spill] sm:$0xff] %v4908_v3  ;;  %v1189_v3 = vmul.f32 %v4914_v43, %v4814_v38  ;;  %v2864_v7 = vmul.f32 %v4916_v15, %v4842_v30 }
 0x612   :  { %1175 = vrot.lane.b32.xlu0 %v1165_v35, %s4019_s24  ;;  %2851 = vrot.lane.b32.xlu1 %v2840_v8, %s4018_s22  ;;  %v1191_v35 = vmul.f32 %v4914_v43, %v4828_v20  ;;  %v2866_v8 = vmul.f32 %v4916_v15, %v4415_v49 }
 0x614   :  { %v4920_v31 = vpop.permute.xlu0 %2653  ;;  %v4922_v53 = vpop.permute.xlu1 %2459 }
 0x615   :  { %6532 = vst [vmem:[#allocation70_spill] sm:$0xff] %v4920_v31  ;;  %6533 = vst [vmem:[#allocation71_spill] sm:$0xff] %v4922_v53  ;;  %v4938_v53 = vstv %s3711_s0  ;;  %v4940_v31 = vstv %s3780_s7  ;;  %s3725_s0 = sld [smem:[#allocation7 + $0x1b]]  ;;  %s3712_s7 = sld [smem:[#allocation7 + $0xe]] }
 0x616   :  { %1197 = vrot.lane.b32.xlu0 %v1189_v3, %s4020_s26  ;;  %2873 = vrot.lane.b32.xlu1 %v2864_v7, %s4019_s24 }
 0x618   :  { %v4930_v39 = vpop.permute.xlu0 %2675  ;;  %v4932_v22 = vpop.permute.xlu1 %2481 }
 0x619   :  { %6534 = vst [vmem:[#allocation72_spill] sm:$0xff] %v4930_v39  ;;  %6535 = vst [vmem:[#allocation73_spill] sm:$0xff] %v4932_v22  ;;  %v1215_v22 = vmul.f32 %v4938_v53, %v4814_v38  ;;  %v2890_v39 = vmul.f32 %v4940_v31, %v4842_v30 }
 0x61a   :  { %1201 = vrot.lane.b32.xlu0 %v1191_v35, %s4020_s26  ;;  %2877 = vrot.lane.b32.xlu1 %v2866_v8, %s4019_s24  ;;  %v1217_v35 = vmul.f32 %v4938_v53, %v4828_v20  ;;  %v2892_v8 = vmul.f32 %v4940_v31, %v4415_v49  ;;  %v4976_v49 = vld [vmem:[#allocation2 + $0x8] sm:$0xff] }
 0x61c   :  { %v4944_v3 = vpop.permute.xlu0 %2679  ;;  %v4946_v7 = vpop.permute.xlu1 %2485 }
 0x61d   :  { %6536 = vst [vmem:[#allocation74_spill] sm:$0xff] %v4944_v3  ;;  %6537 = vst [vmem:[#allocation75_spill] sm:$0xff] %v4946_v7  ;;  %v4962_v7 = vld [vmem:[#allocation2 + $0x2] sm:$0xff]  ;;  %v4964_v3 = vstv %s3713_s1  ;;  %s3727_s1 = sld [smem:[#allocation7 + $0x1d]] }
 0x61e   :  { %1223 = vrot.lane.b32.xlu0 %v1215_v22, %s4021_s29  ;;  %2899 = vrot.lane.b32.xlu1 %v2890_v39, %s4020_s26 }
 0x620   :  { %v4954_v55 = vpop.permute.xlu0 %2701  ;;  %v4956_v32 = vpop.permute.xlu1 %2507 }
 0x621   :  { %6538 = vst [vmem:[#allocation76_spill] sm:$0xff] %v4954_v55  ;;  %6539 = vst [vmem:[#allocation77_spill] sm:$0xff] %v4956_v32  ;;  %v1255_v32 = vmul.f32 %v4964_v3, %v4962_v7  ;;  %v2916_v55 = vmul.f32 %v4405_v46, %v4842_v30  ;;  %v4992_v30 = vstv %s3714_s8  ;;  %s3728_s8 = sld [smem:[#allocation7 + $0x1e]] }
 0x622   :  { %1227 = vrot.lane.b32.xlu0 %v1217_v35, %s4021_s29  ;;  %2903 = vrot.lane.b32.xlu1 %v2892_v8, %s4020_s26 }
 0x624   :  { %v4968_v22 = vpop.permute.xlu0 %2705  ;;  %v4970_v39 = vpop.permute.xlu1 %2511 }
 0x625   :  { %6540 = vst [vmem:[#allocation78_spill] sm:$0xff] %v4968_v22  ;;  %6541 = vst [vmem:[#allocation79_spill] sm:$0xff] %v4970_v39  ;;  %v1257_v39 = vmul.f32 %v4964_v3, %v4978_v9  ;;  %v916_v22 = vmul.f32 %v4676_v45, %v4976_v49 }
 0x626   :  { %1263 = vrot.lane.b32.xlu0 %v1255_v32, %s4016_s18  ;;  %2925 = vrot.lane.b32.xlu1 %v2916_v55, %s4021_s29 }
 0x628   :  { %v4982_v35 = vpop.permute.xlu0 %2727  ;;  %v4984_v8 = vpop.permute.xlu1 %2533 }
 0x629   :  { %6542 = vst [vmem:[#allocation80_spill] sm:$0xff] %v4982_v35  ;;  %6543 = vst [vmem:[#allocation81_spill] sm:$0xff] %v4984_v8  ;;  %v1281_v8 = vmul.f32 %v4992_v30, %v4962_v7  ;;  %v918_v35 = vmul.f32 %v4676_v45, %v4990_v36 }
 0x62a   :  { %1267 = vrot.lane.b32.xlu0 %v1257_v39, %s4016_s18  ;;  %925 = vrot.lane.b32.xlu1 %v916_v22, %s4016_s18  ;;  %v1283_v22 = vmul.f32 %v4992_v30, %v4978_v9  ;;  %v942_v39 = vmul.f32 %v4700_v11, %v4976_v49 }
 0x62c   :  { %v4996_v55 = vpop.permute.xlu0 %2731  ;;  %v4998_v32 = vpop.permute.xlu1 %2537 }
 0x62d   :  { %6544 = vst [vmem:[#allocation82_spill] sm:$0xff] %v4996_v55  ;;  %6545 = vst [vmem:[#allocation83_spill] sm:$0xff] %v4998_v32  ;;  %v5014_v32 = vstv %s3715_s15  ;;  %s3719_s15 = sld [smem:[#allocation7 + $0x15]] }
 0x62e   :  { %1289 = vrot.lane.b32.xlu0 %v1281_v8, %s4017_s20  ;;  %929 = vrot.lane.b32.xlu1 %v918_v35, %s4016_s18  ;;  %v1307_v8 = vmul.f32 %v5014_v32, %v4962_v7 }
 0x630   :  { %v5006_v27 = vpop.permute.xlu0 %2753  ;;  %v5008_v33 = vpop.permute.xlu1 %2559 }
 0x631   :  { %6546 = vst [vmem:[#allocation84_spill] sm:$0xff] %v5006_v27  ;;  %6547 = vst [vmem:[#allocation85_spill] sm:$0xff] %v5008_v33  ;;  %v944_v33 = vmul.f32 %v4700_v11, %v4990_v36 }
 0x632   :  { %1293 = vrot.lane.b32.xlu0 %v1283_v22, %s4017_s20  ;;  %951 = vrot.lane.b32.xlu1 %v942_v39, %s4017_s20  ;;  %v1309_v22 = vmul.f32 %v5014_v32, %v4978_v9  ;;  %v968_v39 = vmul.f32 %v4726_v44, %v4976_v49 }
 0x634   :  { %v5018_v45 = vpop.permute.xlu0 %2757  ;;  %v5020_v35 = vpop.permute.xlu1 %2563 }
 0x635   :  { %6548 = vst [vmem:[#allocation86_spill] sm:$0xff] %v5018_v45  ;;  %6549 = vst [vmem:[#allocation87_spill] sm:$0xff] %v5020_v35  ;;  %v5036_v35 = vstv %s3716_s16  ;;  %s3729_s16 = sld [smem:[#allocation7 + $0x1f]] }
 0x636   :  { %1315 = vrot.lane.b32.xlu0 %v1307_v8, %s4018_s22  ;;  %955 = vrot.lane.b32.xlu1 %v944_v33, %s4017_s20  ;;  %v1333_v8 = vmul.f32 %v5036_v35, %v4962_v7 }
 0x638   :  { %v5028_v55 = vpop.permute.xlu0 %923  ;;  %v5030_v27 = vpop.permute.xlu1 %2585 }
 0x639   :  { %6550 = vst [vmem:[#allocation88_spill] sm:$0xff] %v5030_v27  ;;  %v970_v27 = vmul.f32 %v4726_v44, %v4990_v36 }
 0x63a   :  { %1319 = vrot.lane.b32.xlu0 %v1309_v22, %s4018_s22  ;;  %977 = vrot.lane.b32.xlu1 %v968_v39, %s4018_s22  ;;  %v1335_v22 = vmul.f32 %v5036_v35, %v4978_v9  ;;  %v994_v39 = vmul.f32 %v4748_v21, %v4976_v49 }
 0x63c   :  { %v5040_v11 = vpop.permute.xlu0 %927  ;;  %v5042_v33 = vpop.permute.xlu1 %2589 }
 0x63d   :  { %6551 = vst [vmem:[#allocation89_spill] sm:$0xff] %v5042_v33  ;;  %v5056_v33 = vstv %s3717_s17  ;;  %s5372_s17 = sld [smem:[#allocation7 + $0x20]] }
 0x63e   :  { %1341 = vrot.lane.b32.xlu0 %v1333_v8, %s4019_s24  ;;  %981 = vrot.lane.b32.xlu1 %v970_v27, %s4018_s22  ;;  %v1359_v27 = vmul.f32 %v5056_v33, %v4962_v7 }
 0x640   :  { %v950_v45 = vpop.permute.xlu0 %949  ;;  %v5050_v58 = vpop.permute.xlu1 %2625 }
 0x641   :  { %6552 = vst [vmem:[#allocation90_spill] sm:$0xff] %v5050_v58  ;;  %v996_v58 = vmul.f32 %v4748_v21, %v4990_v36 }
 0x642   :  { %1345 = vrot.lane.b32.xlu0 %v1335_v22, %s4019_s24  ;;  %1003 = vrot.lane.b32.xlu1 %v994_v39, %s4019_s24  ;;  %v1361_v22 = vmul.f32 %v5056_v33, %v4978_v9  ;;  %v1020_v39 = vmul.f32 %v4770_v13, %v4976_v49 }
 0x644   :  { %v954_v44 = vpop.permute.xlu0 %953  ;;  %v5060_v8 = vpop.permute.xlu1 %2629 }
 0x645   :  { %6553 = vst [vmem:[#allocation91_spill] sm:$0xff] %v5060_v8  ;;  %v5074_v8 = vstv %s3718_s19  ;;  %s3731_s19 = sld [smem:[#allocation7 + $0x21]] }
 0x646   :  { %1367 = vrot.lane.b32.xlu0 %v1359_v27, %s4020_s26  ;;  %1007 = vrot.lane.b32.xlu1 %v996_v58, %s4019_s24  ;;  %v1385_v58 = vmul.f32 %v5074_v8, %v4962_v7 }
 0x648   :  { %v976_v16 = vpop.permute.xlu0 %975  ;;  %v5068_v47 = vpop.permute.xlu1 %2651 }
 0x649   :  { %6554 = vst [vmem:[#allocation92_spill] sm:$0xff] %v5068_v47  ;;  %v1022_v47 = vmul.f32 %v4770_v13, %v4990_v36 }
 0x64a   :  { %1371 = vrot.lane.b32.xlu0 %v1361_v22, %s4020_s26  ;;  %1029 = vrot.lane.b32.xlu1 %v1020_v39, %s4020_s26  ;;  %v1387_v22 = vmul.f32 %v5074_v8, %v4978_v9  ;;  %v1046_v39 = vmul.f32 %v4792_v57, %v4976_v49 }
 0x64c   :  { %v980_v21 = vpop.permute.xlu0 %979  ;;  %v5078_v27 = vpop.permute.xlu1 %2655 }
 0x64d   :  { %6555 = vst [vmem:[#allocation93_spill] sm:$0xff] %v5078_v27  ;;  %v5092_v27 = vld [vmem:[#allocation2 + $0x3] sm:$0xff] }
 0x64e   :  { %1393 = vrot.lane.b32.xlu0 %v1385_v58, %s4021_s29  ;;  %1033 = vrot.lane.b32.xlu1 %v1022_v47, %s4020_s26  ;;  %v1425_v58 = vmul.f32 %v5094_v63, %v5092_v27 }
 0x650   :  { %v1002_v59 = vpop.permute.xlu0 %1001  ;;  %v5086_v62 = vpop.permute.xlu1 %2677 }
 0x651   :  { %6556 = vst [vmem:[#allocation94_spill] sm:$0xff] %v5086_v62  ;;  %v1048_v62 = vmul.f32 %v4792_v57, %v4990_v36  ;;  %v1427_v57 = vmul.f32 %v5094_v63, %v5110_v23 }
 0x652   :  { %1397 = vrot.lane.b32.xlu0 %v1387_v22, %s4021_s29  ;;  %1055 = vrot.lane.b32.xlu1 %v1046_v39, %s4021_s29  ;;  %v935_v22 = vadd.f32 %v5028_v55, %v905_v4 }
 0x654   :  { %v1006_v13 = vpop.permute.xlu0 %1005  ;;  %v5100_v47 = vpop.permute.xlu1 %2681  ;;  %v961_v5 = vadd.f32 %v950_v45, %v935_v22 }
 0x655   :  { %6557 = vst [vmem:[#allocation95_spill] sm:$0xff] %v5100_v47 }
 0x656   :  { %1433 = vrot.lane.b32.xlu0 %v1425_v58, %s4016_s18  ;;  %1059 = vrot.lane.b32.xlu1 %v1048_v62, %s4021_s29  ;;  %v5125_v58 = vstv %s3721_s25  ;;  %v937_v62 = vadd.f32 %v5040_v11, %v907_v10  ;;  %v987_v4 = vadd.f32 %v976_v16, %v961_v5  ;;  %s3735_s25 = sld [smem:[#allocation7 + $0x25]] }
 0x657   :  { %v1451_v1 = vmul.f32 %v5125_v58, %v5092_v27  ;;  %v1453_v11 = vmul.f32 %v5125_v58, %v5110_v23 }
 0x658   :  { %v1028_v39 = vpop.permute.xlu0 %1027  ;;  %v5115_v47 = vpop.permute.xlu1 %2703  ;;  %v963_v45 = vadd.f32 %v954_v44, %v937_v62  ;;  %v1013_v22 = vadd.f32 %v1002_v59, %v987_v4  ;;  %v1075_v59 = vmul.f32 %v5136_v0, %v4814_v38  ;;  %v5148_v62 = vstv %s3722_s30  ;;  %s3736_s30 = sld [smem:[#allocation7 + $0x26]] }
 0x659   :  { %6558 = vst [vmem:[#allocation96_spill] sm:$0xff] %v5115_v47  ;;  %v1114_v38 = vmul.f32 %v4840_v2, %v5123_v12 }
 0x65a   :  { %1437 = vrot.lane.b32.xlu0 %v1427_v57, %s4016_s18  ;;  %1095 = vrot.lane.b32.xlu1 %v1086_v61, %s4016_s18  ;;  %v989_v57 = vadd.f32 %v980_v21, %v963_v45  ;;  %v1039_v10 = vadd.f32 %v1028_v39, %v1013_v22  ;;  %v1112_v61 = vmul.f32 %v4840_v2, %v5108_v25  ;;  %v5172_v2 = vstv %s3723_s5  ;;  %s5503_s5 = sld [smem:[#allocation7 + $0x27]] }
 0x65c   :  { %v1032_v55 = vpop.permute.xlu0 %1031  ;;  %v5130_v47 = vpop.permute.xlu1 %2707  ;;  %v1015_v56 = vadd.f32 %v1006_v13, %v989_v57  ;;  %v1077_v13 = vmul.f32 %v5136_v0, %v4828_v20 }
 0x65d   :  { %6559 = vst [vmem:[#allocation97_spill] sm:$0xff] %v5130_v47  ;;  %v5249_v47 = vld [vmem:[#allocation2 + $0x3a] sm:$0xff] }
 0x65e   :  { %1459 = vrot.lane.b32.xlu0 %v1451_v1, %s4017_s20  ;;  %1099 = vrot.lane.b32.xlu1 %v1088_v28, %s4016_s18  ;;  %v1041_v1 = vadd.f32 %v1032_v55, %v1015_v56  ;;  %v1477_v28 = vmul.f32 %v5148_v62, %v5092_v27 }
 0x660   :  { %v1054_v5 = vpop.permute.xlu0 %1053  ;;  %v5140_v16 = vpop.permute.xlu1 %2729 }
 0x661   :  { %6560 = vst [vmem:[#allocation98_spill] sm:$0xff] %v5140_v16  ;;  %v1065_v44 = vadd.f32 %v1054_v5, %v1039_v10  ;;  %v1479_v10 = vmul.f32 %v5148_v62, %v5110_v23  ;;  %v1138_v5 = vmul.f32 %v4866_v24, %v5108_v25 }
 0x662   :  { %1463 = vrot.lane.b32.xlu0 %v1453_v11, %s4017_s20  ;;  %1121 = vrot.lane.b32.xlu1 %v1112_v61, %s4017_s20  ;;  %v1503_v61 = vmul.f32 %v5172_v2, %v5092_v27 }
 0x663   :  { %v5152_v21 = vadd.f32 %v1075_v59, %v1065_v44  ;;  %v1140_v59 = vmul.f32 %v4866_v24, %v5123_v12 }
 0x664   :  { %v1058_v39 = vpop.permute.xlu0 %1057  ;;  %v5154_v4 = vpop.permute.xlu1 %2733 }
 0x665   :  { %6561 = vst [vmem:[#allocation99_spill] sm:$0xff] %v5154_v4  ;;  %v1067_v45 = vadd.f32 %v1058_v39, %v1041_v1  ;;  %v1505_v1 = vmul.f32 %v5172_v2, %v5110_v23  ;;  %v1164_v39 = vmul.f32 %v4890_v41, %v5108_v25  ;;  %v5243_v4 = vld [vmem:[#allocation2 + $0x4c] sm:$0xff] }
 0x666   :  { %1485 = vrot.lane.b32.xlu0 %v1477_v28, %s4018_s22  ;;  %1125 = vrot.lane.b32.xlu1 %v1114_v38, %s4017_s20  ;;  %v5190_v28 = vstv %s3724_s6  ;;  %s3738_s6 = sld [smem:[#allocation7 + $0x28]] }
 0x667   :  { %v5164_v55 = vadd.f32 %v1077_v13, %v1067_v45  ;;  %v1529_v13 = vmul.f32 %v5190_v28, %v5092_v27  ;;  %v1166_v45 = vmul.f32 %v4890_v41, %v5123_v12 }
 0x668   :  { %v1094_v22 = vpop.permute.xlu0 %1093  ;;  %v5166_v57 = vpop.permute.xlu1 %2755 }
 0x669   :  { %6562 = vst [vmem:[#allocation100_spill] sm:$0xff] %v5166_v57 }
 0x66a   :  { %1489 = vrot.lane.b32.xlu0 %v1479_v10, %s4018_s22  ;;  %1147 = vrot.lane.b32.xlu1 %v1138_v5, %s4018_s22 }
 0x66c   :  { %v1098_v20 = vpop.permute.xlu0 %1097  ;;  %v5176_v11 = vpop.permute.xlu1 %2759 }
 0x66d   :  { %6563 = vst [vmem:[#allocation101_spill] sm:$0xff] %v5176_v11 }
 0x66e   :  { %1511 = vrot.lane.b32.xlu0 %v1503_v61, %s4019_s24  ;;  %1151 = vrot.lane.b32.xlu1 %v1140_v59, %s4018_s22  ;;  %v1531_v61 = vmul.f32 %v5190_v28, %v5110_v23  ;;  %v1190_v59 = vmul.f32 %v4914_v43, %v5108_v25 }
 0x670   :  { %v1120_v56 = vpop.permute.xlu0 %1119  ;;  %v5184_v44 = vpop.permute.xlu1 %2795 }
 0x671   :  { %6564 = vst [vmem:[#allocation102_spill] sm:$0xff] %v5184_v44 }
 0x672   :  { %1515 = vrot.lane.b32.xlu0 %v1505_v1, %s4019_s24  ;;  %1173 = vrot.lane.b32.xlu1 %v1164_v39, %s4019_s24  ;;  %v5208_v1 = vstv %s3725_s0  ;;  %s3739_s0 = sld [smem:[#allocation7 + $0x29]] }
 0x674   :  { %v1124_v24 = vpop.permute.xlu0 %1123  ;;  %v5194_v38 = vpop.permute.xlu1 %2799 }
 0x675   :  { %6565 = vst [vmem:[#allocation103_spill] sm:$0xff] %v5194_v38 }
 0x676   :  { %1537 = vrot.lane.b32.xlu0 %v1529_v13, %s4020_s26  ;;  %1177 = vrot.lane.b32.xlu1 %v1166_v45, %s4019_s24  ;;  %v1555_v13 = vmul.f32 %v5208_v1, %v5092_v27  ;;  %v1192_v45 = vmul.f32 %v4914_v43, %v5123_v12 }
 0x678   :  { %v1146_v10 = vpop.permute.xlu0 %1145  ;;  %v5202_v5 = vpop.permute.xlu1 %2821 }
 0x679   :  { %6566 = vst [vmem:[#allocation104_spill] sm:$0xff] %v5202_v5 }
 0x67a   :  { %1541 = vrot.lane.b32.xlu0 %v1531_v61, %s4020_s26  ;;  %1199 = vrot.lane.b32.xlu1 %v1190_v59, %s4020_s26  ;;  %v1557_v61 = vmul.f32 %v5208_v1, %v5110_v23  ;;  %v1216_v59 = vmul.f32 %v4938_v53, %v5108_v25 }
 0x67c   :  { %v1150_v41 = vpop.permute.xlu0 %1149  ;;  %v5212_v39 = vpop.permute.xlu1 %2825 }
 0x67d   :  { %6567 = vst [vmem:[#allocation105_spill] sm:$0xff] %v5212_v39  ;;  %v5226_v39 = vld [vmem:[#allocation2 + $0x1c] sm:$0xff] }
 0x67e   :  { %1563 = vrot.lane.b32.xlu0 %v1555_v13, %s4021_s29  ;;  %1203 = vrot.lane.b32.xlu1 %v1192_v45, %s4020_s26  ;;  %v2785_v13 = vmul.f32 %v4844_v14, %v5226_v39  ;;  %v1218_v45 = vmul.f32 %v4938_v53, %v5123_v12 }
 0x680   :  { %v1172_v38 = vpop.permute.xlu0 %1171  ;;  %v5220_v5 = vpop.permute.xlu1 %2847 }
 0x681   :  { %6568 = vst [vmem:[#allocation106_spill] sm:$0xff] %v5220_v5  ;;  %v5236_v5 = vld [vmem:[#allocation2 + $0xa] sm:$0xff] }
 0x682   :  { %1567 = vrot.lane.b32.xlu0 %v1557_v61, %s4021_s29  ;;  %1225 = vrot.lane.b32.xlu1 %v1216_v59, %s4021_s29  ;;  %v1105_v61 = vadd.f32 %v1094_v22, %v5152_v21  ;;  %v1256_v53 = vmul.f32 %v4964_v3, %v5236_v5  ;;  %v1107_v21 = vadd.f32 %v1098_v20, %v5164_v55 }
 0x684   :  { %v1176_v43 = vpop.permute.xlu0 %1175  ;;  %v5230_v44 = vpop.permute.xlu1 %2851  ;;  %v1131_v57 = vadd.f32 %v1120_v56, %v1105_v61  ;;  %v1133_v16 = vadd.f32 %v1124_v24, %v1107_v21 }
 0x685   :  { %6569 = vst [vmem:[#allocation107_spill] sm:$0xff] %v5230_v44  ;;  %v2787_v44 = vmul.f32 %v5243_v4, %v4844_v14  ;;  %v1258_v14 = vmul.f32 %v4964_v3, %v5249_v47 }
 0x686   :  { %2793 = vrot.lane.b32.xlu0 %v2785_v13, %s4016_s18  ;;  %1229 = vrot.lane.b32.xlu1 %v1218_v45, %s4021_s29  ;;  %v1157_v22 = vadd.f32 %v1146_v10, %v1131_v57  ;;  %v1159_v61 = vadd.f32 %v1150_v41, %v1133_v16  ;;  %v2813_v10 = vmul.f32 %v5243_v4, %v4868_v6 }
 0x688   :  { %v1198_v11 = vpop.permute.xlu0 %1197  ;;  %v5241_v59 = vpop.permute.xlu1 %2873  ;;  %v1183_v56 = vadd.f32 %v1172_v38, %v1157_v22  ;;  %v1185_v3 = vadd.f32 %v1176_v43, %v1159_v61  ;;  %v1284_v43 = vmul.f32 %v4992_v30, %v5249_v47  ;;  %v1308_v61 = vmul.f32 %v5014_v32, %v5236_v5 }
 0x689   :  { %6570 = vst [vmem:[#allocation108_spill] sm:$0xff] %v5241_v59  ;;  %v2811_v59 = vmul.f32 %v4868_v6, %v5226_v39  ;;  %v2837_v6 = vmul.f32 %v4892_v17, %v5226_v39 }
 0x68a   :  { %2797 = vrot.lane.b32.xlu0 %v2787_v44, %s4016_s18  ;;  %1265 = vrot.lane.b32.xlu1 %v1256_v53, %s4016_s18  ;;  %v5262_v44 = vstv %s3712_s7  ;;  %v1209_v55 = vadd.f32 %v1198_v11, %v1183_v56  ;;  %v1282_v53 = vmul.f32 %v4992_v30, %v5236_v5  ;;  %v2839_v56 = vmul.f32 %v5243_v4, %v4892_v17  ;;  %s3741_s7 = sld [smem:[#allocation7 + $0x2b]] }
 0x68b   :  { %v1245_v24 = vmul.f32 %v5262_v44, %v4962_v7  ;;  %v1247_v7 = vmul.f32 %v5262_v44, %v4978_v9 }
 0x68c   :  { %v1202_v13 = vpop.permute.xlu0 %1201  ;;  %v5254_v45 = vpop.permute.xlu1 %2877 }
 0x68d   :  { %6571 = vst [vmem:[#allocation109_spill] sm:$0xff] %v5254_v45  ;;  %v1211_v16 = vadd.f32 %v1202_v13, %v1185_v3  ;;  %v1334_v3 = vmul.f32 %v5036_v35, %v5236_v5 }
 0x68e   :  { %2819 = vrot.lane.b32.xlu0 %v2811_v59, %s4017_s20  ;;  %1269 = vrot.lane.b32.xlu1 %v1258_v14, %s4016_s18 }
 0x690   :  { %v1224_v57 = vpop.permute.xlu0 %1223  ;;  %v5264_v20 = vpop.permute.xlu1 %2899 }
 0x691   :  { %6572 = vst [vmem:[#allocation110_spill] sm:$0xff] %v5264_v20  ;;  %v1235_v38 = vadd.f32 %v1224_v57, %v1209_v55  ;;  %v2863_v55 = vmul.f32 %v4916_v15, %v5226_v39  ;;  %v1310_v57 = vmul.f32 %v5014_v32, %v5249_v47  ;;  %v2889_v32 = vmul.f32 %v4940_v31, %v5226_v39 }
 0x692   :  { %2823 = vrot.lane.b32.xlu0 %v2813_v10, %s4017_s20  ;;  %1291 = vrot.lane.b32.xlu1 %v1282_v53, %s4017_s20  ;;  %v2865_v53 = vmul.f32 %v5243_v4, %v4916_v15 }
 0x693   :  { %v5274_v11 = vadd.f32 %v1245_v24, %v1235_v38 }
 0x694   :  { %v1228_v41 = vpop.permute.xlu0 %1227  ;;  %v5276_v59 = vpop.permute.xlu1 %2903 }
 0x695   :  { %6573 = vst [vmem:[#allocation111_spill] sm:$0xff] %v5276_v59  ;;  %v1237_v21 = vadd.f32 %v1228_v41, %v1211_v16  ;;  %v1336_v16 = vmul.f32 %v5036_v35, %v5249_v47 }
 0x696   :  { %2845 = vrot.lane.b32.xlu0 %v2837_v6, %s4018_s22  ;;  %1295 = vrot.lane.b32.xlu1 %v1284_v43, %s4017_s20  ;;  %v2891_v6 = vmul.f32 %v5243_v4, %v4940_v31  ;;  %v1360_v43 = vmul.f32 %v5056_v33, %v5236_v5 }
 0x697   :  { %v5286_v22 = vadd.f32 %v1247_v7, %v1237_v21  ;;  %v2915_v21 = vmul.f32 %v4405_v46, %v5226_v39  ;;  %v1386_v46 = vmul.f32 %v5074_v8, %v5236_v5  ;;  %v5338_v39 = vld [vmem:[#allocation2 + $0x34] sm:$0xff] }
 0x698   :  { %v1264_v13 = vpop.permute.xlu0 %1263  ;;  %v5288_v14 = vpop.permute.xlu1 %2925 }
 0x699   :  { %6574 = vst [vmem:[#allocation112_spill] sm:$0xff] %v5288_v14  ;;  %v5359_v14 = vld [vmem:[#allocation2 + $0x3b] sm:$0xff] }
 0x69a   :  { %2849 = vrot.lane.b32.xlu0 %v2839_v56, %s4018_s22  ;;  %1317 = vrot.lane.b32.xlu1 %v1308_v61, %s4018_s22  ;;  %v1362_v56 = vmul.f32 %v5056_v33, %v5249_v47  ;;  %v5328_v61 = vld [vmem:[#allocation2 + $0x4] sm:$0xff]  ;;  %v1428_v60 = vmul.f32 %v5094_v63, %v5359_v14 }
 0x69c   :  { %v1268_v9 = vpop.permute.xlu0 %1267  ;;  %v926_v30 = vpop.permute.xlu1 %925 }
 0x69e   :  { %2871 = vrot.lane.b32.xlu0 %v2863_v55, %s4019_s24  ;;  %1321 = vrot.lane.b32.xlu1 %v1310_v57, %s4018_s22  ;;  %v5330_v55 = vstv %s3727_s1  ;;  %s3742_s1 = sld [smem:[#allocation7 + $0x2c]] }
 0x69f   :  { %v1595_v57 = vmul.f32 %v5330_v55, %v5328_v61 }
 0x6a0   :  { %v1290_v17 = vpop.permute.xlu0 %1289  ;;  %v5302_v10 = vpop.permute.xlu1 %929 }
 0x6a2   :  { %2875 = vrot.lane.b32.xlu0 %v2865_v53, %s4019_s24  ;;  %1343 = vrot.lane.b32.xlu1 %v1334_v3, %s4019_s24  ;;  %v1597_v3 = vmul.f32 %v5330_v55, %v5338_v39 }
 0x6a4   :  { %v1294_v24 = vpop.permute.xlu0 %1293  ;;  %v952_v38 = vpop.permute.xlu1 %951 }
 0x6a6   :  { %2897 = vrot.lane.b32.xlu0 %v2889_v32, %s4020_s26  ;;  %1347 = vrot.lane.b32.xlu1 %v1336_v16, %s4019_s24  ;;  %v1388_v32 = vmul.f32 %v5074_v8, %v5249_v47  ;;  %v5346_v16 = vstv %s3728_s8  ;;  %s3743_s8 = sld [smem:[#allocation7 + $0x2d]] }
 0x6a7   :  { %v1623_v20 = vmul.f32 %v5346_v16, %v5338_v39 }
 0x6a8   :  { %v1316_v15 = vpop.permute.xlu0 %1315  ;;  %v5316_v41 = vpop.permute.xlu1 %955 }
 0x6aa   :  { %2901 = vrot.lane.b32.xlu0 %v2891_v6, %s4020_s26  ;;  %1369 = vrot.lane.b32.xlu1 %v1360_v43, %s4020_s26  ;;  %v5348_v6 = vld [vmem:[#allocation2 + $0xb] sm:$0xff]  ;;  %v1275_v43 = vadd.f32 %v1264_v13, %v5274_v11  ;;  %v1277_v11 = vadd.f32 %v1268_v9, %v5286_v22 }
 0x6ab   :  { %v1426_v8 = vmul.f32 %v5094_v63, %v5348_v6 }
 0x6ac   :  { %v1320_v7 = vpop.permute.xlu0 %1319  ;;  %v978_v35 = vpop.permute.xlu1 %977  ;;  %v1301_v59 = vadd.f32 %v1290_v17, %v1275_v43  ;;  %v5370_v17 = vstv %s3729_s16  ;;  %v908_v43 = vmul.f32 %v5096_v42, %v4990_v36  ;;  %v1303_v22 = vadd.f32 %v1294_v24, %v1277_v11  ;;  %s3745_s16 = sld [smem:[#allocation7 + $0x2f]] }
 0x6ad   :  { %v1452_v36 = vmul.f32 %v5125_v58, %v5348_v6 }
 0x6ae   :  { %2923 = vrot.lane.b32.xlu0 %v2915_v21, %s4021_s29  ;;  %1373 = vrot.lane.b32.xlu1 %v1362_v56, %s4020_s26 }
 0x6b0   :  { %v1342_v31 = vpop.permute.xlu0 %1341  ;;  %v982_v4 = vpop.permute.xlu1 %981 }
 0x6b2   :  { %1603 = vrot.lane.b32.xlu0 %v1595_v57, %s4016_s18  ;;  %1395 = vrot.lane.b32.xlu1 %v1386_v46, %s4021_s29  ;;  %v1621_v57 = vmul.f32 %v5346_v16, %v5328_v61  ;;  %v906_v46 = vmul.f32 %v5096_v42, %v4976_v49  ;;  %v5368_v49 = vstv %s3719_s15  ;;  %v1647_v42 = vmul.f32 %v5370_v17, %v5328_v61  ;;  %s3744_s15 = sld [smem:[#allocation7 + $0x2e]] }
 0x6b4   :  { %v1346_v33 = vpop.permute.xlu0 %1345  ;;  %v1004_v53 = vpop.permute.xlu1 %1003  ;;  %v936_v13 = vadd.f32 %v926_v30, %v906_v46  ;;  %v938_v30 = vadd.f32 %v5302_v10, %v908_v43 }
 0x6b6   :  { %1607 = vrot.lane.b32.xlu0 %v1597_v3, %s4016_s18  ;;  %1399 = vrot.lane.b32.xlu1 %v1388_v32, %s4021_s29  ;;  %v1327_v3 = vadd.f32 %v1316_v15, %v1301_v59  ;;  %v962_v9 = vadd.f32 %v952_v38, %v936_v13  ;;  %v1329_v15 = vadd.f32 %v1320_v7, %v1303_v22 }
 0x6b8   :  { %v1368_v21 = vpop.permute.xlu0 %1367  ;;  %v1008_v56 = vpop.permute.xlu1 %1007  ;;  %v1353_v59 = vadd.f32 %v1342_v31, %v1327_v3  ;;  %v988_v63 = vadd.f32 %v978_v35, %v962_v9  ;;  %v1417_v31 = vmul.f32 %v5368_v49, %v5110_v23 }
 0x6ba   :  { %1629 = vrot.lane.b32.xlu0 %v1621_v57, %s4017_s20  ;;  %1435 = vrot.lane.b32.xlu1 %v1426_v8, %s4016_s18  ;;  %v1379_v57 = vadd.f32 %v1368_v21, %v1353_v59  ;;  %v1415_v8 = vmul.f32 %v5368_v49, %v5092_v27  ;;  %v1014_v24 = vadd.f32 %v1004_v53, %v988_v63  ;;  %v5397_v53 = vstv %s5372_s17  ;;  %s3746_s17 = sld [smem:[#allocation7 + $0x30]] }
 0x6bb   :  { %v1673_v9 = vmul.f32 %v5397_v53, %v5328_v61  ;;  %v1675_v63 = vmul.f32 %v5397_v53, %v5338_v39 }
 0x6bc   :  { %v1372_v32 = vpop.permute.xlu0 %1371  ;;  %v1030_v45 = vpop.permute.xlu1 %1029 }
 0x6bd   :  { %v1040_v7 = vadd.f32 %v1030_v45, %v1014_v24  ;;  %v5443_v24 = vstv %s3732_s21  ;;  %s3784_s21 = sld [smem:[#allocation7 + $0x56]] }
 0x6be   :  { %1633 = vrot.lane.b32.xlu0 %v1623_v20, %s4017_s20  ;;  %1439 = vrot.lane.b32.xlu1 %v1428_v60, %s4016_s18  ;;  %v964_v20 = vadd.f32 %v5316_v41, %v938_v30  ;;  %v1355_v60 = vadd.f32 %v1346_v33, %v1329_v15  ;;  %v1649_v41 = vmul.f32 %v5370_v17, %v5338_v39 }
 0x6bf   :  { %v1454_v33 = vmul.f32 %v5125_v58, %v5359_v14 }
 0x6c0   :  { %v1394_v46 = vpop.permute.xlu0 %1393  ;;  %v1034_v50 = vpop.permute.xlu1 %1033  ;;  %v990_v38 = vadd.f32 %v982_v4, %v964_v20  ;;  %v1381_v27 = vadd.f32 %v1372_v32, %v1355_v60  ;;  %v1076_v4 = vmul.f32 %v5136_v0, %v5108_v25  ;;  %v1478_v25 = vmul.f32 %v5148_v62, %v5348_v6 }
 0x6c1   :  { %v1405_v10 = vadd.f32 %v1394_v46, %v1379_v57  ;;  %v1480_v57 = vmul.f32 %v5148_v62, %v5359_v14  ;;  %v1506_v60 = vmul.f32 %v5172_v2, %v5359_v14 }
 0x6c2   :  { %1655 = vrot.lane.b32.xlu0 %v1647_v42, %s4018_s22  ;;  %1461 = vrot.lane.b32.xlu1 %v1452_v36, %s4017_s20  ;;  %v1016_v13 = vadd.f32 %v1008_v56, %v990_v38  ;;  %v1078_v56 = vmul.f32 %v5136_v0, %v5123_v12  ;;  %v1504_v42 = vmul.f32 %v5172_v2, %v5348_v6 }
 0x6c3   :  { %v5388_v35 = vadd.f32 %v1415_v8, %v1405_v10  ;;  %v5427_v8 = vstv %s3731_s19  ;;  %s3783_s19 = sld [smem:[#allocation7 + $0x55]] }
 0x6c4   :  { %v1398_v21 = vpop.permute.xlu0 %1397  ;;  %v1056_v11 = vpop.permute.xlu1 %1055  ;;  %v1042_v23 = vadd.f32 %v1034_v50, %v1016_v13  ;;  %v1699_v46 = vmul.f32 %v5427_v8, %v5328_v61  ;;  %v1701_v20 = vmul.f32 %v5427_v8, %v5338_v39 }
 0x6c5   :  { %v1407_v45 = vadd.f32 %v1398_v21, %v1381_v27  ;;  %v1066_v3 = vadd.f32 %v1056_v11, %v1040_v7  ;;  %v1725_v27 = vmul.f32 %v5443_v24, %v5328_v61  ;;  %v1530_v7 = vmul.f32 %v5190_v28, %v5348_v6 }
 0x6c6   :  { %1659 = vrot.lane.b32.xlu0 %v1649_v41, %s4018_s22  ;;  %1465 = vrot.lane.b32.xlu1 %v1454_v33, %s4017_s20  ;;  %v1727_v21 = vmul.f32 %v5443_v24, %v5338_v39  ;;  %v1532_v11 = vmul.f32 %v5190_v28, %v5359_v14  ;;  %v5459_v41 = vld [vmem:[#allocation2 + $0x5] sm:$0xff]  ;;  %v5461_v33 = vstv %s3734_s23  ;;  %s3733_s23 = sld [smem:[#allocation7 + $0x23]] }
 0x6c7   :  { %v5403_v32 = vadd.f32 %v1417_v31, %v1407_v45  ;;  %v5405_v43 = vadd.f32 %v1076_v4, %v1066_v3  ;;  %v1765_v45 = vmul.f32 %v5461_v33, %v5459_v41  ;;  %v1556_v3 = vmul.f32 %v5208_v1, %v5348_v6 }
 0x6c8   :  { %v5407_v22 = vpop.permute.xlu0 %1433  ;;  %v1060_v58 = vpop.permute.xlu1 %1059 }
 0x6c9   :  { %v1068_v59 = vadd.f32 %v1060_v58, %v1042_v23  ;;  %v5469_v23 = vld [vmem:[#allocation2 + $0x35] sm:$0xff] }
 0x6ca   :  { %1681 = vrot.lane.b32.xlu0 %v1673_v9, %s4019_s24  ;;  %1487 = vrot.lane.b32.xlu1 %v1478_v25, %s4018_s22  ;;  %v1767_v9 = vmul.f32 %v5461_v33, %v5469_v23  ;;  %v1558_v25 = vmul.f32 %v5208_v1, %v5359_v14 }
 0x6cb   :  { %v5417_v50 = vadd.f32 %v1078_v56, %v1068_v59  ;;  %v5477_v56 = vstv %s3735_s25  ;;  %v5479_v59 = vld [vmem:[#allocation2 + $0xc] sm:$0xff]  ;;  %s3785_s25 = sld [smem:[#allocation7 + $0x57]] }
 0x6cc   :  { %v5419_v30 = vpop.permute.xlu0 %1437  ;;  %v5421_v15 = vpop.permute.xlu1 %1095  ;;  %v1596_v1 = vmul.f32 %v5330_v55, %v5479_v59 }
 0x6ce   :  { %1685 = vrot.lane.b32.xlu0 %v1675_v63, %s4019_s24  ;;  %1491 = vrot.lane.b32.xlu1 %v1480_v57, %s4018_s22  ;;  %v1445_v63 = vadd.f32 %v5407_v22, %v5388_v35  ;;  %v1106_v35 = vadd.f32 %v5421_v15, %v5405_v43 }
 0x6d0   :  { %v1460_v0 = vpop.permute.xlu0 %1459  ;;  %v5431_v12 = vpop.permute.xlu1 %1099 }
 0x6d1   :  { %v1108_v43 = vadd.f32 %v5431_v12, %v5417_v50 }
 0x6d2   :  { %1707 = vrot.lane.b32.xlu0 %v1699_v46, %s4020_s26  ;;  %1513 = vrot.lane.b32.xlu1 %v1504_v42, %s4019_s24  ;;  %v1791_v42 = vmul.f32 %v5477_v56, %v5459_v41 }
 0x6d4   :  { %v1464_v62 = vpop.permute.xlu0 %1463  ;;  %v1122_v36 = vpop.permute.xlu1 %1121 }
 0x6d6   :  { %1711 = vrot.lane.b32.xlu0 %v1701_v20, %s4020_s26  ;;  %1517 = vrot.lane.b32.xlu1 %v1506_v60, %s4019_s24  ;;  %v1471_v20 = vadd.f32 %v1460_v0, %v1445_v63  ;;  %v5489_v60 = vld [vmem:[#allocation2 + $0x3c] sm:$0xff] }
 0x6d7   :  { %v1598_v0 = vmul.f32 %v5330_v55, %v5489_v60 }
 0x6d8   :  { %v1486_v10 = vpop.permute.xlu0 %1485  ;;  %v5447_v38 = vpop.permute.xlu1 %1125 }
 0x6d9   :  { %v1497_v22 = vadd.f32 %v1486_v10, %v1471_v20 }
 0x6da   :  { %1733 = vrot.lane.b32.xlu0 %v1725_v27, %s4021_s29  ;;  %1539 = vrot.lane.b32.xlu1 %v1530_v7, %s4020_s26  ;;  %v1447_v27 = vadd.f32 %v5419_v30, %v5403_v32  ;;  %v5505_v32 = vstv %s3736_s30  ;;  %s3787_s30 = sld [smem:[#allocation7 + $0x59]] }
 0x6dc   :  { %v1490_v2 = vpop.permute.xlu0 %1489  ;;  %v1148_v31 = vpop.permute.xlu1 %1147 }
 0x6de   :  { %1737 = vrot.lane.b32.xlu0 %v1727_v21, %s4021_s29  ;;  %1543 = vrot.lane.b32.xlu1 %v1532_v11, %s4020_s26  ;;  %v1793_v11 = vmul.f32 %v5477_v56, %v5469_v23 }
 0x6e0   :  { %v1512_v4 = vpop.permute.xlu0 %1511  ;;  %v1152_v13 = vpop.permute.xlu1 %1151 }
 0x6e2   :  { %1773 = vrot.lane.b32.xlu0 %v1765_v45, %s4016_s18  ;;  %1565 = vrot.lane.b32.xlu1 %v1556_v3, %s4021_s29  ;;  %v5501_v45 = vstv %s3726_s27  ;;  %v1473_v3 = vadd.f32 %v1464_v62, %v1447_v27  ;;  %v1817_v62 = vmul.f32 %v5505_v32, %v5459_v41  ;;  %s3786_s27 = sld [smem:[#allocation7 + $0x58]] }
 0x6e3   :  { %v1585_v63 = vmul.f32 %v5501_v45, %v5328_v61  ;;  %v1587_v27 = vmul.f32 %v5501_v45, %v5338_v39 }
 0x6e4   :  { %v1516_v28 = vpop.permute.xlu0 %1515  ;;  %v1174_v58 = vpop.permute.xlu1 %1173  ;;  %v1499_v30 = vadd.f32 %v1490_v2, %v1473_v3 }
 0x6e6   :  { %1777 = vrot.lane.b32.xlu0 %v1767_v9, %s4016_s18  ;;  %1569 = vrot.lane.b32.xlu1 %v1558_v25, %s4021_s29  ;;  %v1132_v9 = vadd.f32 %v1122_v36, %v1106_v35  ;;  %v1523_v25 = vadd.f32 %v1512_v4, %v1497_v22  ;;  %v1622_v36 = vmul.f32 %v5346_v16, %v5479_v59 }
 0x6e7   :  { %v1134_v4 = vadd.f32 %v5447_v38, %v1108_v43  ;;  %v1819_v38 = vmul.f32 %v5505_v32, %v5469_v23 }
 0x6e8   :  { %v1538_v57 = vpop.permute.xlu0 %1537  ;;  %v1178_v46 = vpop.permute.xlu1 %1177  ;;  %v1158_v15 = vadd.f32 %v1148_v31, %v1132_v9  ;;  %v1248_v9 = vmul.f32 %v5262_v44, %v5249_v47 }
 0x6e9   :  { %v1549_v10 = vadd.f32 %v1538_v57, %v1523_v25  ;;  %v1160_v12 = vadd.f32 %v1152_v13, %v1134_v4  ;;  %v1246_v13 = vmul.f32 %v5262_v44, %v5236_v5  ;;  %v1648_v5 = vmul.f32 %v5370_v17, %v5479_v59 }
 0x6ea   :  { %1799 = vrot.lane.b32.xlu0 %v1791_v42, %s4017_s20  ;;  %1605 = vrot.lane.b32.xlu1 %v1596_v1, %s4016_s18  ;;  %v1525_v1 = vadd.f32 %v1516_v28, %v1499_v30  ;;  %v1184_v20 = vadd.f32 %v1174_v58, %v1158_v15  ;;  %v1624_v28 = vmul.f32 %v5346_v16, %v5489_v60  ;;  %v5529_v58 = vstv %s5503_s5  ;;  %s3788_s5 = sld [smem:[#allocation7 + $0x5a]] }
 0x6eb   :  { %v1186_v22 = vadd.f32 %v1178_v46, %v1160_v12  ;;  %v1843_v46 = vmul.f32 %v5529_v58, %v5459_v41 }
 0x6ec   :  { %v1542_v7 = vpop.permute.xlu0 %1541  ;;  %v1200_v21 = vpop.permute.xlu1 %1199 }
 0x6ed   :  { %v1551_v2 = vadd.f32 %v1542_v7, %v1525_v1  ;;  %v1210_v61 = vadd.f32 %v1200_v21, %v1184_v20  ;;  %v1676_v1 = vmul.f32 %v5397_v53, %v5489_v60  ;;  %v5575_v20 = vstv %s3739_s0  ;;  %s3791_s0 = sld [smem:[#allocation7 + $0x5d]] }
 0x6ee   :  { %1803 = vrot.lane.b32.xlu0 %v1793_v11, %s4017_s20  ;;  %1609 = vrot.lane.b32.xlu1 %v1598_v0, %s4016_s18 }
 0x6f0   :  { %v1564_v55 = vpop.permute.xlu0 %1563  ;;  %v1204_v42 = vpop.permute.xlu1 %1203 }
 0x6f1   :  { %v1575_v50 = vadd.f32 %v1564_v55, %v1549_v10  ;;  %v1212_v39 = vadd.f32 %v1204_v42, %v1186_v22  ;;  %v1845_v10 = vmul.f32 %v5529_v58, %v5469_v23  ;;  %v1650_v55 = vmul.f32 %v5370_v17, %v5489_v60 }
 0x6f2   :  { %1825 = vrot.lane.b32.xlu0 %v1817_v62, %s4018_s22  ;;  %1631 = vrot.lane.b32.xlu1 %v1622_v36, %s4017_s20  ;;  %v1674_v62 = vmul.f32 %v5397_v53, %v5479_v59 }
 0x6f3   :  { %v5520_v31 = vadd.f32 %v1585_v63, %v1575_v50  ;;  %v5557_v63 = vstv %s3738_s6  ;;  %s3790_s6 = sld [smem:[#allocation7 + $0x5c]] }
 0x6f4   :  { %v1568_v57 = vpop.permute.xlu0 %1567  ;;  %v1226_v35 = vpop.permute.xlu1 %1225  ;;  %v1869_v42 = vmul.f32 %v5557_v63, %v5459_v41  ;;  %v1871_v4 = vmul.f32 %v5557_v63, %v5469_v23 }
 0x6f5   :  { %v1577_v11 = vadd.f32 %v1568_v57, %v1551_v2  ;;  %v1236_v7 = vadd.f32 %v1226_v35, %v1210_v61  ;;  %v1895_v2 = vmul.f32 %v5575_v20, %v5459_v41  ;;  %v1700_v61 = vmul.f32 %v5427_v8, %v5479_v59 }
 0x6f6   :  { %1829 = vrot.lane.b32.xlu0 %v1819_v38, %s4018_s22  ;;  %1635 = vrot.lane.b32.xlu1 %v1624_v28, %s4017_s20  ;;  %v1702_v35 = vmul.f32 %v5427_v8, %v5489_v60  ;;  %v5593_v38 = vld [vmem:[#allocation2 + $0x6] sm:$0xff]  ;;  %v5595_v28 = vstv %s3741_s7  ;;  %s3740_s7 = sld [smem:[#allocation7 + $0x2a]] }
 0x6f7   :  { %v5535_v21 = vadd.f32 %v1587_v27, %v1577_v11  ;;  %v5537_v0 = vadd.f32 %v1246_v13, %v1236_v7  ;;  %v1897_v27 = vmul.f32 %v5575_v20, %v5469_v23  ;;  %v1935_v13 = vmul.f32 %v5595_v28, %v5593_v38 }
 0x6f8   :  { %v5539_v3 = vpop.permute.xlu0 %2793  ;;  %v1230_v16 = vpop.permute.xlu1 %1229  ;;  %v1726_v7 = vmul.f32 %v5443_v24, %v5479_v59 }
 0x6f9   :  { %v1238_v25 = vadd.f32 %v1230_v16, %v1212_v39  ;;  %v5605_v39 = vld [vmem:[#allocation2 + $0x36] sm:$0xff] }
 0x6fa   :  { %1851 = vrot.lane.b32.xlu0 %v1843_v46, %s4019_s24  ;;  %1657 = vrot.lane.b32.xlu1 %v1648_v5, %s4018_s22  ;;  %v1937_v46 = vmul.f32 %v5595_v28, %v5605_v39  ;;  %v1728_v5 = vmul.f32 %v5443_v24, %v5489_v60 }
 0x6fb   :  { %v5549_v43 = vadd.f32 %v1248_v9, %v1238_v25  ;;  %v5615_v9 = vstv %s3742_s1  ;;  %v5617_v25 = vld [vmem:[#allocation2 + $0xd] sm:$0xff]  ;;  %s3792_s1 = sld [smem:[#allocation7 + $0x5e]] }
 0x6fc   :  { %v5551_v30 = vpop.permute.xlu0 %2797  ;;  %v1266_v15 = vpop.permute.xlu1 %1265 }
 0x6fd   :  { %v1276_v24 = vadd.f32 %v1266_v15, %v5537_v0 }
 0x6fe   :  { %1855 = vrot.lane.b32.xlu0 %v1845_v10, %s4019_s24  ;;  %1661 = vrot.lane.b32.xlu1 %v1650_v55, %s4018_s22 }
 0x700   :  { %v5561_v47 = vpop.permute.xlu0 %2819  ;;  %v1270_v44 = vpop.permute.xlu1 %1269 }
 0x702   :  { %1877 = vrot.lane.b32.xlu0 %v1869_v42, %s4020_s26  ;;  %1683 = vrot.lane.b32.xlu1 %v1674_v62, %s4019_s24  ;;  %v1961_v42 = vmul.f32 %v5615_v9, %v5593_v38  ;;  %v1766_v62 = vmul.f32 %v5461_v33, %v5617_v25 }
 0x704   :  { %v5569_v17 = vpop.permute.xlu0 %2823  ;;  %v1292_v36 = vpop.permute.xlu1 %1291 }
 0x706   :  { %1881 = vrot.lane.b32.xlu0 %v1871_v4, %s4020_s26  ;;  %1687 = vrot.lane.b32.xlu1 %v1676_v1, %s4019_s24  ;;  %v5627_v4 = vld [vmem:[#allocation2 + $0x3d] sm:$0xff] }
 0x708   :  { %v5579_v50 = vpop.permute.xlu0 %2845  ;;  %v1296_v12 = vpop.permute.xlu1 %1295 }
 0x70a   :  { %1903 = vrot.lane.b32.xlu0 %v1895_v2, %s4021_s29  ;;  %1709 = vrot.lane.b32.xlu1 %v1700_v61, %s4020_s26  ;;  %v1963_v61 = vmul.f32 %v5615_v9, %v5605_v39 }
 0x70c   :  { %v5587_v53 = vpop.permute.xlu0 %2849  ;;  %v1318_v57 = vpop.permute.xlu1 %1317 }
 0x70d   :  { %6575 = vst [vmem:[#allocation113_spill] sm:$0xff] %v5587_v53  ;;  %v5741_v53 = vstv %s3784_s21 }
 0x70e   :  { %1907 = vrot.lane.b32.xlu0 %v1897_v27, %s4021_s29  ;;  %1713 = vrot.lane.b32.xlu1 %v1702_v35, %s4020_s26  ;;  %v1768_v27 = vmul.f32 %v5461_v33, %v5627_v4  ;;  %v1302_v35 = vadd.f32 %v1292_v36, %v1276_v24  ;;  %v1792_v33 = vmul.f32 %v5477_v56, %v5617_v25 }
 0x710   :  { %v5599_v22 = vpop.permute.xlu0 %2871  ;;  %v1322_v11 = vpop.permute.xlu1 %1321  ;;  %v1328_v0 = vadd.f32 %v1318_v57, %v1302_v35  ;;  %v1794_v57 = vmul.f32 %v5477_v56, %v5627_v4  ;;  %v5659_v35 = vstv %s3744_s15  ;;  %s3794_s15 = sld [smem:[#allocation7 + $0x60]] }
 0x711   :  { %6576 = vst [vmem:[#allocation114_spill] sm:$0xff] %v5599_v22  ;;  %v2013_v56 = vmul.f32 %v5659_v35, %v5593_v38  ;;  %v5743_v22 = vld [vmem:[#allocation2 + $0x3e] sm:$0xff] }
 0x712   :  { %1943 = vrot.lane.b32.xlu0 %v1935_v13, %s4016_s18  ;;  %1735 = vrot.lane.b32.xlu1 %v1726_v7, %s4021_s29  ;;  %v5638_v13 = vstv %s3743_s8  ;;  %v1278_v7 = vadd.f32 %v1270_v44, %v5549_v43  ;;  %s3793_s8 = sld [smem:[#allocation7 + $0x5f]] }
 0x713   :  { %v1989_v44 = vmul.f32 %v5638_v13, %v5605_v39 }
 0x714   :  { %v5609_v8 = vpop.permute.xlu0 %2875  ;;  %v1344_v16 = vpop.permute.xlu1 %1343  ;;  %v1304_v36 = vadd.f32 %v1296_v12, %v1278_v7  ;;  %v1416_v12 = vmul.f32 %v5368_v49, %v5348_v6  ;;  %v1418_v6 = vmul.f32 %v5368_v49, %v5359_v14 }
 0x715   :  { %6577 = vst [vmem:[#allocation115_spill] sm:$0xff] %v5609_v8  ;;  %v5732_v8 = vld [vmem:[#allocation2 + $0xe] sm:$0xff] }
 0x716   :  { %1947 = vrot.lane.b32.xlu0 %v1937_v46, %s4016_s18  ;;  %1739 = vrot.lane.b32.xlu1 %v1728_v5, %s4021_s29  ;;  %v1987_v5 = vmul.f32 %v5638_v13, %v5593_v38 }
 0x718   :  { %v5621_v10 = vpop.permute.xlu0 %2897  ;;  %v1348_v55 = vpop.permute.xlu1 %1347 }
 0x719   :  { %6578 = vst [vmem:[#allocation116_spill] sm:$0xff] %v5621_v10 }
 0x71a   :  { %1969 = vrot.lane.b32.xlu0 %v1961_v42, %s4017_s20  ;;  %1775 = vrot.lane.b32.xlu1 %v1766_v62, %s4016_s18  ;;  %v1354_v42 = vadd.f32 %v1344_v16, %v1328_v0  ;;  %v1330_v62 = vadd.f32 %v1322_v11, %v1304_v36 }
 0x71c   :  { %v5632_v1 = vpop.permute.xlu0 %2901  ;;  %v1370_v2 = vpop.permute.xlu1 %1369 }
 0x71d   :  { %6579 = vst [vmem:[#allocation117_spill] sm:$0xff] %v5632_v1  ;;  %v1380_v24 = vadd.f32 %v1370_v2, %v1354_v42  ;;  %v2015_v42 = vmul.f32 %v5659_v35, %v5605_v39 }
 0x71e   :  { %1973 = vrot.lane.b32.xlu0 %v1963_v61, %s4017_s20  ;;  %1779 = vrot.lane.b32.xlu1 %v1768_v27, %s4016_s18  ;;  %v1356_v27 = vadd.f32 %v1348_v55, %v1330_v62  ;;  %v1818_v55 = vmul.f32 %v5505_v32, %v5617_v25  ;;  %v1820_v62 = vmul.f32 %v5505_v32, %v5627_v4 }
 0x720   :  { %v5643_v15 = vpop.permute.xlu0 %2923  ;;  %v1374_v46 = vpop.permute.xlu1 %1373 }
 0x721   :  { %6580 = vst [vmem:[#allocation118_spill] sm:$0xff] %v5643_v15  ;;  %v1382_v11 = vadd.f32 %v1374_v46, %v1356_v27  ;;  %v5730_v15 = vld [vmem:[#allocation2 + $0x4d] sm:$0xff] }
 0x722   :  { %1995 = vrot.lane.b32.xlu0 %v1987_v5, %s4018_s22  ;;  %1801 = vrot.lane.b32.xlu1 %v1792_v33, %s4017_s20 }
 0x724   :  { %v5651_v61 = vpop.permute.xlu0 %1603  ;;  %v1396_v43 = vpop.permute.xlu1 %1395 }
 0x725   :  { %v1406_v16 = vadd.f32 %v1396_v43, %v1380_v24  ;;  %v5681_v24 = vstv %s3745_s16  ;;  %s3795_s16 = sld [smem:[#allocation7 + $0x61]] }
 0x726   :  { %1999 = vrot.lane.b32.xlu0 %v1989_v44, %s4018_s22  ;;  %1805 = vrot.lane.b32.xlu1 %v1794_v57, %s4017_s20  ;;  %v2039_v43 = vmul.f32 %v5681_v24, %v5593_v38  ;;  %v1844_v44 = vmul.f32 %v5529_v58, %v5617_v25  ;;  %v2041_v27 = vmul.f32 %v5681_v24, %v5605_v39 }
 0x727   :  { %v5663_v2 = vadd.f32 %v1416_v12, %v1406_v16  ;;  %v1846_v12 = vmul.f32 %v5529_v58, %v5627_v4  ;;  %v5697_v16 = vstv %s3746_s17  ;;  %s3747_s17 = sld [smem:[#allocation7 + $0x31]] }
 0x728   :  { %v1608_v7 = vpop.permute.xlu0 %1607  ;;  %v1400_v0 = vpop.permute.xlu1 %1399 }
 0x729   :  { %v1408_v5 = vadd.f32 %v1400_v0, %v1382_v11 }
 0x72a   :  { %2021 = vrot.lane.b32.xlu0 %v2013_v56, %s4019_s24  ;;  %1827 = vrot.lane.b32.xlu1 %v1818_v55, %s4018_s22  ;;  %v2065_v56 = vmul.f32 %v5697_v16, %v5593_v38  ;;  %v1870_v55 = vmul.f32 %v5557_v63, %v5617_v25 }
 0x72b   :  { %v5673_v33 = vadd.f32 %v1418_v6, %v1408_v5  ;;  %v2067_v5 = vmul.f32 %v5697_v16, %v5605_v39 }
 0x72c   :  { %v1630_v46 = vpop.permute.xlu0 %1629  ;;  %v5675_v36 = vpop.permute.xlu1 %1435 }
 0x72e   :  { %2025 = vrot.lane.b32.xlu0 %v2015_v42, %s4019_s24  ;;  %1831 = vrot.lane.b32.xlu1 %v1820_v62, %s4018_s22  ;;  %v1872_v42 = vmul.f32 %v5557_v63, %v5627_v4  ;;  %v1615_v63 = vadd.f32 %v5651_v61, %v5520_v31 }
 0x730   :  { %v1634_v14 = vpop.permute.xlu0 %1633  ;;  %v5685_v49 = vpop.permute.xlu1 %1439  ;;  %v1641_v1 = vadd.f32 %v1630_v46, %v1615_v63 }
 0x732   :  { %2047 = vrot.lane.b32.xlu0 %v2039_v43, %s4020_s26  ;;  %1853 = vrot.lane.b32.xlu1 %v1844_v44, %s4019_s24  ;;  %v1896_v44 = vmul.f32 %v5575_v20, %v5617_v25 }
 0x734   :  { %v1656_v32 = vpop.permute.xlu0 %1655  ;;  %v1462_v57 = vpop.permute.xlu1 %1461 }
 0x735   :  { %v1667_v31 = vadd.f32 %v1656_v32, %v1641_v1  ;;  %v1446_v1 = vadd.f32 %v5675_v36, %v5663_v2  ;;  %v1448_v2 = vadd.f32 %v5685_v49, %v5673_v33 }
 0x736   :  { %2051 = vrot.lane.b32.xlu0 %v2041_v27, %s4020_s26  ;;  %1857 = vrot.lane.b32.xlu1 %v1846_v12, %s4019_s24  ;;  %v5717_v27 = vld [vmem:[#allocation2 + $0x1d] sm:$0xff]  ;;  %v5719_v12 = vstv %s3783_s19  ;;  %s3754_s19 = sld [smem:[#allocation7 + $0x38]] }
 0x737   :  { %v2957_v10 = vmul.f32 %v5719_v12, %v5730_v15 }
 0x738   :  { %v1660_v11 = vpop.permute.xlu0 %1659  ;;  %v5701_v0 = vpop.permute.xlu1 %1465 }
 0x73a   :  { %2073 = vrot.lane.b32.xlu0 %v2065_v56, %s4021_s29  ;;  %1879 = vrot.lane.b32.xlu1 %v1870_v55, %s4020_s26 }
 0x73c   :  { %v1682_v58 = vpop.permute.xlu0 %1681  ;;  %v1488_v6 = vpop.permute.xlu1 %1487 }
 0x73d   :  { %v1693_v63 = vadd.f32 %v1682_v58, %v1667_v31  ;;  %v1938_v58 = vmul.f32 %v5595_v28, %v5743_v22 }
 0x73e   :  { %2077 = vrot.lane.b32.xlu0 %v2067_v5, %s4021_s29  ;;  %1883 = vrot.lane.b32.xlu1 %v1872_v42, %s4020_s26  ;;  %v2955_v5 = vmul.f32 %v5719_v12, %v5717_v27  ;;  %v1898_v42 = vmul.f32 %v5575_v20, %v5627_v4  ;;  %v1936_v20 = vmul.f32 %v5595_v28, %v5732_v8 }
 0x73f   :  { %v2983_v28 = vmul.f32 %v5741_v53, %v5730_v15 }
 0x740   :  { %v1686_v62 = vpop.permute.xlu0 %1685  ;;  %v1492_v43 = vpop.permute.xlu1 %1491 }
 0x742   :  { %2927 = vrot.lane.b32.xlu0 %v4408_v48, %s4021_s29  ;;  %1905 = vrot.lane.b32.xlu1 %v1896_v44, %s4021_s29  ;;  %v1617_v48 = vadd.f32 %v1608_v7, %v5535_v21  ;;  %v5747_v21 = vstv %s3733_s23 }
 0x743   :  { %v1757_v33 = vmul.f32 %v5747_v21, %v5469_v23  ;;  %v1586_v23 = vmul.f32 %v5501_v45, %v5479_v59  ;;  %v1588_v59 = vmul.f32 %v5501_v45, %v5489_v60 }
 0x744   :  { %v1708_v56 = vpop.permute.xlu0 %1707  ;;  %v1514_v55 = vpop.permute.xlu1 %1513  ;;  %v1643_v46 = vadd.f32 %v1634_v14, %v1617_v48  ;;  %v2981_v14 = vmul.f32 %v5741_v53, %v5717_v27  ;;  %v1472_v48 = vadd.f32 %v1462_v57, %v1446_v1  ;;  %v1962_v57 = vmul.f32 %v5615_v9, %v5732_v8 }
 0x745   :  { %v1719_v32 = vadd.f32 %v1708_v56, %v1693_v63 }
 0x746   :  { %2963 = vrot.lane.b32.xlu0 %v2955_v5, %s4016_s18  ;;  %1909 = vrot.lane.b32.xlu1 %v1898_v42, %s4021_s29  ;;  %v1669_v7 = vadd.f32 %v1660_v11, %v1643_v46  ;;  %v1498_v36 = vadd.f32 %v1488_v6, %v1472_v48 }
 0x748   :  { %v1712_v61 = vpop.permute.xlu0 %1711  ;;  %v1518_v44 = vpop.permute.xlu1 %1517  ;;  %v1695_v31 = vadd.f32 %v1686_v62, %v1669_v7  ;;  %v1474_v62 = vadd.f32 %v5701_v0, %v1448_v2  ;;  %v1524_v1 = vadd.f32 %v1514_v55, %v1498_v36  ;;  %v1964_v55 = vmul.f32 %v5615_v9, %v5743_v22 }
 0x749   :  { %v1988_v9 = vmul.f32 %v5638_v13, %v5732_v8 }
 0x74a   :  { %2967 = vrot.lane.b32.xlu0 %v2957_v10, %s4016_s18  ;;  %1945 = vrot.lane.b32.xlu1 %v1936_v20, %s4016_s18  ;;  %v1755_v20 = vmul.f32 %v5747_v21, %v5459_v41  ;;  %v1721_v11 = vadd.f32 %v1712_v61, %v1695_v31  ;;  %v5767_v41 = vstv %s3785_s25  ;;  %v1500_v49 = vadd.f32 %v1492_v43, %v1474_v62 }
 0x74b   :  { %v3007_v0 = vmul.f32 %v5767_v41, %v5717_v27  ;;  %v5816_v62 = vstv %s3787_s30 }
 0x74c   :  { %v1734_v5 = vpop.permute.xlu0 %1733  ;;  %v1540_v42 = vpop.permute.xlu1 %1539 }
 0x74d   :  { %v1745_v10 = vadd.f32 %v1734_v5, %v1719_v32  ;;  %v1550_v6 = vadd.f32 %v1540_v42, %v1524_v1 }
 0x74e   :  { %2989 = vrot.lane.b32.xlu0 %v2981_v14, %s4017_s20  ;;  %1949 = vrot.lane.b32.xlu1 %v1938_v58, %s4016_s18  ;;  %v1526_v14 = vadd.f32 %v1518_v44, %v1500_v49 }
 0x74f   :  { %v5761_v56 = vadd.f32 %v1755_v20, %v1745_v10  ;;  %v3009_v10 = vmul.f32 %v5767_v41, %v5730_v15  ;;  %v5796_v20 = vstv %s3786_s27 }
 0x750   :  { %v1738_v46 = vpop.permute.xlu0 %1737  ;;  %v1544_v63 = vpop.permute.xlu1 %1543 }
 0x751   :  { %v1747_v7 = vadd.f32 %v1738_v46, %v1721_v11  ;;  %v1552_v43 = vadd.f32 %v1544_v63, %v1526_v14  ;;  %v3033_v46 = vmul.f32 %v5796_v20, %v5717_v27  ;;  %v1990_v63 = vmul.f32 %v5638_v13, %v5743_v22 }
 0x752   :  { %2993 = vrot.lane.b32.xlu0 %v2983_v28, %s4017_s20  ;;  %1971 = vrot.lane.b32.xlu1 %v1962_v57, %s4017_s20  ;;  %v3035_v28 = vmul.f32 %v5796_v20, %v5730_v15  ;;  %v2014_v57 = vmul.f32 %v5659_v35, %v5732_v8 }
 0x753   :  { %v5774_v61 = vadd.f32 %v1757_v33, %v1747_v7  ;;  %v3059_v7 = vmul.f32 %v5816_v62, %v5717_v27  ;;  %v2016_v33 = vmul.f32 %v5659_v35, %v5743_v22 }
 0x754   :  { %v5776_v32 = vpop.permute.xlu0 %1773  ;;  %v1566_v5 = vpop.permute.xlu1 %1565 }
 0x755   :  { %v1576_v58 = vadd.f32 %v1566_v5, %v1550_v6  ;;  %v3061_v5 = vmul.f32 %v5816_v62, %v5730_v15 }
 0x756   :  { %3015 = vrot.lane.b32.xlu0 %v3007_v0, %s4018_s22  ;;  %1975 = vrot.lane.b32.xlu1 %v1964_v55, %s4017_s20  ;;  %v2040_v0 = vmul.f32 %v5681_v24, %v5732_v8  ;;  %v5832_v55 = vstv %s3788_s5 }
 0x757   :  { %v5786_v42 = vadd.f32 %v1586_v23, %v1576_v58  ;;  %v3085_v23 = vmul.f32 %v5832_v55, %v5717_v27  ;;  %v2042_v58 = vmul.f32 %v5681_v24, %v5743_v22  ;;  %v1785_v24 = vadd.f32 %v5776_v32, %v5761_v56 }
 0x758   :  { %v5788_v48 = vpop.permute.xlu0 %1777  ;;  %v1570_v31 = vpop.permute.xlu1 %1569 }
 0x759   :  { %v1578_v44 = vadd.f32 %v1570_v31, %v1552_v43 }
 0x75a   :  { %3019 = vrot.lane.b32.xlu0 %v3009_v10, %s4018_s22  ;;  %1997 = vrot.lane.b32.xlu1 %v1988_v9, %s4018_s22  ;;  %v3087_v10 = vmul.f32 %v5832_v55, %v5730_v15  ;;  %v2066_v9 = vmul.f32 %v5697_v16, %v5732_v8 }
 0x75b   :  { %v5800_v2 = vadd.f32 %v1588_v59, %v1578_v44  ;;  %v5846_v59 = vld [vmem:[#allocation2 + $0x1e] sm:$0xff]  ;;  %v5848_v44 = vstv %s3790_s6 }
 0x75c   :  { %v1800_v36 = vpop.permute.xlu0 %1799  ;;  %v5802_v11 = vpop.permute.xlu1 %1605 }
 0x75e   :  { %3041 = vrot.lane.b32.xlu0 %v3033_v46, %s4019_s24  ;;  %2001 = vrot.lane.b32.xlu1 %v1990_v63, %s4018_s22 }
 0x760   :  { %v1804_v60 = vpop.permute.xlu0 %1803  ;;  %v5810_v45 = vpop.permute.xlu1 %1609 }
 0x762   :  { %3045 = vrot.lane.b32.xlu0 %v3035_v28, %s4019_s24  ;;  %2023 = vrot.lane.b32.xlu1 %v2014_v57, %s4019_s24  ;;  %v3125_v28 = vmul.f32 %v5848_v44, %v5846_v59  ;;  %v2068_v57 = vmul.f32 %v5697_v16, %v5743_v22  ;;  %v5866_v16 = vstv %s3791_s0 }
 0x764   :  { %v1826_v13 = vpop.permute.xlu0 %1825  ;;  %v1632_v1 = vpop.permute.xlu1 %1631 }
 0x766   :  { %3067 = vrot.lane.b32.xlu0 %v3059_v7, %s4020_s26  ;;  %2027 = vrot.lane.b32.xlu1 %v2016_v33, %s4019_s24  ;;  %v1811_v7 = vadd.f32 %v1800_v36, %v1785_v24  ;;  %v5858_v33 = vld [vmem:[#allocation2 + $0x4e] sm:$0xff]  ;;  %v5868_v36 = vld [vmem:[#allocation2 + $0x25] sm:$0xff] }
 0x768   :  { %v1830_v49 = vpop.permute.xlu0 %1829  ;;  %v5826_v6 = vpop.permute.xlu1 %1635 }
 0x76a   :  { %3071 = vrot.lane.b32.xlu0 %v3061_v5, %s4020_s26  ;;  %2049 = vrot.lane.b32.xlu1 %v2040_v0, %s4020_s26  ;;  %v1787_v5 = vadd.f32 %v5788_v48, %v5774_v61  ;;  %v1837_v0 = vadd.f32 %v1826_v13, %v1811_v7  ;;  %v1616_v61 = vadd.f32 %v5802_v11, %v5786_v42 }
 0x76b   :  { %v1618_v42 = vadd.f32 %v5810_v45, %v5800_v2 }
 0x76c   :  { %v1852_v35 = vpop.permute.xlu0 %1851  ;;  %v1658_v14 = vpop.permute.xlu1 %1657 }
 0x76e   :  { %3093 = vrot.lane.b32.xlu0 %v3085_v23, %s4021_s29  ;;  %2053 = vrot.lane.b32.xlu1 %v2042_v58, %s4020_s26  ;;  %v3127_v23 = vmul.f32 %v5848_v44, %v5858_v33  ;;  %v1813_v58 = vadd.f32 %v1804_v60, %v1787_v5  ;;  %v3151_v60 = vmul.f32 %v5866_v16, %v5846_v59 }
 0x770   :  { %v1856_v43 = vpop.permute.xlu0 %1855  ;;  %v1662_v31 = vpop.permute.xlu1 %1661  ;;  %v1839_v48 = vadd.f32 %v1830_v49, %v1813_v58 }
 0x772   :  { %3097 = vrot.lane.b32.xlu0 %v3087_v10, %s4021_s29  ;;  %2075 = vrot.lane.b32.xlu1 %v2066_v9, %s4021_s29  ;;  %v1863_v10 = vadd.f32 %v1852_v35, %v1837_v0  ;;  %v5873_v9 = vstv %s3740_s7  ;;  %v2956_v35 = vmul.f32 %v5719_v12, %v5868_v36  ;;  %v1865_v7 = vadd.f32 %v1856_v43, %v1839_v48  ;;  %v5881_v0 = vld [vmem:[#allocation2 + $0x55] sm:$0xff] }
 0x773   :  { %v3153_v43 = vmul.f32 %v5866_v16, %v5858_v33  ;;  %v2958_v58 = vmul.f32 %v5719_v12, %v5881_v0  ;;  %v1927_v2 = vmul.f32 %v5873_v9, %v5605_v39  ;;  %v1756_v39 = vmul.f32 %v5747_v21, %v5617_v25 }
 0x774   :  { %v1878_v46 = vpop.permute.xlu0 %1877  ;;  %v1684_v63 = vpop.permute.xlu1 %1683  ;;  %v1758_v25 = vmul.f32 %v5747_v21, %v5627_v4 }
 0x775   :  { %v1889_v13 = vadd.f32 %v1878_v46, %v1863_v10  ;;  %v1644_v10 = vadd.f32 %v5826_v6, %v1618_v42  ;;  %v2982_v6 = vmul.f32 %v5741_v53, %v5868_v36 }
 0x776   :  { %3133 = vrot.lane.b32.xlu0 %v3125_v28, %s4016_s18  ;;  %2079 = vrot.lane.b32.xlu1 %v2068_v57, %s4021_s29  ;;  %v1642_v57 = vadd.f32 %v1632_v1, %v1616_v61 }
 0x777   :  { %v1670_v45 = vadd.f32 %v1662_v31, %v1644_v10 }
 0x778   :  { %v1882_v56 = vpop.permute.xlu0 %1881  ;;  %v1688_v32 = vpop.permute.xlu1 %1687  ;;  %v1668_v11 = vadd.f32 %v1658_v14, %v1642_v57 }
 0x779   :  { %v1891_v49 = vadd.f32 %v1882_v56, %v1865_v7 }
 0x77a   :  { %3137 = vrot.lane.b32.xlu0 %v3127_v23, %s4016_s18  ;;  %2929 = vrot.lane.b32.xlu1 %v4423_v54, %s4021_s29  ;;  %v1925_v54 = vmul.f32 %v5873_v9, %v5593_v38  ;;  %v5895_v38 = vstv %s3792_s1  ;;  %v1694_v61 = vadd.f32 %v1684_v63, %v1668_v11  ;;  %v1696_v63 = vadd.f32 %v1688_v32, %v1670_v45 }
 0x77b   :  { %v3179_v7 = vmul.f32 %v5895_v38, %v5858_v33 }
 0x77c   :  { %v1904_v24 = vpop.permute.xlu0 %1903  ;;  %v1710_v28 = vpop.permute.xlu1 %1709 }
 0x77d   :  { %v1915_v5 = vadd.f32 %v1904_v24, %v1889_v13  ;;  %v1720_v14 = vadd.f32 %v1710_v28, %v1694_v61  ;;  %v3177_v24 = vmul.f32 %v5895_v38, %v5846_v59 }
 0x77e   :  { %3159 = vrot.lane.b32.xlu0 %v3151_v60, %s4017_s20  ;;  %2965 = vrot.lane.b32.xlu1 %v2956_v35, %s4016_s18 }
 0x77f   :  { %v5889_v46 = vadd.f32 %v1925_v54, %v1915_v5  ;;  %v2984_v5 = vmul.f32 %v5741_v53, %v5881_v0  ;;  %v5918_v54 = vstv %s3793_s8  ;;  %v3008_v53 = vmul.f32 %v5767_v41, %v5868_v36 }
 0x780   :  { %v1908_v23 = vpop.permute.xlu0 %1907  ;;  %v1714_v1 = vpop.permute.xlu1 %1713 }
 0x781   :  { %v1917_v48 = vadd.f32 %v1908_v23, %v1891_v49  ;;  %v1722_v31 = vadd.f32 %v1714_v1, %v1696_v63  ;;  %v3203_v23 = vmul.f32 %v5918_v54, %v5846_v59  ;;  %v3205_v1 = vmul.f32 %v5918_v54, %v5858_v33 }
 0x782   :  { %3163 = vrot.lane.b32.xlu0 %v3153_v43, %s4017_s20  ;;  %2969 = vrot.lane.b32.xlu1 %v2958_v58, %s4016_s18  ;;  %v3010_v43 = vmul.f32 %v5767_v41, %v5881_v0  ;;  %v5936_v58 = vstv %s3794_s15 }
 0x783   :  { %v5902_v56 = vadd.f32 %v1927_v2, %v1917_v48  ;;  %v3229_v48 = vmul.f32 %v5936_v58, %v5846_v59  ;;  %v3034_v2 = vmul.f32 %v5796_v20, %v5868_v36 }
 0x784   :  { %v1944_v13 = vpop.permute.xlu0 %1943  ;;  %v1736_v12 = vpop.permute.xlu1 %1735 }
 0x785   :  { %v1746_v60 = vadd.f32 %v1736_v12, %v1720_v14  ;;  %v3231_v14 = vmul.f32 %v5936_v58, %v5858_v33  ;;  %v3036_v12 = vmul.f32 %v5796_v20, %v5881_v0 }
 0x786   :  { %3185 = vrot.lane.b32.xlu0 %v3177_v24, %s4018_s22  ;;  %2991 = vrot.lane.b32.xlu1 %v2982_v6, %s4017_s20  ;;  %v5950_v24 = vstv %s3795_s16 }
 0x787   :  { %v5912_v28 = vadd.f32 %v1756_v39, %v1746_v60  ;;  %v3255_v60 = vmul.f32 %v5950_v24, %v5846_v59  ;;  %v3060_v39 = vmul.f32 %v5816_v62, %v5868_v36 }
 0x788   :  { %v1948_v35 = vpop.permute.xlu0 %1947  ;;  %v1740_v57 = vpop.permute.xlu1 %1739 }
 0x789   :  { %v1748_v32 = vadd.f32 %v1740_v57, %v1722_v31  ;;  %v3257_v57 = vmul.f32 %v5950_v24, %v5858_v33 }
 0x78a   :  { %3189 = vrot.lane.b32.xlu0 %v3179_v7, %s4018_s22  ;;  %2995 = vrot.lane.b32.xlu1 %v2984_v5, %s4017_s20  ;;  %v3062_v7 = vmul.f32 %v5816_v62, %v5881_v0  ;;  %v1955_v5 = vadd.f32 %v1944_v13, %v5889_v46  ;;  %v5976_v46 = vstv %s3747_s17 }
 0x78b   :  { %v5924_v42 = vadd.f32 %v1758_v25, %v1748_v32 }
 0x78c   :  { %v1970_v11 = vpop.permute.xlu0 %1969  ;;  %v1776_v49 = vpop.permute.xlu1 %1775 }
 0x78d   :  { %v1786_v13 = vadd.f32 %v1776_v49, %v5912_v28 }
 0x78e   :  { %3211 = vrot.lane.b32.xlu0 %v3203_v23, %s4019_s24  ;;  %3017 = vrot.lane.b32.xlu1 %v3008_v53, %s4018_s22  ;;  %v3086_v23 = vmul.f32 %v5832_v55, %v5868_v36  ;;  %v1981_v53 = vadd.f32 %v1970_v11, %v1955_v5  ;;  %v5982_v5 = vld [vmem:[#allocation2 + $0x56] sm:$0xff] }
 0x790   :  { %v1974_v4 = vpop.permute.xlu0 %1973  ;;  %v1780_v21 = vpop.permute.xlu1 %1779 }
 0x792   :  { %3215 = vrot.lane.b32.xlu0 %v3205_v1, %s4019_s24  ;;  %3021 = vrot.lane.b32.xlu1 %v3010_v43, %s4018_s22  ;;  %v1957_v1 = vadd.f32 %v1948_v35, %v5902_v56 }
 0x794   :  { %v1996_v10 = vpop.permute.xlu0 %1995  ;;  %v1802_v61 = vpop.permute.xlu1 %1801 }
 0x795   :  { %v2007_v43 = vadd.f32 %v1996_v10, %v1981_v53  ;;  %v1812_v10 = vadd.f32 %v1802_v61, %v1786_v13 }
 0x796   :  { %3237 = vrot.lane.b32.xlu0 %v3229_v48, %s4020_s26  ;;  %3043 = vrot.lane.b32.xlu1 %v3034_v2, %s4019_s24  ;;  %v3088_v2 = vmul.f32 %v5832_v55, %v5881_v0  ;;  %v3915_v55 = vld [vmem:[#allocation2 + $0x18] sm:$0xff] }
 0x798   :  { %v2000_v41 = vpop.permute.xlu0 %1999  ;;  %v1806_v45 = vpop.permute.xlu1 %1805 }
 0x79a   :  { %3241 = vrot.lane.b32.xlu0 %v3231_v14, %s4020_s26  ;;  %3047 = vrot.lane.b32.xlu1 %v3036_v12, %s4019_s24  ;;  %v1983_v14 = vadd.f32 %v1974_v4, %v1957_v1  ;;  %v2095_v4 = vmul.f32 %v3915_v55, %v5976_v46 }
 0x79c   :  { %v2022_v6 = vpop.permute.xlu0 %2021  ;;  %v1828_v63 = vpop.permute.xlu1 %1827  ;;  %v2009_v11 = vadd.f32 %v2000_v41, %v1983_v14 }
 0x79d   :  { %v2033_v12 = vadd.f32 %v2022_v6, %v2007_v43  ;;  %v1838_v28 = vadd.f32 %v1828_v63, %v1812_v10  ;;  %v6005_v10 = vstv %s3754_s19 }
 0x79e   :  { %3263 = vrot.lane.b32.xlu0 %v3255_v60, %s4021_s29  ;;  %3069 = vrot.lane.b32.xlu1 %v3060_v39, %s4020_s26  ;;  %v5973_v60 = vld [vmem:[#allocation2 + $0x26] sm:$0xff] }
 0x79f   :  { %v3126_v35 = vmul.f32 %v5848_v44, %v5973_v60 }
 0x7a0   :  { %v2026_v31 = vpop.permute.xlu0 %2025  ;;  %v1832_v20 = vpop.permute.xlu1 %1831 }
 0x7a2   :  { %3267 = vrot.lane.b32.xlu0 %v3257_v57, %s4021_s29  ;;  %3073 = vrot.lane.b32.xlu1 %v3062_v7, %s4020_s26  ;;  %v2035_v7 = vadd.f32 %v2026_v31, %v2009_v11  ;;  %v3128_v31 = vmul.f32 %v5848_v44, %v5982_v5  ;;  %v1926_v44 = vmul.f32 %v5873_v9, %v5732_v8 }
 0x7a4   :  { %v2048_v32 = vpop.permute.xlu0 %2047  ;;  %v1854_v25 = vpop.permute.xlu1 %1853 }
 0x7a5   :  { %v2059_v39 = vadd.f32 %v2048_v32, %v2033_v12  ;;  %v3916_v32 = vld [vmem:[#allocation2 + $0x48] sm:$0xff] }
 0x7a6   :  { %3095 = vrot.lane.b32.xlu1 %v3086_v23, %s4021_s29  ;;  %v1788_v23 = vadd.f32 %v1780_v21, %v5924_v42  ;;  %v2097_v53 = vmul.f32 %v3916_v32, %v5976_v46  ;;  %v6583_v32 = vld [vmem:[#allocation18_spill] sm:$0xff] }
 0x7a8   :  { %v2052_v48 = vpop.permute.xlu0 %2051  ;;  %v1858_v62 = vpop.permute.xlu1 %1857  ;;  %v1814_v43 = vadd.f32 %v1806_v45, %v1788_v23  ;;  %v6581_v23 = vld [vmem:[#allocation15_spill] sm:$0xff] }
 0x7a9   :  { %v2061_v49 = vadd.f32 %v2052_v48, %v2035_v7 }
 0x7aa   :  { %3099 = vrot.lane.b32.xlu1 %v3088_v2, %s4021_s29  ;;  %v1864_v2 = vadd.f32 %v1854_v25, %v1838_v28  ;;  %v1840_v42 = vadd.f32 %v1832_v20, %v1814_v43 }
 0x7ac   :  { %v2074_v57 = vpop.permute.xlu0 %2073  ;;  %v1880_v56 = vpop.permute.xlu1 %1879  ;;  %v1866_v45 = vadd.f32 %v1858_v62, %v1840_v42 }
 0x7ad   :  { %v2085_v6 = vadd.f32 %v2074_v57, %v2059_v39  ;;  %v1890_v63 = vadd.f32 %v1880_v56, %v1864_v2  ;;  %v3152_v39 = vmul.f32 %v5866_v16, %v5973_v60 }
 0x7ae   :  { %3135 = vrot.lane.b32.xlu1 %v3126_v35, %s4016_s18 }
 0x7af   :  { %v2099_v41 = vadd.f32 %v2095_v4, %v2085_v6 }
 0x7b0   :  { %v2078_v1 = vpop.permute.xlu0 %2077  ;;  %v1884_v61 = vpop.permute.xlu1 %1883 }
 0x7b1   :  { %v2125_v14 = vadd.f32 %v4492_v19, %v2099_v41  ;;  %v2087_v12 = vadd.f32 %v2078_v1, %v2061_v49  ;;  %v1892_v56 = vadd.f32 %v1884_v61, %v1866_v45  ;;  %v6584_v61 = vld [vmem:[#allocation17_spill] sm:$0xff] }
 0x7b2   :  { %3139 = vrot.lane.b32.xlu1 %v3128_v31, %s4016_s18  ;;  %s3761_s18 = sld [smem:[#allocation7 + $0x3f]] }
 0x7b3   :  { %v2151_v21 = vadd.f32 %v4509_v26, %v2125_v14  ;;  %v2101_v48 = vadd.f32 %v2097_v53, %v2087_v12  ;;  %v3180_v14 = vmul.f32 %v5895_v38, %v5982_v5  ;;  %v6585_v12 = vld [vmem:[#allocation20_spill] sm:$0xff] }
 0x7b4   :  { %v5992_v13 = vpop.permute.xlu0 %2927  ;;  %v1906_v11 = vpop.permute.xlu1 %1905 }
 0x7b5   :  { %v2177_v19 = vadd.f32 %v4526_v34, %v2151_v21  ;;  %v2127_v25 = vadd.f32 %v4501_v18, %v2101_v48  ;;  %v1916_v57 = vadd.f32 %v1906_v11, %v1890_v63  ;;  %v3154_v34 = vmul.f32 %v5866_v16, %v5982_v5  ;;  %v6586_v63 = vld [vmem:[#allocation24_spill] sm:$0xff]  ;;  %v6587_v11 = vld [vmem:[#allocation19_spill] sm:$0xff] }
 0x7b6   :  { %3161 = vrot.lane.b32.xlu1 %v3152_v39, %s4017_s20 }
 0x7b7   :  { %v2203_v26 = vadd.f32 %v4543_v51, %v2177_v19  ;;  %v2153_v20 = vadd.f32 %v4518_v29, %v2127_v25  ;;  %v6003_v35 = vadd.f32 %v1926_v44, %v1916_v57  ;;  %v1928_v51 = vmul.f32 %v5873_v9, %v5743_v22  ;;  %v3917_v29 = vld [vmem:[#allocation2 + $0x19] sm:$0xff] }
 0x7b8   :  { %v6007_v7 = vpop.permute.xlu0 %2963  ;;  %v1910_v8 = vpop.permute.xlu1 %1909  ;;  %v2265_v4 = vmul.f32 %v3917_v29, %v6005_v10  ;;  %v6582_v22 = vld [vmem:[#allocation16_spill] sm:$0xff]  ;;  %v3204_v19 = vmul.f32 %v5918_v54, %v5973_v60 }
 0x7b9   :  { %v2229_v18 = vadd.f32 %v4564_v52, %v2203_v26  ;;  %v2179_v62 = vadd.f32 %v4535_v40, %v2153_v20  ;;  %v1918_v55 = vadd.f32 %v1910_v8, %v1892_v56  ;;  %v3178_v40 = vmul.f32 %v5895_v38, %v5973_v60  ;;  %v6588_v25 = vld [vmem:[#allocation28_spill] sm:$0xff]  ;;  %v6589_v26 = vld [vmem:[#allocation22_spill] sm:$0xff] }
 0x7ba   :  { %3165 = vrot.lane.b32.xlu1 %v3154_v34, %s4017_s20  ;;  %v6050_v20 = vstv %s3761_s18  ;;  %v6590_v56 = vld [vmem:[#allocation32_spill] sm:$0xff]  ;;  %v6591_v34 = vld [vmem:[#allocation26_spill] sm:$0xff]  ;;  %s3768_s20 = sld [smem:[#allocation7 + $0x46]] }
 0x7bb   :  { %v2255_v6 = vadd.f32 %v4586_v37, %v2229_v18  ;;  %v2205_v28 = vadd.f32 %v6581_v23, %v2179_v62  ;;  %v6019_v49 = vadd.f32 %v1928_v51, %v1918_v55  ;;  %v3918_v37 = vld [vmem:[#allocation2 + $0x49] sm:$0xff]  ;;  %v3206_v51 = vmul.f32 %v5918_v54, %v5982_v5  ;;  %v3919_v29 = vld [vmem:[#allocation2 + $0x1a] sm:$0xff] }
 0x7bc   :  { %v6021_v16 = vpop.permute.xlu0 %2967  ;;  %v6023_v52 = vpop.permute.xlu1 %1945  ;;  %v2267_v1 = vmul.f32 %v3918_v37, %v6005_v10  ;;  %v3230_v37 = vmul.f32 %v5936_v58, %v5973_v60  ;;  %v3920_v54 = vld [vmem:[#allocation2 + $0x4a] sm:$0xff] }
 0x7bd   :  { %v2269_v41 = vadd.f32 %v2265_v4, %v2255_v6  ;;  %v2231_v9 = vadd.f32 %v6582_v22, %v2205_v28  ;;  %v2435_v4 = vmul.f32 %v3919_v29, %v6050_v20  ;;  %v6592_v6 = vld [vmem:[#allocation36_spill] sm:$0xff]  ;;  %v6593_v28 = vld [vmem:[#allocation30_spill] sm:$0xff] }
 0x7be   :  { %3187 = vrot.lane.b32.xlu1 %v3178_v40, %s4018_s22  ;;  %v6594_v22 = vld [vmem:[#allocation34_spill] sm:$0xff] }
 0x7bf   :  { %v2295_v53 = vadd.f32 %v6583_v32, %v2269_v41  ;;  %v2257_v31 = vadd.f32 %v6584_v61, %v2231_v9  ;;  %v6595_v61 = vld [vmem:[#allocation40_spill] sm:$0xff] }
 0x7c0   :  { %v6032_v43 = vpop.permute.xlu0 %2989  ;;  %v6034_v2 = vpop.permute.xlu1 %1949 }
 0x7c1   :  { %v2321_v42 = vadd.f32 %v6585_v12, %v2295_v53  ;;  %v2271_v21 = vadd.f32 %v2267_v1, %v2257_v31  ;;  %v2437_v1 = vmul.f32 %v3920_v54, %v6050_v20 }
 0x7c2   :  { %3191 = vrot.lane.b32.xlu1 %v3180_v14, %s4018_s22  ;;  %v6596_v14 = vld [vmem:[#allocation38_spill] sm:$0xff]  ;;  %s3775_s22 = sld [smem:[#allocation7 + $0x4d]] }
 0x7c3   :  { %v2347_v48 = vadd.f32 %v6586_v63, %v2321_v42  ;;  %v2297_v39 = vadd.f32 %v6587_v11, %v2271_v21  ;;  %v6597_v42 = vld [vmem:[#allocation44_spill] sm:$0xff] }
 0x7c4   :  { %v6042_v44 = vpop.permute.xlu0 %2993  ;;  %v6044_v45 = vpop.permute.xlu1 %1971 }
 0x7c5   :  { %v2373_v57 = vadd.f32 %v6588_v25, %v2347_v48  ;;  %v2323_v38 = vadd.f32 %v6589_v26, %v2297_v39  ;;  %v3232_v39 = vmul.f32 %v5936_v58, %v5982_v5 }
 0x7c6   :  { %3213 = vrot.lane.b32.xlu1 %v3204_v19, %s4019_s24  ;;  %v6598_v19 = vld [vmem:[#allocation48_spill] sm:$0xff] }
 0x7c7   :  { %v2399_v8 = vadd.f32 %v6590_v56, %v2373_v57  ;;  %v2349_v18 = vadd.f32 %v6591_v34, %v2323_v38  ;;  %v6599_v57 = vld [vmem:[#allocation42_spill] sm:$0xff] }
 0x7c8   :  { %v6055_v62 = vpop.permute.xlu0 %3015  ;;  %v6057_v55 = vpop.permute.xlu1 %1975  ;;  %v6600_v38 = vld [vmem:[#allocation46_spill] sm:$0xff] }
 0x7c9   :  { %v2425_v23 = vadd.f32 %v6592_v6, %v2399_v8  ;;  %v2375_v40 = vadd.f32 %v6593_v28, %v2349_v18  ;;  %v6601_v8 = vld [vmem:[#allocation52_spill] sm:$0xff]  ;;  %v6084_v18 = vstv %s3768_s20  ;;  %v6602_v6 = vld [vmem:[#allocation50_spill] sm:$0xff] }
 0x7ca   :  { %3217 = vrot.lane.b32.xlu1 %v3206_v51, %s4019_s24  ;;  %s3782_s24 = sld [smem:[#allocation7 + $0x54]] }
 0x7cb   :  { %v2439_v41 = vadd.f32 %v2435_v4, %v2425_v23  ;;  %v2401_v9 = vadd.f32 %v6594_v22, %v2375_v40  ;;  %v3256_v4 = vmul.f32 %v5950_v24, %v5973_v60  ;;  %v6603_v23 = vld [vmem:[#allocation56_spill] sm:$0xff]  ;;  %v6604_v22 = vld [vmem:[#allocation54_spill] sm:$0xff] }
 0x7cc   :  { %v6066_v32 = vpop.permute.xlu0 %3019  ;;  %v1998_v53 = vpop.permute.xlu1 %1997  ;;  %v3921_v40 = vld [vmem:[#allocation2 + $0x1b] sm:$0xff] }
 0x7cd   :  { %v2465_v31 = vadd.f32 %v6595_v61, %v2439_v41  ;;  %v2427_v12 = vadd.f32 %v6596_v14, %v2401_v9  ;;  %v2605_v41 = vmul.f32 %v3921_v40, %v6084_v18  ;;  %v6606_v14 = vld [vmem:[#allocation58_spill] sm:$0xff]  ;;  %v1958_v40 = vadd.f32 %v6034_v2, %v6019_v49  ;;  %v3923_v49 = vld [vmem:[#allocation2 + $0x1c] sm:$0xff] }
 0x7ce   :  { %3239 = vrot.lane.b32.xlu1 %v3230_v37, %s4020_s26  ;;  %v6605_v37 = vld [vmem:[#allocation60_spill] sm:$0xff] }
 0x7cf   :  { %v2491_v21 = vadd.f32 %v6597_v42, %v2465_v31  ;;  %v2441_v63 = vadd.f32 %v2437_v1, %v2427_v12  ;;  %v3258_v31 = vmul.f32 %v5950_v24, %v5982_v5  ;;  %v6609_v24 = vld [vmem:[#allocation68_spill] sm:$0xff] }
 0x7d0   :  { %v6075_v48 = vpop.permute.xlu0 %3041  ;;  %v2002_v11 = vpop.permute.xlu1 %2001 }
 0x7d1   :  { %v2517_v25 = vadd.f32 %v6598_v19, %v2491_v21  ;;  %v2467_v26 = vadd.f32 %v6599_v57, %v2441_v63  ;;  %v3922_v21 = vld [vmem:[#allocation2 + $0x4b] sm:$0xff] }
 0x7d2   :  { %3243 = vrot.lane.b32.xlu1 %v3232_v39, %s4020_s26  ;;  %v2607_v63 = vmul.f32 %v3922_v21, %v6084_v18  ;;  %v6607_v39 = vld [vmem:[#allocation62_spill] sm:$0xff]  ;;  %v6615_v21 = vld [vmem:[#allocation80_spill] sm:$0xff]  ;;  %s3789_s26 = sld [smem:[#allocation7 + $0x5b]] }
 0x7d3   :  { %v2493_v56 = vadd.f32 %v6600_v38, %v2467_v26  ;;  %v2543_v34 = vadd.f32 %v6601_v8, %v2517_v25  ;;  %v6608_v25 = vld [vmem:[#allocation64_spill] sm:$0xff]  ;;  %v1956_v26 = vadd.f32 %v6023_v52, %v6003_v35  ;;  %v6612_v52 = vld [vmem:[#allocation70_spill] sm:$0xff] }
 0x7d4   :  { %v6086_v51 = vpop.permute.xlu0 %3045  ;;  %v2024_v29 = vpop.permute.xlu1 %2023 }
 0x7d5   :  { %v2519_v58 = vadd.f32 %v6602_v6, %v2493_v56  ;;  %v2569_v28 = vadd.f32 %v6603_v23, %v2543_v34  ;;  %v6610_v6 = vld [vmem:[#allocation66_spill] sm:$0xff]  ;;  %v6611_v23 = vld [vmem:[#allocation72_spill] sm:$0xff] }
 0x7d6   :  { %3265 = vrot.lane.b32.xlu1 %v3256_v4, %s4021_s29  ;;  %v1982_v4 = vadd.f32 %v6044_v45, %v1956_v26 }
 0x7d7   :  { %v2545_v9 = vadd.f32 %v6604_v22, %v2519_v58  ;;  %v2595_v54 = vadd.f32 %v6605_v37, %v2569_v28  ;;  %v6115_v22 = vstv %s3775_s22 }
 0x7d8   :  { %v6096_v1 = vpop.permute.xlu0 %3067  ;;  %v2028_v61 = vpop.permute.xlu1 %2027  ;;  %v2775_v2 = vmul.f32 %v3923_v49, %v6115_v22 }
 0x7d9   :  { %v2571_v12 = vadd.f32 %v6606_v14, %v2545_v9  ;;  %v2609_v42 = vadd.f32 %v2605_v41, %v2595_v54  ;;  %v2008_v41 = vadd.f32 %v1998_v53, %v1982_v4  ;;  %v6613_v54 = vld [vmem:[#allocation76_spill] sm:$0xff]  ;;  %v1984_v14 = vadd.f32 %v6057_v55, %v1958_v40 }
 0x7da   :  { %3269 = vrot.lane.b32.xlu1 %v3258_v31, %s4021_s29 }
 0x7db   :  { %v2597_v19 = vadd.f32 %v6607_v39, %v2571_v12  ;;  %v2635_v57 = vadd.f32 %v6608_v25, %v2609_v42  ;;  %v2034_v45 = vadd.f32 %v2024_v29, %v2008_v41  ;;  %v6614_v12 = vld [vmem:[#allocation74_spill] sm:$0xff]  ;;  %v2010_v39 = vadd.f32 %v2002_v11, %v1984_v14  ;;  %v3924_v25 = vld [vmem:[#allocation2 + $0x20] sm:$0xff] }
 0x7dc   :  { %v6107_v38 = vpop.permute.xlu0 %3071  ;;  %v2050_v56 = vpop.permute.xlu1 %2049 }
 0x7dd   :  { %v2611_v8 = vadd.f32 %v2607_v63, %v2597_v19  ;;  %v2661_v34 = vadd.f32 %v6609_v24, %v2635_v57  ;;  %v2060_v19 = vadd.f32 %v2050_v56, %v2034_v45  ;;  %v2096_v57 = vmul.f32 %v3924_v25, %v5976_v46  ;;  %v6620_v45 = vld [vmem:[#allocation21_spill] sm:$0xff] }
 0x7de   :  { %v2036_v29 = vadd.f32 %v2028_v61, %v2010_v39 }
 0x7df   :  { %v2637_v58 = vadd.f32 %v6610_v6, %v2611_v8  ;;  %v2687_v28 = vadd.f32 %v6611_v23, %v2661_v34  ;;  %v6616_v8 = vld [vmem:[#allocation78_spill] sm:$0xff]  ;;  %v6617_v34 = vld [vmem:[#allocation84_spill] sm:$0xff] }
 0x7e0   :  { %v6117_v9 = vpop.permute.xlu0 %3093  ;;  %v2054_v35 = vpop.permute.xlu1 %2053  ;;  %v6618_v6 = vld [vmem:[#allocation82_spill] sm:$0xff] }
 0x7e1   :  { %v2663_v37 = vadd.f32 %v6612_v52, %v2637_v58  ;;  %v2713_v31 = vadd.f32 %v6613_v54, %v2687_v28  ;;  %v2062_v56 = vadd.f32 %v2054_v35, %v2036_v29  ;;  %v3925_v28 = vld [vmem:[#allocation2 + $0x4c] sm:$0xff] }
 0x7e2   :  { %v2777_v40 = vmul.f32 %v3925_v28, %v6115_v22  ;;  %v3926_v52 = vld [vmem:[#allocation2 + $0x50] sm:$0xff]  ;;  %v6625_v29 = vld [vmem:[#allocation33_spill] sm:$0xff] }
 0x7e3   :  { %v2689_v42 = vadd.f32 %v6614_v12, %v2663_v37  ;;  %v2739_v63 = vadd.f32 %v6615_v21, %v2713_v31  ;;  %v2098_v37 = vmul.f32 %v3926_v52, %v5976_v46  ;;  %v6619_v31 = vld [vmem:[#allocation86_spill] sm:$0xff] }
 0x7e4   :  { %v6125_v53 = vpop.permute.xlu0 %3097  ;;  %v2076_v26 = vpop.permute.xlu1 %2075 }
 0x7e5   :  { %v2715_v24 = vadd.f32 %v6616_v8, %v2689_v42  ;;  %v2765_v55 = vadd.f32 %v6617_v34, %v2739_v63  ;;  %v2086_v4 = vadd.f32 %v2076_v26, %v2060_v19  ;;  %v6621_v63 = vld [vmem:[#allocation25_spill] sm:$0xff] }
 0x7e7   :  { %v2741_v58 = vadd.f32 %v6618_v6, %v2715_v24  ;;  %v2779_v11 = vadd.f32 %v2775_v2, %v2765_v55  ;;  %v2100_v23 = vadd.f32 %v2096_v57, %v2086_v4  ;;  %v6622_v57 = vld [vmem:[#allocation29_spill] sm:$0xff]  ;;  %v6148_v24 = vstv %s3782_s24  ;;  %v6626_v6 = vld [vmem:[#allocation27_spill] sm:$0xff] }
 0x7e8   :  { %v6132_v41 = vpop.permute.xlu0 %3133  ;;  %v2080_v54 = vpop.permute.xlu1 %2079 }
 0x7e9   :  { %v2767_v14 = vadd.f32 %v6619_v31, %v2741_v58  ;;  %v2805_v61 = vadd.f32 %v5539_v3, %v2779_v11  ;;  %v2126_v12 = vadd.f32 %v6620_v45, %v2100_v23  ;;  %v2088_v42 = vadd.f32 %v2080_v54, %v2062_v56  ;;  %v6623_v3 = vld [vmem:[#allocation23_spill] sm:$0xff]  ;;  %v6628_v23 = vld [vmem:[#allocation116_spill] sm:$0xff] }
 0x7ea   :  { %v3927_v31 = vld [vmem:[#allocation2 + $0x21] sm:$0xff] }
 0x7eb   :  { %v2781_v21 = vadd.f32 %v2777_v40, %v2767_v14  ;;  %v2831_v35 = vadd.f32 %v5561_v47, %v2805_v61  ;;  %v2152_v39 = vadd.f32 %v6621_v63, %v2126_v12  ;;  %v2102_v19 = vadd.f32 %v2098_v37, %v2088_v42  ;;  %v6624_v47 = vld [vmem:[#allocation114_spill] sm:$0xff]  ;;  %v6629_v40 = vld [vmem:[#allocation37_spill] sm:$0xff]  ;;  %v6630_v37 = vld [vmem:[#allocation31_spill] sm:$0xff] }
 0x7ec   :  { %v6140_v49 = vpop.permute.xlu0 %3137  ;;  %v6142_v2 = vpop.permute.xlu1 %2929  ;;  %v2266_v14 = vmul.f32 %v3927_v31, %v6005_v10  ;;  %v6631_v61 = vld [vmem:[#allocation115_spill] sm:$0xff]  ;;  %v6632_v12 = vld [vmem:[#allocation118_spill] sm:$0xff] }
 0x7ed   :  { %v2807_v46 = vadd.f32 %v5551_v30, %v2781_v21  ;;  %v2857_v25 = vadd.f32 %v5579_v50, %v2831_v35  ;;  %v2178_v26 = vadd.f32 %v6622_v57, %v2152_v39  ;;  %v2128_v8 = vadd.f32 %v6623_v3, %v2102_v19  ;;  %v6627_v30 = vld [vmem:[#allocation113_spill] sm:$0xff]  ;;  %v6634_v63 = vld [vmem:[#allocation35_spill] sm:$0xff] }
 0x7ee   :  { %v6633_v21 = vld [vmem:[#allocation41_spill] sm:$0xff]  ;;  %v6636_v3 = vld [vmem:[#allocation39_spill] sm:$0xff] }
 0x7ef   :  { %v2833_v34 = vadd.f32 %v5569_v17, %v2807_v46  ;;  %v2883_v55 = vadd.f32 %v6624_v47, %v2857_v25  ;;  %v2204_v4 = vadd.f32 %v6625_v29, %v2178_v26  ;;  %v2154_v58 = vadd.f32 %v6626_v6, %v2128_v8  ;;  %v6635_v25 = vld [vmem:[#allocation117_spill] sm:$0xff]  ;;  %v3928_v47 = vld [vmem:[#allocation2 + $0x51] sm:$0xff] }
 0x7f0   :  { %v6154_v11 = vpop.permute.xlu0 %3159  ;;  %v6156_v56 = vpop.permute.xlu1 %2965  ;;  %v2945_v17 = vmul.f32 %v6148_v24, %v5717_v27  ;;  %v6637_v6 = vld [vmem:[#allocation45_spill] sm:$0xff] }
 0x7f1   :  { %v2859_v50 = vadd.f32 %v6627_v30, %v2833_v34  ;;  %v2909_v28 = vadd.f32 %v6628_v23, %v2883_v55  ;;  %v2230_v52 = vadd.f32 %v6629_v40, %v2204_v4  ;;  %v2180_v54 = vadd.f32 %v6630_v37, %v2154_v58  ;;  %v6638_v30 = vld [vmem:[#allocation43_spill] sm:$0xff]  ;;  %v6639_v37 = vld [vmem:[#allocation49_spill] sm:$0xff] }
 0x7f2   :  { %v2947_v34 = vmul.f32 %v6148_v24, %v5730_v15  ;;  %v2268_v55 = vmul.f32 %v3928_v47, %v6005_v10 }
 0x7f3   :  { %v2885_v45 = vadd.f32 %v6631_v61, %v2859_v50  ;;  %v2935_v42 = vadd.f32 %v6632_v12, %v2909_v28  ;;  %v2256_v35 = vadd.f32 %v6633_v21, %v2230_v52  ;;  %v2206_v39 = vadd.f32 %v6634_v63, %v2180_v54  ;;  %v6642_v21 = vld [vmem:[#allocation57_spill] sm:$0xff]  ;;  %v6643_v63 = vld [vmem:[#allocation51_spill] sm:$0xff] }
 0x7f4   :  { %v6169_v19 = vpop.permute.xlu0 %3163  ;;  %v6171_v46 = vpop.permute.xlu1 %2969  ;;  %v6190_v61 = vstv %s3789_s26 }
 0x7f5   :  { %v2911_v57 = vadd.f32 %v6635_v25, %v2885_v45  ;;  %v2949_v26 = vadd.f32 %v2945_v17, %v2935_v42  ;;  %v2270_v27 = vadd.f32 %v2266_v14, %v2256_v35  ;;  %v2232_v8 = vadd.f32 %v6636_v3, %v2206_v39  ;;  %v6644_v25 = vld [vmem:[#allocation61_spill] sm:$0xff] }
 0x7f6   :  { %v3929_v3 = vld [vmem:[#allocation2 + $0x22] sm:$0xff] }
 0x7f7   :  { %v2937_v29 = vadd.f32 %v5992_v13, %v2911_v57  ;;  %v2975_v4 = vadd.f32 %v6007_v7, %v2949_v26  ;;  %v2296_v58 = vadd.f32 %v6637_v6, %v2270_v27  ;;  %v2258_v50 = vadd.f32 %v6638_v30, %v2232_v8  ;;  %v6640_v13 = vld [vmem:[#allocation53_spill] sm:$0xff]  ;;  %v6641_v7 = vld [vmem:[#allocation47_spill] sm:$0xff] }
 0x7f8   :  { %v3186_v23 = vpop.permute.xlu0 %3185  ;;  %v6182_v28 = vpop.permute.xlu1 %2991  ;;  %v6645_v26 = vld [vmem:[#allocation55_spill] sm:$0xff]  ;;  %v2436_v8 = vmul.f32 %v3929_v3, %v6050_v20 }
 0x7f9   :  { %v2951_v40 = vadd.f32 %v2947_v34, %v2937_v29  ;;  %v3001_v52 = vadd.f32 %v6032_v43, %v2975_v4  ;;  %v2322_v54 = vadd.f32 %v6639_v37, %v2296_v58  ;;  %v2272_v15 = vadd.f32 %v2268_v55, %v2258_v50  ;;  %v6648_v50 = vld [vmem:[#allocation63_spill] sm:$0xff] }
 0x7fa   :  { %v3117_v37 = vmul.f32 %v6190_v61, %v5858_v33  ;;  %v6652_v33 = vld [vmem:[#allocation77_spill] sm:$0xff] }
 0x7fb   :  { %v2977_v17 = vadd.f32 %v6021_v16, %v2951_v40  ;;  %v3027_v10 = vadd.f32 %v6055_v62, %v3001_v52  ;;  %v2348_v31 = vadd.f32 %v6640_v13, %v2322_v54  ;;  %v2298_v14 = vadd.f32 %v6641_v7, %v2272_v15  ;;  %v3930_v52 = vld [vmem:[#allocation2 + $0x52] sm:$0xff]  ;;  %v6649_v15 = vld [vmem:[#allocation69_spill] sm:$0xff] }
 0x7fc   :  { %v3190_v45 = vpop.permute.xlu0 %3189  ;;  %v6192_v12 = vpop.permute.xlu1 %2995 }
 0x7fd   :  { %v3003_v42 = vadd.f32 %v6042_v44, %v2977_v17  ;;  %v3053_v43 = vadd.f32 %v6075_v48, %v3027_v10  ;;  %v2374_v35 = vadd.f32 %v6642_v21, %v2348_v31  ;;  %v2324_v39 = vadd.f32 %v6643_v63, %v2298_v14  ;;  %v6651_v31 = vld [vmem:[#allocation73_spill] sm:$0xff]  ;;  %v6653_v63 = vld [vmem:[#allocation71_spill] sm:$0xff] }
 0x7fe   :  { %v3115_v44 = vmul.f32 %v6190_v61, %v5846_v59  ;;  %v2438_v59 = vmul.f32 %v3930_v52, %v6050_v20 }
 0x7ff   :  { %v3029_v16 = vadd.f32 %v6066_v32, %v3003_v42  ;;  %v3079_v62 = vadd.f32 %v6096_v1, %v3053_v43  ;;  %v2400_v57 = vadd.f32 %v6644_v25, %v2374_v35  ;;  %v2350_v27 = vadd.f32 %v6645_v26, %v2324_v39  ;;  %v6646_v32 = vld [vmem:[#allocation65_spill] sm:$0xff]  ;;  %v6647_v1 = vld [vmem:[#allocation59_spill] sm:$0xff] }
 0x800   :  { %v3212_v34 = vpop.permute.xlu0 %3211  ;;  %v6205_v48 = vpop.permute.xlu1 %3017  ;;  %v6655_v25 = vld [vmem:[#allocation81_spill] sm:$0xff] }
 0x801   :  { %v3055_v47 = vadd.f32 %v6086_v51, %v3029_v16  ;;  %v3105_v55 = vadd.f32 %v6117_v9, %v3079_v62  ;;  %v2426_v29 = vadd.f32 %v6646_v32, %v2400_v57  ;;  %v2376_v4 = vadd.f32 %v6647_v1, %v2350_v27  ;;  %v6654_v62 = vld [vmem:[#allocation75_spill] sm:$0xff] }
 0x803   :  { %v3081_v6 = vadd.f32 %v6107_v38, %v3055_v47  ;;  %v2440_v58 = vadd.f32 %v2436_v8, %v2426_v29  ;;  %v3119_v30 = vadd.f32 %v3115_v44, %v3105_v55  ;;  %v2402_v40 = vadd.f32 %v6648_v50, %v2376_v4  ;;  %v6650_v38 = vld [vmem:[#allocation67_spill] sm:$0xff]  ;;  %v6657_v47 = vld [vmem:[#allocation85_spill] sm:$0xff]  ;;  %v6659_v4 = vld [vmem:[#allocation88_spill] sm:$0xff] }
 0x804   :  { %v3216_v54 = vpop.permute.xlu0 %3215  ;;  %v6216_v51 = vpop.permute.xlu1 %3021  ;;  %v3931_v29 = vld [vmem:[#allocation2 + $0x23] sm:$0xff] }
 0x805   :  { %v3107_v9 = vadd.f32 %v6125_v53, %v3081_v6  ;;  %v2466_v17 = vadd.f32 %v6649_v15, %v2440_v58  ;;  %v3145_v10 = vadd.f32 %v6132_v41, %v3119_v30  ;;  %v2428_v13 = vadd.f32 %v6650_v38, %v2402_v40 }
 0x806   :  { %v2606_v1 = vmul.f32 %v3931_v29, %v6084_v18 }
 0x807   :  { %v2492_v7 = vadd.f32 %v6651_v31, %v2466_v17  ;;  %v2442_v14 = vadd.f32 %v2438_v59, %v2428_v13  ;;  %v3121_v42 = vadd.f32 %v3117_v37, %v3107_v9  ;;  %v3171_v20 = vadd.f32 %v6154_v11, %v3145_v10  ;;  %v6656_v11 = vld [vmem:[#allocation79_spill] sm:$0xff]  ;;  %v6662_v17 = vld [vmem:[#allocation90_spill] sm:$0xff] }
 0x808   :  { %v3238_v43 = vpop.permute.xlu0 %3237  ;;  %v6224_v21 = vpop.permute.xlu1 %3043  ;;  %v3932_v37 = vld [vmem:[#allocation2 + $0x53] sm:$0xff] }
 0x809   :  { %v2518_v35 = vadd.f32 %v6652_v33, %v2492_v7  ;;  %v2468_v39 = vadd.f32 %v6653_v63, %v2442_v14  ;;  %v3147_v53 = vadd.f32 %v6140_v49, %v3121_v42  ;;  %v3197_v16 = vadd.f32 %v3186_v23, %v3171_v20  ;;  %v6658_v49 = vld [vmem:[#allocation83_spill] sm:$0xff]  ;;  %v6663_v14 = vld [vmem:[#allocation92_spill] sm:$0xff] }
 0x80a   :  { %v2608_v9 = vmul.f32 %v3932_v37, %v6084_v18 }
 0x80b   :  { %v2494_v41 = vadd.f32 %v6654_v62, %v2468_v39  ;;  %v2544_v57 = vadd.f32 %v6655_v25, %v2518_v35  ;;  %v3173_v26 = vadd.f32 %v6169_v19, %v3147_v53  ;;  %v3223_v27 = vadd.f32 %v3212_v34, %v3197_v16  ;;  %v6660_v34 = vld [vmem:[#allocation87_spill] sm:$0xff]  ;;  %v6665_v35 = vld [vmem:[#allocation94_spill] sm:$0xff]  ;;  %v6666_v53 = vld [vmem:[#allocation93_spill] sm:$0xff] }
 0x80c   :  { %v3242_v3 = vpop.permute.xlu0 %3241  ;;  %v6232_v8 = vpop.permute.xlu1 %3047  ;;  %v6667_v62 = vld [vmem:[#allocation96_spill] sm:$0xff]  ;;  %v6668_v25 = vld [vmem:[#allocation95_spill] sm:$0xff] }
 0x80d   :  { %v2520_v44 = vadd.f32 %v6656_v11, %v2494_v41  ;;  %v2570_v55 = vadd.f32 %v6657_v47, %v2544_v57  ;;  %v3199_v32 = vadd.f32 %v3190_v45, %v3173_v26  ;;  %v3249_v30 = vadd.f32 %v3238_v43, %v3223_v27  ;;  %v6661_v45 = vld [vmem:[#allocation89_spill] sm:$0xff]  ;;  %v6664_v43 = vld [vmem:[#allocation91_spill] sm:$0xff]  ;;  %v6669_v26 = vld [vmem:[#allocation98_spill] sm:$0xff] }
 0x80e   :  { %v6670_v11 = vld [vmem:[#allocation97_spill] sm:$0xff]  ;;  %v6671_v47 = vld [vmem:[#allocation100_spill] sm:$0xff] }
 0x80f   :  { %v2546_v23 = vadd.f32 %v6658_v49, %v2520_v44  ;;  %v2596_v6 = vadd.f32 %v6659_v4, %v2570_v55  ;;  %v3225_v58 = vadd.f32 %v3216_v54, %v3199_v32  ;;  %v3933_v32 = vld [vmem:[#allocation2 + $0x24] sm:$0xff]  ;;  %v6672_v49 = vld [vmem:[#allocation99_spill] sm:$0xff] }
 0x810   :  { %v3264_v50 = vpop.permute.xlu0 %3263  ;;  %v6239_v19 = vpop.permute.xlu1 %3069  ;;  %v2776_v29 = vmul.f32 %v3933_v32, %v6115_v22 }
 0x811   :  { %v2572_v40 = vadd.f32 %v6660_v34, %v2546_v23  ;;  %v2610_v52 = vadd.f32 %v2606_v1, %v2596_v6  ;;  %v3275_v59 = vadd.f32 %v3264_v50, %v3249_v30  ;;  %v3251_v38 = vadd.f32 %v3242_v3, %v3225_v58  ;;  %v6673_v30 = vld [vmem:[#allocation101_spill] sm:$0xff]  ;;  %v3934_v34 = vld [vmem:[#allocation2 + $0x54] sm:$0xff] }
 0x813   :  { %v2598_v15 = vadd.f32 %v6661_v45, %v2572_v40  ;;  %v2636_v10 = vadd.f32 %v6662_v17, %v2610_v52  ;;  %v3796_v13 = vmul.f32 -1.442695, %v3275_v59  ;;  %v2778_v40 = vmul.f32 %v3934_v34, %v6115_v22  ;;  %v6674_v52 = vld [vmem:[#allocation102_spill] sm:$0xff]  ;;  %v6675_v45 = vld [vmem:[#allocation104_spill] sm:$0xff] }
 0x814   :  { %v3268_v31 = vpop.permute.xlu0 %3267  ;;  %v6245_v7 = vpop.permute.xlu1 %3073 }
 0x815   :  { %v2612_v54 = vadd.f32 %v2608_v9, %v2598_v15  ;;  %v2662_v42 = vadd.f32 %v6663_v14, %v2636_v10  ;;  %3898 = vpow2.f32 %v3796_v13  ;;  %v3277_v20 = vadd.f32 %v3268_v31, %v3251_v38  ;;  %v6676_v38 = vld [vmem:[#allocation103_spill] sm:$0xff]  ;;  %v6677_v31 = vld [vmem:[#allocation106_spill] sm:$0xff]  ;;  %v6678_v14 = vld [vmem:[#allocation105_spill] sm:$0xff] }
 0x817   :  { %v2638_v33 = vadd.f32 %v6664_v43, %v2612_v54  ;;  %v2688_v63 = vadd.f32 %v6665_v35, %v2662_v42  ;;  %v3798_v39 = vmul.f32 -1.442695, %v3277_v20  ;;  %v6679_v20 = vld [vmem:[#allocation108_spill] sm:$0xff] }
 0x818   :  { %v6250_v18 = vpop.permute.xlu1 %3095 }
 0x819   :  { %v2664_v16 = vadd.f32 %v6666_v53, %v2638_v33  ;;  %v2714_v41 = vadd.f32 %v6667_v62, %v2688_v63  ;;  %3900 = vpow2.f32 %v3798_v39  ;;  %v6680_v33 = vld [vmem:[#allocation107_spill] sm:$0xff]  ;;  %v6681_v63 = vld [vmem:[#allocation110_spill] sm:$0xff]  ;;  %v6682_v53 = vld [vmem:[#allocation109_spill] sm:$0xff] }
 0x81a   :  { %v6683_v62 = vld [vmem:[#allocation112_spill] sm:$0xff] }
 0x81b   :  { %v2690_v57 = vadd.f32 %v6668_v25, %v2664_v16  ;;  %v2740_v27 = vadd.f32 %v6669_v26, %v2714_v41  ;;  %v2946_v25 = vmul.f32 %v6148_v24, %v5868_v36  ;;  %v6687_v36 = vmov 0.0  }
 0x81c   :  { %v6256_v3 = vpop.permute.xlu1 %3099 }
 0x81d   :  { %v2716_v44 = vadd.f32 %v6670_v11, %v2690_v57  ;;  %v2766_v55 = vadd.f32 %v6671_v47, %v2740_v27  ;;  %v6684_v27 = vld [vmem:[#allocation111_spill] sm:$0xff]  ;;  %v6685_v47 = vld [vmem:[#allocation13_spill] sm:$0xff] }
 0x81f   :  { %v3899_v1 = vpop.eup %3898  ;;  %v2742_v23 = vadd.f32 %v6672_v49, %v2716_v44  ;;  %v2780_v4 = vadd.f32 %v2776_v29, %v2766_v55  ;;  %v6686_v49 = vld [vmem:[#allocation14_spill] sm:$0xff] }
 0x820   :  { %v3291_v6 = vadd.f32 1.0, %v3899_v1  ;;  %v6262_v58 = vpop.permute.xlu1 %3135  ;;  %v2948_v1 = vmul.f32 %v6148_v24, %v5881_v0 }
 0x821   :  { %v2768_v50 = vadd.f32 %v6673_v30, %v2742_v23  ;;  %v2806_v59 = vadd.f32 %v6674_v52, %v2780_v4 }
 0x822   :  { %3902 = vrcp.f32 %v3291_v6 }
 0x823   :  { %v3901_v37 = vpop.eup %3900  ;;  %v2782_v9 = vadd.f32 %v2778_v40, %v2768_v50  ;;  %v2832_v15 = vadd.f32 %v6675_v45, %v2806_v59 }
 0x824   :  { %v3293_v17 = vadd.f32 1.0, %v3901_v37  ;;  %v6268_v10 = vpop.permute.xlu1 %3139 }
 0x825   :  { %v2808_v13 = vadd.f32 %v6676_v38, %v2782_v9  ;;  %v2858_v54 = vadd.f32 %v6677_v31, %v2832_v15  ;;  %v3116_v31 = vmul.f32 %v6190_v61, %v5973_v60 }
 0x826   :  { %3904 = vrcp.f32 %v3293_v17 }
 0x827   :  { %v2834_v42 = vadd.f32 %v6678_v14, %v2808_v13  ;;  %v2884_v43 = vadd.f32 %v6679_v20, %v2858_v54  ;;  %v3118_v20 = vmul.f32 %v6190_v61, %v5982_v5 }
 0x828   :  { %v3162_v22 = vpop.permute.xlu1 %3161 }
 0x829   :  { %v2860_v35 = vadd.f32 %v6680_v33, %v2834_v42  ;;  %v2910_v39 = vadd.f32 %v6681_v63, %v2884_v43 }
 0x82b   :  { %v2886_v16 = vadd.f32 %v6682_v53, %v2860_v35  ;;  %v2936_v41 = vadd.f32 %v6683_v62, %v2910_v39 }
 0x82c   :  { %v3903_v57 = vpop.eup %3902  ;;  %v3166_v26 = vpop.permute.xlu1 %3165 }
 0x82d   :  { %v2912_v11 = vadd.f32 %v6684_v27, %v2886_v16  ;;  %v2950_v44 = vadd.f32 %v2946_v25, %v2936_v41  ;;  %v3312_v55 = vrot.slane %v3903_v57, %v6685_v47  ;;  %v3305_v30 = vcombine.high %v3903_v57, %v6687_v36 }
 0x82f   :  { %v2938_v32 = vadd.f32 %v6142_v2, %v2912_v11  ;;  %v2976_v29 = vadd.f32 %v6156_v56, %v2950_v44  ;;  %v6287_v23 = vrot.slane %v3312_v55, %v6686_v49  ;;  %v3320_v2 = vcombine.high %v3312_v55, %v6687_v36 }
 0x830   :  { %v3905_v4 = vpop.eup %3904  ;;  %v3188_v6 = vpop.permute.xlu1 %3187  ;;  %v6307_v45 = vrot.slane %v3305_v30, %v6685_v47 }
 0x831   :  { %v2952_v50 = vadd.f32 %v2948_v1, %v2938_v32  ;;  %v3002_v34 = vadd.f32 %v6182_v28, %v2976_v29  ;;  %v3350_v40 = vcombine.high %v6287_v23, %v6687_v36  ;;  %v3410_v56 = vrot.slane %v3905_v4, %v6685_v47 }
 0x832   :  { %v6304_v9 = vrot.slane %v3320_v2, %v6686_v49  ;;  %v3403_v15 = vcombine.high %v3905_v4, %v6687_v36  ;;  %v6324_v54 = vrot.slane %v6307_v45, %v6686_v49 }
 0x833   :  { %v2978_v52 = vadd.f32 %v6171_v46, %v2952_v50  ;;  %v3028_v0 = vadd.f32 %v6205_v48, %v3002_v34  ;;  %3503 = vrot.lane.b32.xlu0 %v3350_v40, %s4012_s14  ;;  %v6299_v59 = vrot.slane %v3410_v56, %v6686_v49  ;;  %v3418_v48 = vcombine.high %v3410_v56, %v6687_v36 }
 0x834   :  { %v3192_v24 = vpop.permute.xlu1 %3191 }
 0x835   :  { %v3004_v37 = vadd.f32 %v6192_v12, %v2978_v52  ;;  %v3054_v28 = vadd.f32 %v6224_v21, %v3028_v0  ;;  %v3448_v46 = vcombine.high %v6299_v59, %v6687_v36  ;;  %v3351_v0 = vcombine.high %v6304_v9, %v6687_v36 }
 0x837   :  { %v3030_v17 = vadd.f32 %v6216_v51, %v3004_v37  ;;  %v3080_v38 = vadd.f32 %v6239_v19, %v3054_v28  ;;  %3511 = vrot.lane.b32.xlu0 %v6304_v9, %s4011_s13  ;;  %3505 = vrot.lane.b32.xlu1 %v3448_v46, %s4012_s14  ;;  %v3432_v51 = vrot.slane %v3418_v48, %v6686_v49 }
 0x838   :  { %v3214_v12 = vpop.permute.xlu1 %3213  ;;  %v6328_v19 = vrot.slane %v3403_v15, %v6685_v47  ;;  %v3352_v9 = vcombine.high %v6324_v54, %v6687_v36 }
 0x839   :  { %v3056_v21 = vadd.f32 %v6232_v8, %v3030_v17  ;;  %v3106_v13 = vadd.f32 %v6250_v18, %v3080_v38  ;;  %v3449_v48 = vcombine.high %v3432_v51, %v6687_v36  ;;  %v3335_v38 = vcombine.high %v6307_v45, %v6687_v36 }
 0x83a   :  { %v3440_v43 = vrot.slane %v6328_v19, %v6686_v49 }
 0x83b   :  { %v3082_v14 = vadd.f32 %v6245_v7, %v3056_v21  ;;  %v3120_v42 = vadd.f32 %v3116_v31, %v3106_v13  ;;  %3527 = vrot.lane.b32.xlu0 %v6324_v54, %s4009_s11  ;;  %3513 = vrot.lane.b32.xlu1 %v3432_v51, %s4011_s13  ;;  %v3433_v21 = vcombine.high %v6328_v19, %v6687_v36 }
 0x83c   :  { %v3218_v8 = vpop.permute.xlu1 %3217 }
 0x83d   :  { %v3108_v60 = vadd.f32 %v6256_v3, %v3082_v14  ;;  %v3146_v18 = vadd.f32 %v6262_v58, %v3120_v42  ;;  %v3447_v31 = vrot.slane %v3433_v21, %v6686_v49 }
 0x83f   :  { %v3122_v33 = vadd.f32 %v3118_v20, %v3108_v60  ;;  %v3172_v35 = vadd.f32 %v3162_v22, %v3146_v18  ;;  %3529 = vrot.lane.b32.xlu1 %v3440_v43, %s4009_s11  ;;  %v3451_v20 = vcombine.high %v3447_v31, %v6687_v36 }
 0x840   :  { %v3240_v7 = vpop.permute.xlu1 %3239 }
 0x841   :  { %v3148_v63 = vadd.f32 %v6268_v10, %v3122_v33  ;;  %v3198_v39 = vadd.f32 %v3188_v6, %v3172_v35 }
 0x843   :  { %v3174_v53 = vadd.f32 %v3166_v26, %v3148_v63  ;;  %v3224_v16 = vadd.f32 %v3214_v12, %v3198_v39  ;;  %v3349_v12 = vrot.slane %v3335_v38, %v6686_v49 }
 0x844   :  { %v3244_v62 = vpop.permute.xlu1 %3243 }
 0x845   :  { %v3200_v3 = vadd.f32 %v3192_v24, %v3174_v53  ;;  %v3250_v58 = vadd.f32 %v3240_v7, %v3224_v16 }
 0x847   :  { %v3226_v41 = vadd.f32 %v3218_v8, %v3200_v3  ;;  %v3353_v8 = vcombine.high %v3349_v12, %v6687_v36 }
 0x848   :  { %v3266_v25 = vpop.permute.xlu1 %3265 }
 0x849   :  { %v3276_v57 = vadd.f32 %v3266_v25, %v3250_v58  ;;  %v3252_v5 = vadd.f32 %v3244_v62, %v3226_v41 }
 0x84b   :  { %v3797_v61 = vmul.f32 -1.442695, %v3276_v57 }
 0x84c   :  { %v3270_v27 = vpop.permute.xlu1 %3269 }
 0x84d   :  { %3906 = vpow2.f32 %v3797_v61  ;;  %v3278_v11 = vadd.f32 %v3270_v27, %v3252_v5 }
 0x84f   :  { %v3799_v22 = vmul.f32 -1.442695, %v3278_v11 }
 0x851   :  { %3908 = vpow2.f32 %v3799_v22 }
 0x857   :  { %v3907_v44 = vpop.eup %3906 }
 0x858   :  { %v3292_v55 = vadd.f32 1.0, %v3907_v44 }
 0x85a   :  { %3910 = vrcp.f32 %v3292_v55 }
 0x85b   :  { %v3909_v10 = vpop.eup %3908 }
 0x85c   :  { %v3294_v32 = vadd.f32 1.0, %v3909_v10 }
 0x85e   :  { %3912 = vrcp.f32 %v3294_v32 }
 0x864   :  { %v3911_v26 = vpop.eup %3910 }
 0x865   :  { %v3361_v29 = vrot.slane %v3911_v26, %v6685_v47  ;;  %v3354_v52 = vcombine.high %v3911_v26, %v6687_v36 }
 0x867   :  { %v6344_v1 = vrot.slane %v3361_v29, %v6686_v49  ;;  %v3369_v30 = vcombine.high %v3361_v29, %v6687_v36  ;;  %v3368_v37 = vrot.slane %v3354_v52, %v6685_v47 }
 0x868   :  { %v3913_v4 = vpop.eup %3912 }
 0x869   :  { %v3399_v6 = vcombine.high %v6344_v1, %v6687_v36  ;;  %v3459_v50 = vrot.slane %v3913_v4, %v6685_v47  ;;  %v3383_v40 = vrot.slane %v3369_v30, %v6686_v49  ;;  %v3452_v28 = vcombine.high %v3913_v4, %v6687_v36 }
 0x86a   :  { %v3391_v46 = vrot.slane %v3368_v37, %v6686_v49  ;;  %v3384_v51 = vcombine.high %v3368_v37, %v6687_v36 }
 0x86b   :  { %3559 = vrot.lane.b32.xlu0 %v3399_v6, %s4012_s14  ;;  %v6352_v34 = vrot.slane %v3459_v50, %v6686_v49  ;;  %v3467_v56 = vcombine.high %v3459_v50, %v6687_v36  ;;  %v3466_v15 = vrot.slane %v3452_v28, %v6685_v47  ;;  %v3450_v47 = vcombine.high %v3440_v43, %v6687_v36 }
 0x86c   :  { %v3400_v13 = vcombine.high %v3383_v40, %v6687_v36  ;;  %v3401_v45 = vcombine.high %v3391_v46, %v6687_v36  ;;  %v3398_v19 = vrot.slane %v3384_v51, %v6686_v49 }
 0x86d   :  { %v3497_v2 = vcombine.high %v6352_v34, %v6687_v36  ;;  %v3481_v24 = vrot.slane %v3467_v56, %v6686_v49  ;;  %v3489_v17 = vrot.slane %v3466_v15, %v6686_v49  ;;  %v3482_v42 = vcombine.high %v3466_v15, %v6687_v36 }
 0x86e   :  { %v3402_v18 = vcombine.high %v3398_v19, %v6687_v36 }
 0x86f   :  { %3567 = vrot.lane.b32.xlu0 %v3383_v40, %s4011_s13  ;;  %3561 = vrot.lane.b32.xlu1 %v3497_v2, %s4012_s14  ;;  %v3498_v54 = vcombine.high %v3481_v24, %v6687_v36  ;;  %v3499_v14 = vcombine.high %v3489_v17, %v6687_v36  ;;  %v3496_v60 = vrot.slane %v3482_v42, %v6686_v49 }
 0x871   :  { %v3500_v43 = vcombine.high %v3496_v60, %v6687_v36 }
 0x873   :  { %3519 = vrot.lane.b32.xlu0 %v3351_v0, %s4010_s12  ;;  %3569 = vrot.lane.b32.xlu1 %v3481_v24, %s4011_s13 }
 0x877   :  { %3583 = vrot.lane.b32.xlu0 %v3391_v46, %s4009_s11  ;;  %3521 = vrot.lane.b32.xlu1 %v3449_v48, %s4010_s12 }
 0x87b   :  { %3535 = vrot.lane.b32.xlu0 %v3352_v9, %s4008_s10  ;;  %3585 = vrot.lane.b32.xlu1 %v3489_v17, %s4009_s11 }
 0x87f   :  { %3543 = vrot.lane.b32.xlu0 %v3349_v12, %s4007_s9  ;;  %3537 = vrot.lane.b32.xlu1 %v3450_v47, %s4008_s10 }
 0x883   :  { %3575 = vrot.lane.b32.xlu0 %v3400_v13, %s4010_s12  ;;  %3545 = vrot.lane.b32.xlu1 %v3447_v31, %s4007_s9  ;;  %v6688_v13 = vld [vmem:[#allocation12_spill] sm:$0xff] }
 0x887   :  { %3591 = vrot.lane.b32.xlu0 %v3401_v45, %s4008_s10  ;;  %3577 = vrot.lane.b32.xlu1 %v3498_v54, %s4010_s12 }
 0x88b   :  { %3599 = vrot.lane.b32.xlu0 %v3398_v19, %s4007_s9  ;;  %3593 = vrot.lane.b32.xlu1 %v3499_v14, %s4008_s10 }
 0x88f   :  { %3551 = vrot.lane.b32.xlu0 %v3353_v8, %s4006_s2  ;;  %3601 = vrot.lane.b32.xlu1 %v3496_v60, %s4007_s9  ;;  %v3303_v60 = vld [vmem:[#allocation8] sm:$0xff] }
 0x893   :  { %3607 = vrot.lane.b32.xlu0 %v3402_v18, %s4006_s2  ;;  %3553 = vrot.lane.b32.xlu1 %v3451_v20, %s4006_s2 }
 0x897   :  { %3609 = vrot.lane.b32.xlu1 %v3500_v43, %s4006_s2  ;;  %s4022_s2 = smov [#allocation8]  }
 0x898   :  { %s3681_s9 = sshll.u32 %s4022_s2, 4  ;;  %s3682_s9 = int_to_ptr.vmem [resolvable:$true] %s3681_s9 }
 0x899   :  { %s3969_s10 = scalar_lea.vmem %s3682_s9, 256  ;;  %p3974_p0 = scmp.lt.s32.totalorder %s3682_s9, %s3682_s9 }
 0x89a   :  { %p3970_p13 = scmp.ne.s32.totalorder %s3682_s9, %s3969_s10  ;;  %p3975_p1 = scmp.lt.s32.totalorder %s3969_s10, %s3969_s10 }
 0x89c   :  { %p3976_p2 = por %p3975_p1, %p3974_p0 }
 0x89e   :  { %p3977_p3 = pnand %p3976_p2, %p3970_p13 }
 0x8a5   :  { %v3504_v33 = vpop.permute.xlu0 %3503 }
 0x8a6   :  { %v3614_v55 = vsel %vm3613_vm10, %v6287_v23, %v3504_v33 }
 0x8a9   :  { %v3506_v35 = vpop.permute.xlu1 %3505  ;;  %v3512_v7 = vpop.permute.xlu0 %3511 }
 0x8aa   :  { %v3617_v10 = vsel %vm3616_vm11, %v3614_v55, %v3512_v7  ;;  %v3615_v30 = vsel %vm3613_vm10, %v6299_v59, %v3506_v35  ;;  %v3304_v35 = vld [vmem:[#allocation8 + $0x8] sm:$0xff] }
 0x8ad   :  { %v3514_v49 = vpop.permute.xlu1 %3513  ;;  %v3528_v63 = vpop.permute.xlu0 %3527 }
 0x8ae   :  { %v3618_v23 = vsel %vm3616_vm11, %v3615_v30, %v3514_v49 }
 0x8b1   :  { %v3530_v39 = vpop.permute.xlu1 %3529 }
 0x8dd   :  { %v3560_v53 = vpop.permute.xlu0 %3559 }
 0x8de   :  { %v3634_v29 = vsel %vm3613_vm10, %v6344_v1, %v3560_v53 }
 0x8e1   :  { %v3568_v16 = vpop.permute.xlu0 %3567  ;;  %v3562_v62 = vpop.permute.xlu1 %3561 }
 0x8e2   :  { %v3636_v6 = vsel %vm3616_vm11, %v3634_v29, %v3568_v16  ;;  %v3635_v1 = vsel %vm3613_vm10, %v6352_v34, %v3562_v62 }
 0x8e5   :  { %v3520_v3 = vpop.permute.xlu0 %3519  ;;  %v3570_v41 = vpop.permute.xlu1 %3569 }
 0x8e6   :  { %v3620_v4 = vsel %vm3619_vm12, %v3617_v10, %v3520_v3  ;;  %v3637_v24 = vsel %vm3616_vm11, %v3635_v1, %v3570_v41 }
 0x8e7   :  { %v3623_v40 = vsel %vm3622_vm13, %v3620_v4, %v3528_v63 }
 0x8e9   :  { %v3584_v58 = vpop.permute.xlu0 %3583  ;;  %v3522_v25 = vpop.permute.xlu1 %3521 }
 0x8ea   :  { %v3621_v52 = vsel %vm3619_vm12, %v3618_v23, %v3522_v25 }
 0x8eb   :  { %v3624_v15 = vsel %vm3622_vm13, %v3621_v52, %v3530_v39 }
 0x8ed   :  { %v3536_v57 = vpop.permute.xlu0 %3535  ;;  %v3586_v5 = vpop.permute.xlu1 %3585 }
 0x8ee   :  { %v3626_v0 = vsel %vm3625_vm14, %v3623_v40, %v3536_v57 }
 0x8f1   :  { %v3544_v61 = vpop.permute.xlu0 %3543  ;;  %v3538_v27 = vpop.permute.xlu1 %3537 }
 0x8f2   :  { %v3629_v59 = vsel %vm3628_vm15, %v3626_v0, %v3544_v61  ;;  %v3627_v38 = vsel %vm3625_vm14, %v3624_v15, %v3538_v27 }
 0x8f5   :  { %v3576_v36 = vpop.permute.xlu0 %3575  ;;  %v3546_v11 = vpop.permute.xlu1 %3545 }
 0x8f6   :  { %v3638_v50 = vsel %vm3619_vm12, %v3636_v6, %v3576_v36  ;;  %v3630_v47 = vsel %vm3628_vm15, %v3627_v38, %v3546_v11 }
 0x8f7   :  { %v3640_v37 = vsel %vm3622_vm13, %v3638_v50, %v3584_v58 }
 0x8f9   :  { %v3592_v22 = vpop.permute.xlu0 %3591  ;;  %v3578_v44 = vpop.permute.xlu1 %3577 }
 0x8fa   :  { %v3642_v28 = vsel %vm3625_vm14, %v3640_v37, %v3592_v22  ;;  %v3639_v46 = vsel %vm3619_vm12, %v3637_v24, %v3578_v44 }
 0x8fb   :  { %v3641_v21 = vsel %vm3622_vm13, %v3639_v46, %v3586_v5 }
 0x8fd   :  { %v3600_v32 = vpop.permute.xlu0 %3599  ;;  %v3594_v26 = vpop.permute.xlu1 %3593 }
 0x8fe   :  { %v3644_v34 = vsel %vm3628_vm15, %v3642_v28, %v3600_v32  ;;  %v3643_v54 = vsel %vm3625_vm14, %v3641_v21, %v3594_v26 }
 0x901   :  { %v3552_v2 = vpop.permute.xlu0 %3551  ;;  %v3602_v56 = vpop.permute.xlu1 %3601 }
 0x902   :  { %v3632_v48 = vsel %vm3631_vm0, %v3629_v59, %v3552_v2  ;;  %v3645_v19 = vsel %vm3628_vm15, %v3643_v54, %v3602_v56 }
 0x903   :  { %v3651_v31 = vrot.slane %v3632_v48, %v6688_v13 }
 0x905   :  { %v3608_v9 = vpop.permute.xlu0 %3607  ;;  %v3554_v17 = vpop.permute.xlu1 %3553 }
 0x906   :  { %v3646_v12 = vsel %vm3631_vm0, %v3644_v34, %v3608_v9  ;;  %v3633_v51 = vsel %vm3631_vm0, %v3630_v47, %v3554_v17 }
 0x907   :  { %v3655_v45 = vrot.slane %v3646_v12, %v6688_v13  ;;  %v3659_v18 = vrot.slane %v3633_v51, %v6688_v13 }
 0x909   :  { %v3668_v14 = vcombine.low %v3651_v31, %v3655_v45  ;;  %v3610_v42 = vpop.permute.xlu1 %3609 }
 0x90a   :  { %v3647_v8 = vsel %vm3631_vm0, %v3645_v19, %v3610_v42 }
 0x90b   :  { %v3663_v20 = vrot.slane %v3647_v8, %v6688_v13  ;;  %v3672_v43 = vmul.f32 %v3668_v14, %v3303_v60 }
 0x90d   :  { %v3669_v33 = vcombine.low %v3659_v18, %v3663_v20  ;;  %3674 = vst [vmem:[#allocation8] sm:$0xff] %v3672_v43 }
 0x90f   :  { %v3673_v7 = vmul.f32 %v3669_v33, %v3304_v35 }
 0x911   :  { %3675 = vst [vmem:[#allocation8 + $0x8] sm:$0xff] %v3673_v7 }
 0x912   :  { %3980 = shalt.err (!%p3977_p3)
}
 0x913   :  { %s3981_s13 = scalar_lea.hbm %s6465_s4, 256 }
 0x914   :  { %p3982_p4 = scmp.ne.s32.totalorder %s6465_s4, %s3981_s13  ;;  %p3985_p5 = scmp.lt.u32.totalorder %s3981_s13, %s6465_s4 }
 0x916   :  { %p3987_p6 = pnand %p3985_p5, %p3982_p4 }
 0x918   :  { %3990 = shalt.err (!%p3987_p6)
}
 0x919   :  { %3687 = dma.vmem_to_hbm [thread:$0]  %s3682_s9, 256, %s6465_s4, [#allocation5], %s3998_s3, %s3998_s3, %s3999_s28  }
 0x91a   :  { %3995 = dma.done.wait [#allocation5], 256  }
 0x91b   :  { %3996 = vsyncadd [#allocation5], 4294967040 }
 0x91c   :  { %3691 = vsyncpa [#allocation4], 1 }
 0x91d   :  { %3692 = vsyncpa [#allocation5], 1 }
 0x91e   :  { %3693 = vsyncpa [#allocation6], 1 }

</bundles_post_ra>
